<compile_context>
chip_gen: v5e
topology: v5e:2x2
jax: 0.10.0
libtpu: 0.0.40
codegen_flags: <defaults>
</compile_context>

<pallas_src>
import numpy as np
import jax
import jax.numpy as jnp
from jax.experimental import pallas as pl
from jax.experimental.pallas import tpu as pltpu


# --------- fused Conv3d(k=3, s=1, p=1) + bias + ReLU + MaxPool3d(1,2,2) ---------

def _conv_relu_pool_kernel(x_ref, w_ref, b_ref, o_ref, pad_ref):
    """One batch item.

    x_ref:   (1, D, H, W*Cin)        bf16  unpadded channels-last input
    w_ref:   (9, W*Cin, 2*Wo*Cout)   bf16  banded weight, one matrix per (kd, kh)
    b_ref:   (1, Wo*Cout)            f32   bias tiled over wo
    o_ref:   (1, D, Ho, Wo*Cout)     bf16  pooled output
    pad_ref: (D+2, H+2, W*Cin)       bf16  VMEM scratch, zero-padded in D and H
    """
    _, D, H, WC = x_ref.shape
    Ho = H // 2
    N = w_ref.shape[-1]
    half = N // 2                                   # = Wo * Cout

    # Zero-pad in D and H inside VMEM (no HBM round trip; W pad is folded
    # into the banded weight).
    pad_ref[...] = jnp.zeros_like(pad_ref)
    pad_ref[1:D + 1, 1:H + 1, :] = x_ref[0]

    # 9 lane-dense MXU dots: K = W*Cin, N = 2*Wo*Cout.
    acc = jnp.zeros((D * H, N), jnp.float32)
    for kd in range(3):
        for kh in range(3):
            a = pad_ref[kd:kd + D, kh:kh + H, :].reshape(D * H, WC)
            acc = acc + jnp.dot(a, w_ref[kd * 3 + kh],
                                preferred_element_type=jnp.float32)

    # MaxPool3d(1,2,2): W-pool = max of the two 128-lane-aligned column halves
    # (columns ordered (pw, wo, cout)); H-pool = max of even/odd rows.
    yw = jnp.maximum(acc[:, :half], acc[:, half:])          # (D*H, Wo*Cout)
    q = yw.reshape(D * Ho, 2, half)
    yhw = jnp.maximum(q[:, 0, :], q[:, 1, :])                # (D*Ho, Wo*Cout)

    # bias + ReLU commute with the max-pool (bias constant per window).
    out = jnp.maximum(yhw + b_ref[...], 0.0)
    o_ref[0] = out.reshape(D, Ho, half).astype(o_ref.dtype)


def _conv3d_relu_pool(x, w_banded, bias_tiled):
    """x: [B, D, H, W*Cin] bf16 -> [B, D, H//2, (W//2)*Cout] bf16."""
    B, D, H, WC = x.shape
    assert H % 2 == 0, "fused MaxPool3d(1,2,2) needs even H"
    N = w_banded.shape[-1]
    WoC = N // 2
    Ho = H // 2

    return pl.pallas_call(
        _conv_relu_pool_kernel,
        out_shape=jax.ShapeDtypeStruct((B, D, Ho, WoC), jnp.bfloat16),
        grid=(B,),
        in_specs=[
            pl.BlockSpec((1, D, H, WC), lambda b: (b, 0, 0, 0)),
            pl.BlockSpec((9, WC, N), lambda b: (0, 0, 0)),
            pl.BlockSpec((1, WoC), lambda b: (0, 0)),
        ],
        out_specs=pl.BlockSpec((1, D, Ho, WoC), lambda b: (b, 0, 0, 0)),
        scratch_shapes=[pltpu.VMEM((D + 2, H + 2, WC), jnp.bfloat16)],
        compiler_params=pltpu.CompilerParams(
            dimension_semantics=("parallel",)),
    )(x, w_banded, bias_tiled)


# ------------------------------ fc + sigmoid*10 -------------------------------

def _fc_kernel(a_ref, w_ref, b_ref, o_ref):
    y = jnp.dot(a_ref[...], w_ref[...], preferred_element_type=jnp.float32)
    o_ref[...] = jax.nn.sigmoid(y + b_ref[...]) * 10.0


def _fc_sigmoid10(flat, w, b):
    """flat: [B, F] bf16, w: [F, Rp] bf16 (pre-permuted, R padded to 128),
    b: [1, Rp] f32 -> [B, Rp] f32. Single-step: F*Rp*2 bytes is ~0.4 MB here.
    """
    B, F = flat.shape
    Rp = w.shape[1]
    return pl.pallas_call(
        _fc_kernel,
        out_shape=jax.ShapeDtypeStruct((B, Rp), jnp.float32),
        grid=(1,),
        in_specs=[
            pl.BlockSpec((B, F), lambda i: (0, 0)),
            pl.BlockSpec((F, Rp), lambda i: (0, 0)),
            pl.BlockSpec((1, Rp), lambda i: (0, 0)),
        ],
        out_specs=pl.BlockSpec((B, Rp), lambda i: (0, 0)),
    )(flat, w, b)


# ------------------------------ forward / params ------------------------------

def video_rating_forward(x, p, *, num_ratings):
    """x: [B, 3, frames, H, W] (NCDHW, like the torch module)."""
    B, C, D, H, W = x.shape
    # Channels-last once, with (W, C) folded into the lane dim.
    x = jnp.transpose(x, (0, 2, 3, 4, 1)).reshape(B, D, H, W * C)
    x = x.astype(jnp.bfloat16)
    x = _conv3d_relu_pool(x, p["conv1_w"], p["conv1_b"])
    # Dropout3d(0.2): identity at inference (eval mode).
    x = _conv3d_relu_pool(x, p["conv2_w"], p["conv2_b"])
    flat = x.reshape(x.shape[0], -1)                 # (d, h, w, c) order, bf16
    y = _fc_sigmoid10(flat, p["fc_w"], p["fc_b"])
    return y[:, :num_ratings]


def init_params(key, num_ratings, input_frames, input_h, input_w):
    """Parameters in the same layouts as the PyTorch module."""
    k1, k2, k3, k4, k5, k6 = jax.random.split(key, 6)
    flattened = 32 * input_frames * (input_h // 4) * (input_w // 4)
    return {
        "conv1_w": 0.05 * jax.random.normal(k1, (16, 3, 3, 3, 3), jnp.float32),
        "conv1_b": 0.01 * jax.random.normal(k2, (16,), jnp.float32),
        "conv2_w": 0.05 * jax.random.normal(k3, (32, 16, 3, 3, 3), jnp.float32),
        "conv2_b": 0.01 * jax.random.normal(k4, (32,), jnp.float32),
        "fc_w": 0.02 * jax.random.normal(k5, (num_ratings, flattened), jnp.float32),
        "fc_b": 0.01 * jax.random.normal(k6, (num_ratings,), jnp.float32),
    }


def _banded_conv_weight(w, W):
    """torch Conv3d weight [Cout, Cin, 3, 3, 3] -> [9, W*Cin, 2*Wo*Cout] bf16.

    One banded matrix per (kd, kh): row (w', cin) x column (pw, wo, cout)
    holds w[:, :, kd, kh, kw].T where w' = 2*wo + pw + kw - 1; out-of-range
    taps (the W zero-padding) are simply left as zeros.
    """
    assert W % 2 == 0
    w = np.asarray(w, np.float32)
    Cout, Cin = w.shape[0], w.shape[1]
    Wo = W // 2
    band = np.zeros((3, 3, W * Cin, 2 * Wo * Cout), np.float32)
    for kd in range(3):
        for kh in range(3):
            for kw in range(3):
                tap = w[:, :, kd, kh, kw].T                    # (Cin, Cout)
                for pw in range(2):
                    for wo in range(Wo):
                        wp = 2 * wo + pw + kw - 1
                        if 0 <= wp < W:
                            r0 = wp * Cin
                            c0 = (pw * Wo + wo) * Cout
                            band[kd, kh, r0:r0 + Cin, c0:c0 + Cout] = tap
    return jnp.asarray(band.reshape(9, W * Cin, 2 * Wo * Cout), jnp.bfloat16)


def prepare_params(p, input_frames, input_h, input_w, r_pad=128):
    """One-time (offline) repack of torch-layout params for the kernels."""
    r, f = p["fc_w"].shape
    assert r <= r_pad
    d, h4, w4 = input_frames, input_h // 4, input_w // 4
    # torch flattens (c, d, h, w); the kernels flatten channels-last
    # (d, h, w, c) -- permute the fc weight once here, then zero-pad R -> 128
    # so the fc output store is lane-dense / unmasked.
    fc_w = (jnp.transpose(p["fc_w"].reshape(r, 32, d, h4, w4), (2, 3, 4, 1, 0))
            .reshape(f, r))
    fc_w = jnp.pad(fc_w, ((0, 0), (0, r_pad - r))).astype(jnp.bfloat16)
    fc_b = jnp.pad(p["fc_b"], (0, r_pad - r)).reshape(1, r_pad).astype(jnp.float32)
    return {
        "conv1_w": _banded_conv_weight(p["conv1_w"], input_w),
        "conv1_b": jnp.tile(p["conv1_b"], input_w // 2)
                      .reshape(1, -1).astype(jnp.float32),
        "conv2_w": _banded_conv_weight(p["conv2_w"], input_w // 2),
        "conv2_b": jnp.tile(p["conv2_b"], input_w // 4)
                      .reshape(1, -1).astype(jnp.float32),
        "fc_w": fc_w,
        "fc_b": fc_b,
    }


# ------------------------------------ main ------------------------------------

if __name__ == "__main__":
    # small shapes consistent with the module: B=2, C=3 (RGB), frames=3, 16x16
    B, C, FRAMES, H, W = 2, 3, 3, 16, 16
    NUM_RATINGS = 7

    key = jax.random.PRNGKey(0)
    kx, kp = jax.random.split(key)
    x = jax.random.normal(kx, (B, C, FRAMES, H, W), jnp.float32)
    params = prepare_params(init_params(kp, NUM_RATINGS, FRAMES, H, W),
                            FRAMES, H, W)

    fwd = jax.jit(video_rating_forward, static_argnames="num_ratings")
    out = fwd(x, params, num_ratings=NUM_RATINGS)
    out = jax.block_until_ready(out)

    assert out.shape == (B, NUM_RATINGS), out.shape
    assert bool(jnp.all((out > 0.0) & (out < 10.0)))
    print("KERNEL_OK")
</pallas_src>

<mosaic_0001>
module attributes {stable_mosaic.version = 11 : i64} {
  func.func @_conv_relu_pool_kernel(%arg0: i32, %arg1: memref<1x3x16x48xbf16, #tpu.memory_space<vmem>>, %arg2: memref<9x48x256xbf16, #tpu.memory_space<vmem>>, %arg3: memref<1x128xf32, #tpu.memory_space<vmem>>, %arg4: memref<1x3x8x128xbf16, #tpu.memory_space<vmem>>, %arg5: memref<5x18x48xbf16, #tpu.memory_space<vmem>>) attributes {dimension_semantics = [#tpu.dimension_semantics<parallel>], iteration_bounds = array<i64: 2>, scalar_prefetch = 0 : i64, scratch_operands = 1 : i64, tpu.core_type = #tpu.core_type<tc>, window_params = [{transform_indices = @transform_0, window_bounds = array<i64: 1, 3, 16, 48>}, {pipeline_mode = #tpu.pipeline_mode<synchronous>, transform_indices = @transform_1, window_bounds = array<i64: 9, 48, 256>}, {pipeline_mode = #tpu.pipeline_mode<synchronous>, transform_indices = @transform_2, window_bounds = array<i64: 1, 128>}, {transform_indices = @transform_3, window_bounds = array<i64: 1, 3, 8, 128>}]} {
    %cst = arith.constant 0.000000e+00 : bf16
    %0 = vector.broadcast %cst : bf16 to vector<5x18x48xbf16>
    %c0 = arith.constant 0 : index
    %c0_0 = arith.constant 0 : index
    %c0_1 = arith.constant 0 : index
    %1 = vector.load %arg5[%c0, %c0_0, %c0_1] : memref<5x18x48xbf16, #tpu.memory_space<vmem>>, vector<5x18x48xbf16>
    tpu.vector_store %arg5[%c0, %c0_0, %c0_1], %0 {strides = array<i32>} : memref<5x18x48xbf16, #tpu.memory_space<vmem>>, vector<5x18x48xbf16>,
    %c0_2 = arith.constant 0 : index
    %c0_3 = arith.constant 0 : index
    %c0_4 = arith.constant 0 : index
    %c0_5 = arith.constant 0 : index
    %2 = vector.load %arg1[%c0_2, %c0_3, %c0_4, %c0_5] : memref<1x3x16x48xbf16, #tpu.memory_space<vmem>>, vector<1x3x16x48xbf16>
    %3 = vector.shape_cast %2 : vector<1x3x16x48xbf16> to vector<3x16x48xbf16>
    %c1 = arith.constant 1 : index
    %c1_6 = arith.constant 1 : index
    %c0_7 = arith.constant 0 : index
    %4 = vector.load %arg5[%c1, %c1_6, %c0_7] : memref<5x18x48xbf16, #tpu.memory_space<vmem>>, vector<3x16x48xbf16>
    tpu.vector_store %arg5[%c1, %c1_6, %c0_7], %3 {strides = array<i32>} : memref<5x18x48xbf16, #tpu.memory_space<vmem>>, vector<3x16x48xbf16>,
    %cst_8 = arith.constant 0.000000e+00 : f32
    %5 = vector.broadcast %cst_8 : f32 to vector<48x256xf32>
    %c0_9 = arith.constant 0 : index
    %c0_10 = arith.constant 0 : index
    %c0_11 = arith.constant 0 : index
    %6 = vector.load %arg5[%c0_9, %c0_10, %c0_11] : memref<5x18x48xbf16, #tpu.memory_space<vmem>>, vector<3x16x48xbf16>
    %7 = vector.shape_cast %6 : vector<3x16x48xbf16> to vector<48x48xbf16>
    %c0_12 = arith.constant 0 : index
    %c0_13 = arith.constant 0 : index
    %c0_14 = arith.constant 0 : index
    %8 = vector.load %arg2[%c0_12, %c0_13, %c0_14] : memref<9x48x256xbf16, #tpu.memory_space<vmem>>, vector<1x48x256xbf16>
    %9 = vector.shape_cast %8 : vector<1x48x256xbf16> to vector<48x256xbf16>
    %cst_15 = arith.constant dense<0.000000e+00> : vector<48x256xf32>
    %10 = tpu.matmul %7, %9, %cst_15 {dimension_numbers = #tpu.dot_dimension_numbers<[1], [0], [0], [1], [0, 0, 1, 1], [], []>} : vector<48x48xbf16>, vector<48x256xbf16>, vector<48x256xf32> -> vector<48x256xf32>
    %11 = arith.addf %5, %10 : vector<48x256xf32>
    %c0_16 = arith.constant 0 : index
    %c1_17 = arith.constant 1 : index
    %c0_18 = arith.constant 0 : index
    %12 = vector.load %arg5[%c0_16, %c1_17, %c0_18] : memref<5x18x48xbf16, #tpu.memory_space<vmem>>, vector<3x16x48xbf16>
    %13 = vector.shape_cast %12 : vector<3x16x48xbf16> to vector<48x48xbf16>
    %c1_19 = arith.constant 1 : index
    %c0_20 = arith.constant 0 : index
    %c0_21 = arith.constant 0 : index
    %14 = vector.load %arg2[%c1_19, %c0_20, %c0_21] : memref<9x48x256xbf16, #tpu.memory_space<vmem>>, vector<1x48x256xbf16>
    %15 = vector.shape_cast %14 : vector<1x48x256xbf16> to vector<48x256xbf16>
    %cst_22 = arith.constant dense<0.000000e+00> : vector<48x256xf32>
    %16 = tpu.matmul %13, %15, %cst_22 {dimension_numbers = #tpu.dot_dimension_numbers<[1], [0], [0], [1], [0, 0, 1, 1], [], []>} : vector<48x48xbf16>, vector<48x256xbf16>, vector<48x256xf32> -> vector<48x256xf32>
    %17 = arith.addf %11, %16 : vector<48x256xf32>
    %c0_23 = arith.constant 0 : index
    %c2 = arith.constant 2 : index
    %c0_24 = arith.constant 0 : index
    %18 = vector.load %arg5[%c0_23, %c2, %c0_24] : memref<5x18x48xbf16, #tpu.memory_space<vmem>>, vector<3x16x48xbf16>
    %19 = vector.shape_cast %18 : vector<3x16x48xbf16> to vector<48x48xbf16>
    %c2_25 = arith.constant 2 : index
    %c0_26 = arith.constant 0 : index
    %c0_27 = arith.constant 0 : index
    %20 = vector.load %arg2[%c2_25, %c0_26, %c0_27] : memref<9x48x256xbf16, #tpu.memory_space<vmem>>, vector<1x48x256xbf16>
    %21 = vector.shape_cast %20 : vector<1x48x256xbf16> to vector<48x256xbf16>
    %cst_28 = arith.constant dense<0.000000e+00> : vector<48x256xf32>
    %22 = tpu.matmul %19, %21, %cst_28 {dimension_numbers = #tpu.dot_dimension_numbers<[1], [0], [0], [1], [0, 0, 1, 1], [], []>} : vector<48x48xbf16>, vector<48x256xbf16>, vector<48x256xf32> -> vector<48x256xf32>
    %23 = arith.addf %17, %22 : vector<48x256xf32>
    %c1_29 = arith.constant 1 : index
    %c0_30 = arith.constant 0 : index
    %c0_31 = arith.constant 0 : index
    %24 = vector.load %arg5[%c1_29, %c0_30, %c0_31] : memref<5x18x48xbf16, #tpu.memory_space<vmem>>, vector<3x16x48xbf16>
    %25 = vector.shape_cast %24 : vector<3x16x48xbf16> to vector<48x48xbf16>
    %c3 = arith.constant 3 : index
    %c0_32 = arith.constant 0 : index
    %c0_33 = arith.constant 0 : index
    %26 = vector.load %arg2[%c3, %c0_32, %c0_33] : memref<9x48x256xbf16, #tpu.memory_space<vmem>>, vector<1x48x256xbf16>
    %27 = vector.shape_cast %26 : vector<1x48x256xbf16> to vector<48x256xbf16>
    %cst_34 = arith.constant dense<0.000000e+00> : vector<48x256xf32>
    %28 = tpu.matmul %25, %27, %cst_34 {dimension_numbers = #tpu.dot_dimension_numbers<[1], [0], [0], [1], [0, 0, 1, 1], [], []>} : vector<48x48xbf16>, vector<48x256xbf16>, vector<48x256xf32> -> vector<48x256xf32>
    %29 = arith.addf %23, %28 : vector<48x256xf32>
    %c1_35 = arith.constant 1 : index
    %c1_36 = arith.constant 1 : index
    %c0_37 = arith.constant 0 : index
    %30 = vector.load %arg5[%c1_35, %c1_36, %c0_37] : memref<5x18x48xbf16, #tpu.memory_space<vmem>>, vector<3x16x48xbf16>
    %31 = vector.shape_cast %30 : vector<3x16x48xbf16> to vector<48x48xbf16>
    %c4 = arith.constant 4 : index
    %c0_38 = arith.constant 0 : index
    %c0_39 = arith.constant 0 : index
    %32 = vector.load %arg2[%c4, %c0_38, %c0_39] : memref<9x48x256xbf16, #tpu.memory_space<vmem>>, vector<1x48x256xbf16>
    %33 = vector.shape_cast %32 : vector<1x48x256xbf16> to vector<48x256xbf16>
    %cst_40 = arith.constant dense<0.000000e+00> : vector<48x256xf32>
    %34 = tpu.matmul %31, %33, %cst_40 {dimension_numbers = #tpu.dot_dimension_numbers<[1], [0], [0], [1], [0, 0, 1, 1], [], []>} : vector<48x48xbf16>, vector<48x256xbf16>, vector<48x256xf32> -> vector<48x256xf32>
    %35 = arith.addf %29, %34 : vector<48x256xf32>
    %c1_41 = arith.constant 1 : index
    %c2_42 = arith.constant 2 : index
    %c0_43 = arith.constant 0 : index
    %36 = vector.load %arg5[%c1_41, %c2_42, %c0_43] : memref<5x18x48xbf16, #tpu.memory_space<vmem>>, vector<3x16x48xbf16>
    %37 = vector.shape_cast %36 : vector<3x16x48xbf16> to vector<48x48xbf16>
    %c5 = arith.constant 5 : index
    %c0_44 = arith.constant 0 : index
    %c0_45 = arith.constant 0 : index
    %38 = vector.load %arg2[%c5, %c0_44, %c0_45] : memref<9x48x256xbf16, #tpu.memory_space<vmem>>, vector<1x48x256xbf16>
    %39 = vector.shape_cast %38 : vector<1x48x256xbf16> to vector<48x256xbf16>
    %cst_46 = arith.constant dense<0.000000e+00> : vector<48x256xf32>
    %40 = tpu.matmul %37, %39, %cst_46 {dimension_numbers = #tpu.dot_dimension_numbers<[1], [0], [0], [1], [0, 0, 1, 1], [], []>} : vector<48x48xbf16>, vector<48x256xbf16>, vector<48x256xf32> -> vector<48x256xf32>
    %41 = arith.addf %35, %40 : vector<48x256xf32>
    %c2_47 = arith.constant 2 : index
    %c0_48 = arith.constant 0 : index
    %c0_49 = arith.constant 0 : index
    %42 = vector.load %arg5[%c2_47, %c0_48, %c0_49] : memref<5x18x48xbf16, #tpu.memory_space<vmem>>, vector<3x16x48xbf16>
    %43 = vector.shape_cast %42 : vector<3x16x48xbf16> to vector<48x48xbf16>
    %c6 = arith.constant 6 : index
    %c0_50 = arith.constant 0 : index
    %c0_51 = arith.constant 0 : index
    %44 = vector.load %arg2[%c6, %c0_50, %c0_51] : memref<9x48x256xbf16, #tpu.memory_space<vmem>>, vector<1x48x256xbf16>
    %45 = vector.shape_cast %44 : vector<1x48x256xbf16> to vector<48x256xbf16>
    %cst_52 = arith.constant dense<0.000000e+00> : vector<48x256xf32>
    %46 = tpu.matmul %43, %45, %cst_52 {dimension_numbers = #tpu.dot_dimension_numbers<[1], [0], [0], [1], [0, 0, 1, 1], [], []>} : vector<48x48xbf16>, vector<48x256xbf16>, vector<48x256xf32> -> vector<48x256xf32>
    %47 = arith.addf %41, %46 : vector<48x256xf32>
    %c2_53 = arith.constant 2 : index
    %c1_54 = arith.constant 1 : index
    %c0_55 = arith.constant 0 : index
    %48 = vector.load %arg5[%c2_53, %c1_54, %c0_55] : memref<5x18x48xbf16, #tpu.memory_space<vmem>>, vector<3x16x48xbf16>
    %49 = vector.shape_cast %48 : vector<3x16x48xbf16> to vector<48x48xbf16>
    %c7 = arith.constant 7 : index
    %c0_56 = arith.constant 0 : index
    %c0_57 = arith.constant 0 : index
    %50 = vector.load %arg2[%c7, %c0_56, %c0_57] : memref<9x48x256xbf16, #tpu.memory_space<vmem>>, vector<1x48x256xbf16>
    %51 = vector.shape_cast %50 : vector<1x48x256xbf16> to vector<48x256xbf16>
    %cst_58 = arith.constant dense<0.000000e+00> : vector<48x256xf32>
    %52 = tpu.matmul %49, %51, %cst_58 {dimension_numbers = #tpu.dot_dimension_numbers<[1], [0], [0], [1], [0, 0, 1, 1], [], []>} : vector<48x48xbf16>, vector<48x256xbf16>, vector<48x256xf32> -> vector<48x256xf32>
    %53 = arith.addf %47, %52 : vector<48x256xf32>
    %c2_59 = arith.constant 2 : index
    %c2_60 = arith.constant 2 : index
    %c0_61 = arith.constant 0 : index
    %54 = vector.load %arg5[%c2_59, %c2_60, %c0_61] : memref<5x18x48xbf16, #tpu.memory_space<vmem>>, vector<3x16x48xbf16>
    %55 = vector.shape_cast %54 : vector<3x16x48xbf16> to vector<48x48xbf16>
    %c8 = arith.constant 8 : index
    %c0_62 = arith.constant 0 : index
    %c0_63 = arith.constant 0 : index
    %56 = vector.load %arg2[%c8, %c0_62, %c0_63] : memref<9x48x256xbf16, #tpu.memory_space<vmem>>, vector<1x48x256xbf16>
    %57 = vector.shape_cast %56 : vector<1x48x256xbf16> to vector<48x256xbf16>
    %cst_64 = arith.constant dense<0.000000e+00> : vector<48x256xf32>
    %58 = tpu.matmul %55, %57, %cst_64 {dimension_numbers = #tpu.dot_dimension_numbers<[1], [0], [0], [1], [0, 0, 1, 1], [], []>} : vector<48x48xbf16>, vector<48x256xbf16>, vector<48x256xf32> -> vector<48x256xf32>
    %59 = arith.addf %53, %58 : vector<48x256xf32>
    %60 = vector.extract_strided_slice %59 {offsets = [0, 0], sizes = [48, 128], strides = [1, 1]} : vector<48x256xf32> to vector<48x128xf32>
    %61 = vector.extract_strided_slice %59 {offsets = [0, 128], sizes = [48, 128], strides = [1, 1]} : vector<48x256xf32> to vector<48x128xf32>
    %62 = arith.maximumf %60, %61 : vector<48x128xf32>
    %63 = vector.shape_cast %62 : vector<48x128xf32> to vector<24x2x128xf32>
    %64 = vector.extract_strided_slice %63 {offsets = [0, 0, 0], sizes = [24, 1, 128], strides = [1, 1, 1]} : vector<24x2x128xf32> to vector<24x1x128xf32>
    %65 = vector.shape_cast %64 : vector<24x1x128xf32> to vector<24x128xf32>
    %66 = vector.extract_strided_slice %63 {offsets = [0, 1, 0], sizes = [24, 1, 128], strides = [1, 1, 1]} : vector<24x2x128xf32> to vector<24x1x128xf32>
    %67 = vector.shape_cast %66 : vector<24x1x128xf32> to vector<24x128xf32>
    %68 = arith.maximumf %65, %67 : vector<24x128xf32>
    %c0_65 = arith.constant 0 : index
    %c0_66 = arith.constant 0 : index
    %69 = vector.load %arg3[%c0_65, %c0_66] : memref<1x128xf32, #tpu.memory_space<vmem>>, vector<1x128xf32>
    %70 = vector.broadcast %69 : vector<1x128xf32> to vector<24x128xf32>
    %71 = arith.addf %68, %70 : vector<24x128xf32>
    %cst_67 = arith.constant 0.000000e+00 : f32
    %72 = vector.broadcast %cst_67 : f32 to vector<24x128xf32>
    %73 = arith.maximumf %71, %72 : vector<24x128xf32>
    %74 = vector.shape_cast %73 : vector<24x128xf32> to vector<3x8x128xf32>
    %75 = arith.truncf %74 : vector<3x8x128xf32> to vector<3x8x128xbf16>
    %c0_68 = arith.constant 0 : index
    %c0_69 = arith.constant 0 : index
    %c0_70 = arith.constant 0 : index
    %c0_71 = arith.constant 0 : index
    %76 = vector.load %arg4[%c0_68, %c0_69, %c0_70, %c0_71] : memref<1x3x8x128xbf16, #tpu.memory_space<vmem>>, vector<1x3x8x128xbf16>
    %77 = vector.shape_cast %76 : vector<1x3x8x128xbf16> to vector<3x8x128xbf16>
    %78 = vector.shape_cast %75 : vector<3x8x128xbf16> to vector<1x3x8x128xbf16>
    tpu.vector_store %arg4[%c0_68, %c0_69, %c0_70, %c0_71], %78 {strides = array<i32>} : memref<1x3x8x128xbf16, #tpu.memory_space<vmem>>, vector<1x3x8x128xbf16>,
    return
  }
  func.func @transform_0(%arg0: i32) -> (i32, i32, i32, i32) {
    %c0_i32 = arith.constant 0 : i32
    %c0_i32_0 = arith.constant 0 : i32
    %c0_i32_1 = arith.constant 0 : i32
    %c0_i32_2 = arith.constant 0 : i32
    return %arg0, %c0_i32, %c0_i32_0, %c0_i32_1 : i32, i32, i32, i32
  }
  func.func @transform_1(%arg0: i32) -> (i32, i32, i32) {
    %c0_i32 = arith.constant 0 : i32
    %c0_i32_0 = arith.constant 0 : i32
    %c0_i32_1 = arith.constant 0 : i32
    %c0_i32_2 = arith.constant 0 : i32
    return %c0_i32, %c0_i32_0, %c0_i32_1 : i32, i32, i32
  }
  func.func @transform_2(%arg0: i32) -> (i32, i32) {
    %c0_i32 = arith.constant 0 : i32
    %c0_i32_0 = arith.constant 0 : i32
    %c0_i32_1 = arith.constant 0 : i32
    return %c0_i32, %c0_i32_0 : i32, i32
  }
  func.func @transform_3(%arg0: i32) -> (i32, i32, i32, i32) {
    %c0_i32 = arith.constant 0 : i32
    %c0_i32_0 = arith.constant 0 : i32
    %c0_i32_1 = arith.constant 0 : i32
    %c0_i32_2 = arith.constant 0 : i32
    return %arg0, %c0_i32, %c0_i32_0, %c0_i32_1 : i32, i32, i32, i32
  }
}

module attributes {stable_mosaic.version = 11 : i64} {
  func.func @_conv_relu_pool_kernel(%arg0: i32, %arg1: memref<1x3x8x128xbf16, #tpu.memory_space<vmem>>, %arg2: memref<9x128x256xbf16, #tpu.memory_space<vmem>>, %arg3: memref<1x128xf32, #tpu.memory_space<vmem>>, %arg4: memref<1x3x4x128xbf16, #tpu.memory_space<vmem>>, %arg5: memref<5x10x128xbf16, #tpu.memory_space<vmem>>) attributes {dimension_semantics = [#tpu.dimension_semantics<parallel>], iteration_bounds = array<i64: 2>, scalar_prefetch = 0 : i64, scratch_operands = 1 : i64, tpu.core_type = #tpu.core_type<tc>, window_params = [{transform_indices = @transform_0, window_bounds = array<i64: 1, 3, 8, 128>}, {pipeline_mode = #tpu.pipeline_mode<synchronous>, transform_indices = @transform_1, window_bounds = array<i64: 9, 128, 256>}, {pipeline_mode = #tpu.pipeline_mode<synchronous>, transform_indices = @transform_2, window_bounds = array<i64: 1, 128>}, {transform_indices = @transform_3, window_bounds = array<i64: 1, 3, 4, 128>}]} {
    %cst = arith.constant 0.000000e+00 : bf16
    %0 = vector.broadcast %cst : bf16 to vector<5x10x128xbf16>
    %c0 = arith.constant 0 : index
    %c0_0 = arith.constant 0 : index
    %c0_1 = arith.constant 0 : index
    %1 = vector.load %arg5[%c0, %c0_0, %c0_1] : memref<5x10x128xbf16, #tpu.memory_space<vmem>>, vector<5x10x128xbf16>
    tpu.vector_store %arg5[%c0, %c0_0, %c0_1], %0 {strides = array<i32>} : memref<5x10x128xbf16, #tpu.memory_space<vmem>>, vector<5x10x128xbf16>,
    %c0_2 = arith.constant 0 : index
    %c0_3 = arith.constant 0 : index
    %c0_4 = arith.constant 0 : index
    %c0_5 = arith.constant 0 : index
    %2 = vector.load %arg1[%c0_2, %c0_3, %c0_4, %c0_5] : memref<1x3x8x128xbf16, #tpu.memory_space<vmem>>, vector<1x3x8x128xbf16>
    %3 = vector.shape_cast %2 : vector<1x3x8x128xbf16> to vector<3x8x128xbf16>
    %c1 = arith.constant 1 : index
    %c1_6 = arith.constant 1 : index
    %c0_7 = arith.constant 0 : index
    %4 = vector.load %arg5[%c1, %c1_6, %c0_7] : memref<5x10x128xbf16, #tpu.memory_space<vmem>>, vector<3x8x128xbf16>
    tpu.vector_store %arg5[%c1, %c1_6, %c0_7], %3 {strides = array<i32>} : memref<5x10x128xbf16, #tpu.memory_space<vmem>>, vector<3x8x128xbf16>,
    %cst_8 = arith.constant 0.000000e+00 : f32
    %5 = vector.broadcast %cst_8 : f32 to vector<24x256xf32>
    %c0_9 = arith.constant 0 : index
    %c0_10 = arith.constant 0 : index
    %c0_11 = arith.constant 0 : index
    %6 = vector.load %arg5[%c0_9, %c0_10, %c0_11] : memref<5x10x128xbf16, #tpu.memory_space<vmem>>, vector<3x8x128xbf16>
    %7 = vector.shape_cast %6 : vector<3x8x128xbf16> to vector<24x128xbf16>
    %c0_12 = arith.constant 0 : index
    %c0_13 = arith.constant 0 : index
    %c0_14 = arith.constant 0 : index
    %8 = vector.load %arg2[%c0_12, %c0_13, %c0_14] : memref<9x128x256xbf16, #tpu.memory_space<vmem>>, vector<1x128x256xbf16>
    %9 = vector.shape_cast %8 : vector<1x128x256xbf16> to vector<128x256xbf16>
    %cst_15 = arith.constant dense<0.000000e+00> : vector<24x256xf32>
    %10 = tpu.matmul %7, %9, %cst_15 {dimension_numbers = #tpu.dot_dimension_numbers<[1], [0], [0], [1], [0, 0, 1, 1], [], []>} : vector<24x128xbf16>, vector<128x256xbf16>, vector<24x256xf32> -> vector<24x256xf32>
    %11 = arith.addf %5, %10 : vector<24x256xf32>
    %c0_16 = arith.constant 0 : index
    %c1_17 = arith.constant 1 : index
    %c0_18 = arith.constant 0 : index
    %12 = vector.load %arg5[%c0_16, %c1_17, %c0_18] : memref<5x10x128xbf16, #tpu.memory_space<vmem>>, vector<3x8x128xbf16>
    %13 = vector.shape_cast %12 : vector<3x8x128xbf16> to vector<24x128xbf16>
    %c1_19 = arith.constant 1 : index
    %c0_20 = arith.constant 0 : index
    %c0_21 = arith.constant 0 : index
    %14 = vector.load %arg2[%c1_19, %c0_20, %c0_21] : memref<9x128x256xbf16, #tpu.memory_space<vmem>>, vector<1x128x256xbf16>
    %15 = vector.shape_cast %14 : vector<1x128x256xbf16> to vector<128x256xbf16>
    %cst_22 = arith.constant dense<0.000000e+00> : vector<24x256xf32>
    %16 = tpu.matmul %13, %15, %cst_22 {dimension_numbers = #tpu.dot_dimension_numbers<[1], [0], [0], [1], [0, 0, 1, 1], [], []>} : vector<24x128xbf16>, vector<128x256xbf16>, vector<24x256xf32> -> vector<24x256xf32>
    %17 = arith.addf %11, %16 : vector<24x256xf32>
    %c0_23 = arith.constant 0 : index
    %c2 = arith.constant 2 : index
    %c0_24 = arith.constant 0 : index
    %18 = vector.load %arg5[%c0_23, %c2, %c0_24] : memref<5x10x128xbf16, #tpu.memory_space<vmem>>, vector<3x8x128xbf16>
    %19 = vector.shape_cast %18 : vector<3x8x128xbf16> to vector<24x128xbf16>
    %c2_25 = arith.constant 2 : index
    %c0_26 = arith.constant 0 : index
    %c0_27 = arith.constant 0 : index
    %20 = vector.load %arg2[%c2_25, %c0_26, %c0_27] : memref<9x128x256xbf16, #tpu.memory_space<vmem>>, vector<1x128x256xbf16>
    %21 = vector.shape_cast %20 : vector<1x128x256xbf16> to vector<128x256xbf16>
    %cst_28 = arith.constant dense<0.000000e+00> : vector<24x256xf32>
    %22 = tpu.matmul %19, %21, %cst_28 {dimension_numbers = #tpu.dot_dimension_numbers<[1], [0], [0], [1], [0, 0, 1, 1], [], []>} : vector<24x128xbf16>, vector<128x256xbf16>, vector<24x256xf32> -> vector<24x256xf32>
    %23 = arith.addf %17, %22 : vector<24x256xf32>
    %c1_29 = arith.constant 1 : index
    %c0_30 = arith.constant 0 : index
    %c0_31 = arith.constant 0 : index
    %24 = vector.load %arg5[%c1_29, %c0_30, %c0_31] : memref<5x10x128xbf16, #tpu.memory_space<vmem>>, vector<3x8x128xbf16>
    %25 = vector.shape_cast %24 : vector<3x8x128xbf16> to vector<24x128xbf16>
    %c3 = arith.constant 3 : index
    %c0_32 = arith.constant 0 : index
    %c0_33 = arith.constant 0 : index
    %26 = vector.load %arg2[%c3, %c0_32, %c0_33] : memref<9x128x256xbf16, #tpu.memory_space<vmem>>, vector<1x128x256xbf16>
    %27 = vector.shape_cast %26 : vector<1x128x256xbf16> to vector<128x256xbf16>
    %cst_34 = arith.constant dense<0.000000e+00> : vector<24x256xf32>
    %28 = tpu.matmul %25, %27, %cst_34 {dimension_numbers = #tpu.dot_dimension_numbers<[1], [0], [0], [1], [0, 0, 1, 1], [], []>} : vector<24x128xbf16>, vector<128x256xbf16>, vector<24x256xf32> -> vector<24x256xf32>
    %29 = arith.addf %23, %28 : vector<24x256xf32>
    %c1_35 = arith.constant 1 : index
    %c1_36 = arith.constant 1 : index
    %c0_37 = arith.constant 0 : index
    %30 = vector.load %arg5[%c1_35, %c1_36, %c0_37] : memref<5x10x128xbf16, #tpu.memory_space<vmem>>, vector<3x8x128xbf16>
    %31 = vector.shape_cast %30 : vector<3x8x128xbf16> to vector<24x128xbf16>
    %c4 = arith.constant 4 : index
    %c0_38 = arith.constant 0 : index
    %c0_39 = arith.constant 0 : index
    %32 = vector.load %arg2[%c4, %c0_38, %c0_39] : memref<9x128x256xbf16, #tpu.memory_space<vmem>>, vector<1x128x256xbf16>
    %33 = vector.shape_cast %32 : vector<1x128x256xbf16> to vector<128x256xbf16>
    %cst_40 = arith.constant dense<0.000000e+00> : vector<24x256xf32>
    %34 = tpu.matmul %31, %33, %cst_40 {dimension_numbers = #tpu.dot_dimension_numbers<[1], [0], [0], [1], [0, 0, 1, 1], [], []>} : vector<24x128xbf16>, vector<128x256xbf16>, vector<24x256xf32> -> vector<24x256xf32>
    %35 = arith.addf %29, %34 : vector<24x256xf32>
    %c1_41 = arith.constant 1 : index
    %c2_42 = arith.constant 2 : index
    %c0_43 = arith.constant 0 : index
    %36 = vector.load %arg5[%c1_41, %c2_42, %c0_43] : memref<5x10x128xbf16, #tpu.memory_space<vmem>>, vector<3x8x128xbf16>
    %37 = vector.shape_cast %36 : vector<3x8x128xbf16> to vector<24x128xbf16>
    %c5 = arith.constant 5 : index
    %c0_44 = arith.constant 0 : index
    %c0_45 = arith.constant 0 : index
    %38 = vector.load %arg2[%c5, %c0_44, %c0_45] : memref<9x128x256xbf16, #tpu.memory_space<vmem>>, vector<1x128x256xbf16>
    %39 = vector.shape_cast %38 : vector<1x128x256xbf16> to vector<128x256xbf16>
    %cst_46 = arith.constant dense<0.000000e+00> : vector<24x256xf32>
    %40 = tpu.matmul %37, %39, %cst_46 {dimension_numbers = #tpu.dot_dimension_numbers<[1], [0], [0], [1], [0, 0, 1, 1], [], []>} : vector<24x128xbf16>, vector<128x256xbf16>, vector<24x256xf32> -> vector<24x256xf32>
    %41 = arith.addf %35, %40 : vector<24x256xf32>
    %c2_47 = arith.constant 2 : index
    %c0_48 = arith.constant 0 : index
    %c0_49 = arith.constant 0 : index
    %42 = vector.load %arg5[%c2_47, %c0_48, %c0_49] : memref<5x10x128xbf16, #tpu.memory_space<vmem>>, vector<3x8x128xbf16>
    %43 = vector.shape_cast %42 : vector<3x8x128xbf16> to vector<24x128xbf16>
    %c6 = arith.constant 6 : index
    %c0_50 = arith.constant 0 : index
    %c0_51 = arith.constant 0 : index
    %44 = vector.load %arg2[%c6, %c0_50, %c0_51] : memref<9x128x256xbf16, #tpu.memory_space<vmem>>, vector<1x128x256xbf16>
    %45 = vector.shape_cast %44 : vector<1x128x256xbf16> to vector<128x256xbf16>
    %cst_52 = arith.constant dense<0.000000e+00> : vector<24x256xf32>
    %46 = tpu.matmul %43, %45, %cst_52 {dimension_numbers = #tpu.dot_dimension_numbers<[1], [0], [0], [1], [0, 0, 1, 1], [], []>} : vector<24x128xbf16>, vector<128x256xbf16>, vector<24x256xf32> -> vector<24x256xf32>
    %47 = arith.addf %41, %46 : vector<24x256xf32>
    %c2_53 = arith.constant 2 : index
    %c1_54 = arith.constant 1 : index
    %c0_55 = arith.constant 0 : index
    %48 = vector.load %arg5[%c2_53, %c1_54, %c0_55] : memref<5x10x128xbf16, #tpu.memory_space<vmem>>, vector<3x8x128xbf16>
    %49 = vector.shape_cast %48 : vector<3x8x128xbf16> to vector<24x128xbf16>
    %c7 = arith.constant 7 : index
    %c0_56 = arith.constant 0 : index
    %c0_57 = arith.constant 0 : index
    %50 = vector.load %arg2[%c7, %c0_56, %c0_57] : memref<9x128x256xbf16, #tpu.memory_space<vmem>>, vector<1x128x256xbf16>
    %51 = vector.shape_cast %50 : vector<1x128x256xbf16> to vector<128x256xbf16>
    %cst_58 = arith.constant dense<0.000000e+00> : vector<24x256xf32>
    %52 = tpu.matmul %49, %51, %cst_58 {dimension_numbers = #tpu.dot_dimension_numbers<[1], [0], [0], [1], [0, 0, 1, 1], [], []>} : vector<24x128xbf16>, vector<128x256xbf16>, vector<24x256xf32> -> vector<24x256xf32>
    %53 = arith.addf %47, %52 : vector<24x256xf32>
    %c2_59 = arith.constant 2 : index
    %c2_60 = arith.constant 2 : index
    %c0_61 = arith.constant 0 : index
    %54 = vector.load %arg5[%c2_59, %c2_60, %c0_61] : memref<5x10x128xbf16, #tpu.memory_space<vmem>>, vector<3x8x128xbf16>
    %55 = vector.shape_cast %54 : vector<3x8x128xbf16> to vector<24x128xbf16>
    %c8 = arith.constant 8 : index
    %c0_62 = arith.constant 0 : index
    %c0_63 = arith.constant 0 : index
    %56 = vector.load %arg2[%c8, %c0_62, %c0_63] : memref<9x128x256xbf16, #tpu.memory_space<vmem>>, vector<1x128x256xbf16>
    %57 = vector.shape_cast %56 : vector<1x128x256xbf16> to vector<128x256xbf16>
    %cst_64 = arith.constant dense<0.000000e+00> : vector<24x256xf32>
    %58 = tpu.matmul %55, %57, %cst_64 {dimension_numbers = #tpu.dot_dimension_numbers<[1], [0], [0], [1], [0, 0, 1, 1], [], []>} : vector<24x128xbf16>, vector<128x256xbf16>, vector<24x256xf32> -> vector<24x256xf32>
    %59 = arith.addf %53, %58 : vector<24x256xf32>
    %60 = vector.extract_strided_slice %59 {offsets = [0, 0], sizes = [24, 128], strides = [1, 1]} : vector<24x256xf32> to vector<24x128xf32>
    %61 = vector.extract_strided_slice %59 {offsets = [0, 128], sizes = [24, 128], strides = [1, 1]} : vector<24x256xf32> to vector<24x128xf32>
    %62 = arith.maximumf %60, %61 : vector<24x128xf32>
    %63 = vector.shape_cast %62 : vector<24x128xf32> to vector<12x2x128xf32>
    %64 = vector.extract_strided_slice %63 {offsets = [0, 0, 0], sizes = [12, 1, 128], strides = [1, 1, 1]} : vector<12x2x128xf32> to vector<12x1x128xf32>
    %65 = vector.shape_cast %64 : vector<12x1x128xf32> to vector<12x128xf32>
    %66 = vector.extract_strided_slice %63 {offsets = [0, 1, 0], sizes = [12, 1, 128], strides = [1, 1, 1]} : vector<12x2x128xf32> to vector<12x1x128xf32>
    %67 = vector.shape_cast %66 : vector<12x1x128xf32> to vector<12x128xf32>
    %68 = arith.maximumf %65, %67 : vector<12x128xf32>
    %c0_65 = arith.constant 0 : index
    %c0_66 = arith.constant 0 : index
    %69 = vector.load %arg3[%c0_65, %c0_66] : memref<1x128xf32, #tpu.memory_space<vmem>>, vector<1x128xf32>
    %70 = vector.broadcast %69 : vector<1x128xf32> to vector<12x128xf32>
    %71 = arith.addf %68, %70 : vector<12x128xf32>
    %cst_67 = arith.constant 0.000000e+00 : f32
    %72 = vector.broadcast %cst_67 : f32 to vector<12x128xf32>
    %73 = arith.maximumf %71, %72 : vector<12x128xf32>
    %74 = vector.shape_cast %73 : vector<12x128xf32> to vector<3x4x128xf32>
    %75 = arith.truncf %74 : vector<3x4x128xf32> to vector<3x4x128xbf16>
    %c0_68 = arith.constant 0 : index
    %c0_69 = arith.constant 0 : index
    %c0_70 = arith.constant 0 : index
    %c0_71 = arith.constant 0 : index
    %76 = vector.load %arg4[%c0_68, %c0_69, %c0_70, %c0_71] : memref<1x3x4x128xbf16, #tpu.memory_space<vmem>>, vector<1x3x4x128xbf16>
    %77 = vector.shape_cast %76 : vector<1x3x4x128xbf16> to vector<3x4x128xbf16>
    %78 = vector.shape_cast %75 : vector<3x4x128xbf16> to vector<1x3x4x128xbf16>
    tpu.vector_store %arg4[%c0_68, %c0_69, %c0_70, %c0_71], %78 {strides = array<i32>} : memref<1x3x4x128xbf16, #tpu.memory_space<vmem>>, vector<1x3x4x128xbf16>,
    return
  }
  func.func @transform_0(%arg0: i32) -> (i32, i32, i32, i32) {
    %c0_i32 = arith.constant 0 : i32
    %c0_i32_0 = arith.constant 0 : i32
    %c0_i32_1 = arith.constant 0 : i32
    %c0_i32_2 = arith.constant 0 : i32
    return %arg0, %c0_i32, %c0_i32_0, %c0_i32_1 : i32, i32, i32, i32
  }
  func.func @transform_1(%arg0: i32) -> (i32, i32, i32) {
    %c0_i32 = arith.constant 0 : i32
    %c0_i32_0 = arith.constant 0 : i32
    %c0_i32_1 = arith.constant 0 : i32
    %c0_i32_2 = arith.constant 0 : i32
    return %c0_i32, %c0_i32_0, %c0_i32_1 : i32, i32, i32
  }
  func.func @transform_2(%arg0: i32) -> (i32, i32) {
    %c0_i32 = arith.constant 0 : i32
    %c0_i32_0 = arith.constant 0 : i32
    %c0_i32_1 = arith.constant 0 : i32
    return %c0_i32, %c0_i32_0 : i32, i32
  }
  func.func @transform_3(%arg0: i32) -> (i32, i32, i32, i32) {
    %c0_i32 = arith.constant 0 : i32
    %c0_i32_0 = arith.constant 0 : i32
    %c0_i32_1 = arith.constant 0 : i32
    %c0_i32_2 = arith.constant 0 : i32
    return %arg0, %c0_i32, %c0_i32_0, %c0_i32_1 : i32, i32, i32, i32
  }
}

module attributes {stable_mosaic.version = 11 : i64} {
  func.func @_fc_kernel(%arg0: i32, %arg1: memref<2x1536xbf16, #tpu.memory_space<vmem>>, %arg2: memref<1536x128xbf16, #tpu.memory_space<vmem>>, %arg3: memref<1x128xf32, #tpu.memory_space<vmem>>, %arg4: memref<2x128xf32, #tpu.memory_space<vmem>>) attributes {dimension_semantics = [#tpu.dimension_semantics<arbitrary>], iteration_bounds = array<i64: 1>, scalar_prefetch = 0 : i64, scratch_operands = 0 : i64, tpu.core_type = #tpu.core_type<tc>, window_params = [{pipeline_mode = #tpu.pipeline_mode<synchronous>, transform_indices = @transform_0, window_bounds = array<i64: 2, 1536>}, {pipeline_mode = #tpu.pipeline_mode<synchronous>, transform_indices = @transform_1, window_bounds = array<i64: 1536, 128>}, {pipeline_mode = #tpu.pipeline_mode<synchronous>, transform_indices = @transform_2, window_bounds = array<i64: 1, 128>}, {pipeline_mode = #tpu.pipeline_mode<synchronous>, transform_indices = @transform_3, window_bounds = array<i64: 2, 128>}]} {
    %c0 = arith.constant 0 : index
    %c0_0 = arith.constant 0 : index
    %0 = vector.load %arg1[%c0, %c0_0] : memref<2x1536xbf16, #tpu.memory_space<vmem>>, vector<2x1536xbf16>
    %c0_1 = arith.constant 0 : index
    %c0_2 = arith.constant 0 : index
    %1 = vector.load %arg2[%c0_1, %c0_2] : memref<1536x128xbf16, #tpu.memory_space<vmem>>, vector<1536x128xbf16>
    %cst = arith.constant dense<0.000000e+00> : vector<2x128xf32>
    %2 = tpu.matmul %0, %1, %cst {dimension_numbers = #tpu.dot_dimension_numbers<[1], [0], [0], [1], [0, 0, 1, 1], [], []>} : vector<2x1536xbf16>, vector<1536x128xbf16>, vector<2x128xf32> -> vector<2x128xf32>
    %c0_3 = arith.constant 0 : index
    %c0_4 = arith.constant 0 : index
    %3 = vector.load %arg3[%c0_3, %c0_4] : memref<1x128xf32, #tpu.memory_space<vmem>>, vector<1x128xf32>
    %4 = vector.broadcast %3 : vector<1x128xf32> to vector<2x128xf32>
    %5 = arith.addf %2, %4 : vector<2x128xf32>
    %6 = arith.negf %5 : vector<2x128xf32>
    %7 = math.exp %6 : vector<2x128xf32>
    %cst_5 = arith.constant 1.000000e+00 : f32
    %8 = vector.broadcast %cst_5 : f32 to vector<2x128xf32>
    %9 = arith.addf %8, %7 : vector<2x128xf32>
    %10 = arith.divf %8, %9 : vector<2x128xf32>
    %cst_6 = arith.constant 1.000000e+01 : f32
    %11 = vector.broadcast %cst_6 : f32 to vector<2x128xf32>
    %12 = arith.mulf %10, %11 : vector<2x128xf32>
    %c0_7 = arith.constant 0 : index
    %c0_8 = arith.constant 0 : index
    %13 = vector.load %arg4[%c0_7, %c0_8] : memref<2x128xf32, #tpu.memory_space<vmem>>, vector<2x128xf32>
    tpu.vector_store %arg4[%c0_7, %c0_8], %12 {strides = array<i32>} : memref<2x128xf32, #tpu.memory_space<vmem>>, vector<2x128xf32>,
    return
  }
  func.func @transform_0(%arg0: i32) -> (i32, i32) {
    %c0_i32 = arith.constant 0 : i32
    %c0_i32_0 = arith.constant 0 : i32
    %c0_i32_1 = arith.constant 0 : i32
    return %c0_i32, %c0_i32_0 : i32, i32
  }
  func.func @transform_1(%arg0: i32) -> (i32, i32) {
    %c0_i32 = arith.constant 0 : i32
    %c0_i32_0 = arith.constant 0 : i32
    %c0_i32_1 = arith.constant 0 : i32
    return %c0_i32, %c0_i32_0 : i32, i32
  }
  func.func @transform_2(%arg0: i32) -> (i32, i32) {
    %c0_i32 = arith.constant 0 : i32
    %c0_i32_0 = arith.constant 0 : i32
    %c0_i32_1 = arith.constant 0 : i32
    return %c0_i32, %c0_i32_0 : i32, i32
  }
  func.func @transform_3(%arg0: i32) -> (i32, i32) {
    %c0_i32 = arith.constant 0 : i32
    %c0_i32_0 = arith.constant 0 : i32
    %c0_i32_1 = arith.constant 0 : i32
    return %c0_i32, %c0_i32_0 : i32, i32
  }
}

</mosaic_0001>

<bundles_post_ra>
// kernel: video_rating_forward.5
= control target key start
LH: loop header
LB: loop body
LE: loop exit
PB: predicated region body
PF: predicated region fallthrough
CT: control target
= control target key end

     0   :  { %s1844_s0 = inlined_call_operand.vmem [shape: bf16[2,1536], index: 0, kind: input, shape index: {}]   ;;  %s1845_s1 = inlined_call_operand.vmem [shape: bf16[1536,128], index: 1, kind: input, shape index: {}]   ;;  %s1846_s2 = inlined_call_operand.vmem [shape: f32[1,128], index: 2, kind: input, shape index: {}]   ;;  %s1847_s3 = inlined_call_operand.hbm [shape: f32[2,128], index: 3, kind: output, shape index: {}]  }
   0x1   :  { %v1402_v0 = vld [vmem:[%s1845_s1 + $0x38] sm:$0xff]  ;;  %v1401_v4 = vld [vmem:[%s1845_s1 + $0x30] sm:$0xff]  ;;  %v1400_v8 = vld [vmem:[%s1845_s1 + $0x28] sm:$0xff] }
   0x2   :  { %v1410_v1 = vld [vmem:[%s1845_s1 + $0x78] sm:$0xff]  ;;  %817 = vmatpush.bf16.msra.mxu0 %v1402_v0  ;;  %v1409_v5 = vld [vmem:[%s1845_s1 + $0x70] sm:$0xff]  ;;  %v1408_v9 = vld [vmem:[%s1845_s1 + $0x68] sm:$0xff] }
   0x3   :  { %v1418_v2 = vld [vmem:[%s1845_s1 + $0xb8] sm:$0xff]  ;;  %830 = vmatpush.bf16.msra.mxu1 %v1410_v1  ;;  %v1417_v6 = vld [vmem:[%s1845_s1 + $0xb0] sm:$0xff]  ;;  %v1416_v10 = vld [vmem:[%s1845_s1 + $0xa8] sm:$0xff] }
   0x4   :  { %v1426_v3 = vld [vmem:[%s1845_s1 + $0xf8] sm:$0xff]  ;;  %843 = vmatpush.bf16.msra.mxu2 %v1418_v2  ;;  %v1425_v7 = vld [vmem:[%s1845_s1 + $0xf0] sm:$0xff]  ;;  %v1424_v11 = vld [vmem:[%s1845_s1 + $0xe8] sm:$0xff] }
   0x5   :  { %856 = vmatpush.bf16.msra.mxu3 %v1426_v3  ;;  %v1399_v12 = vld [vmem:[%s1845_s1 + $0x20] sm:$0xff]  ;;  %v1398_v16 = vld [vmem:[%s1845_s1 + $0x18] sm:$0xff]  ;;  %v1397_v20 = vld [vmem:[%s1845_s1 + $0x10] sm:$0xff] }
   0x6   :  { %818 = vmatpush.bf16.msra.mxu0 %v1401_v4  ;;  %v1407_v13 = vld [vmem:[%s1845_s1 + $0x60] sm:$0xff]  ;;  %v1406_v17 = vld [vmem:[%s1845_s1 + $0x58] sm:$0xff]  ;;  %v1405_v21 = vld [vmem:[%s1845_s1 + $0x50] sm:$0xff] }
   0x7   :  { %831 = vmatpush.bf16.msra.mxu1 %v1409_v5  ;;  %v1415_v14 = vld [vmem:[%s1845_s1 + $0xa0] sm:$0xff]  ;;  %v1414_v18 = vld [vmem:[%s1845_s1 + $0x98] sm:$0xff] }
   0x8   :  { %844 = vmatpush.bf16.msra.mxu2 %v1417_v6  ;;  %v1423_v15 = vld [vmem:[%s1845_s1 + $0xe0] sm:$0xff]  ;;  %v1422_v19 = vld [vmem:[%s1845_s1 + $0xd8] sm:$0xff] }
   0x9   :  { %857 = vmatpush.bf16.msra.mxu3 %v1425_v7  ;;  %v15_v22 = vld [vmem:[%s1844_s0] sm:$0xff] }
   0xa   :  { %819 = vmatpush.bf16.msra.mxu0 %v1400_v8  ;;  %214 = vst [vmem:[#allocation1] ss:$9 sm:$0xff] %v15_v22 }
   0xb   :  { %832 = vmatpush.bf16.msra.mxu1 %v1408_v9 }
   0xc   :  { %845 = vmatpush.bf16.msra.mxu2 %v1416_v10 }
   0xd   :  { %858 = vmatpush.bf16.msra.mxu3 %v1424_v11 }
   0xe   :  { %820 = vmatpush.bf16.msra.mxu0 %v1399_v12 }
   0xf   :  { %833 = vmatpush.bf16.msra.mxu1 %v1407_v13 }
  0x10   :  { %846 = vmatpush.bf16.msra.mxu2 %v1415_v14 }
  0x11   :  { %859 = vmatpush.bf16.msra.mxu3 %v1423_v15 }
  0x12   :  { %821 = vmatpush.bf16.msra.mxu0 %v1398_v16 }
  0x13   :  { %834 = vmatpush.bf16.msra.mxu1 %v1406_v17 }
  0x14   :  { %8 = vsyncpa [#allocation3], 0  ;;  %847 = vmatpush.bf16.msra.mxu2 %v1414_v18  ;;  %v1413_v23 = vld [vmem:[%s1845_s1 + $0x90] sm:$0xff]  ;;  %v1396_v25 = vld [vmem:[%s1845_s1 + $0x8] sm:$0xff]  ;;  %s1001_s19 = sshll.u32 %s1847_s3, 4  ;;  %s1002_s19 = int_to_ptr.hbm [resolvable:$true] %s1001_s19 }
  0x15   :  { %860 = vmatpush.bf16.msra.mxu3 %v1422_v19  ;;  %v1421_v24 = vld [vmem:[%s1845_s1 + $0xd0] sm:$0xff]  ;;  %v1404_v26 = vld [vmem:[%s1845_s1 + $0x48] sm:$0xff]  ;;  %v1395_v29 = vld [vmem:[%s1845_s1] sm:$0xff] }
  0x16   :  { %822 = vmatpush.bf16.msra.mxu0 %v1397_v20  ;;  %v1412_v27 = vld [vmem:[%s1845_s1 + $0x88] sm:$0xff]  ;;  %v1403_v30 = vld [vmem:[%s1845_s1 + $0x40] sm:$0xff]  ;;  %v1434_v33 = vld [vmem:[%s1845_s1 + $0x138] sm:$0xff] }
  0x17   :  { %835 = vmatpush.bf16.msra.mxu1 %v1405_v21  ;;  %v1420_v28 = vld [vmem:[%s1845_s1 + $0xc8] sm:$0xff]  ;;  %v1411_v31 = vld [vmem:[%s1845_s1 + $0x80] sm:$0xff]  ;;  %v1442_v34 = vld [vmem:[%s1845_s1 + $0x178] sm:$0xff] }
  0x18   :  { %848 = vmatpush.bf16.msra.mxu2 %v1413_v23  ;;  %v1419_v32 = vld [vmem:[%s1845_s1 + $0xc0] sm:$0xff]  ;;  %v1450_v35 = vld [vmem:[%s1845_s1 + $0x1b8] sm:$0xff]  ;;  %v1433_v37 = vld [vmem:[%s1845_s1 + $0x130] sm:$0xff] }
  0x19   :  { %861 = vmatpush.bf16.msra.mxu3 %v1421_v24  ;;  %v1458_v36 = vld [vmem:[%s1845_s1 + $0x1f8] sm:$0xff]  ;;  %v215_v39 = vld [vmem:[#allocation1] sm:$0xff]  ;;  %v1441_v40 = vld [vmem:[%s1845_s1 + $0x170] sm:$0xff] }
  0x1a   :  { %823 = vmatpush.bf16.msra.mxu0 %v1396_v25  ;;  %v217_v38 = vld [vmem:[#allocation1 + $0x12] sm:$0xff]  ;;  %v218_v41 = vld [vmem:[#allocation1 + $0x1b] sm:$0xff]  ;;  %v216_v42 = vld [vmem:[#allocation1 + $0x9] sm:$0xff] }
  0x1b   :  { %836 = vmatpush.bf16.msra.mxu1 %v1404_v26  ;;  %v1449_v43 = vld [vmem:[%s1845_s1 + $0x1b0] sm:$0xff]  ;;  %v1432_v45 = vld [vmem:[%s1845_s1 + $0x128] sm:$0xff]  ;;  %v1431_v49 = vld [vmem:[%s1845_s1 + $0x120] sm:$0xff] }
  0x1c   :  { %849 = vmatpush.bf16.msra.mxu2 %v1412_v27  ;;  %v1457_v44 = vld [vmem:[%s1845_s1 + $0x1f0] sm:$0xff]  ;;  %v1440_v46 = vld [vmem:[%s1845_s1 + $0x168] sm:$0xff]  ;;  %v1439_v50 = vld [vmem:[%s1845_s1 + $0x160] sm:$0xff] }
  0x1d   :  { %862 = vmatpush.bf16.msra.mxu3 %v1420_v28  ;;  %v1448_v47 = vld [vmem:[%s1845_s1 + $0x1a8] sm:$0xff]  ;;  %v221_v51 = vld [vmem:[#allocation1 + $0x36] sm:$0xff]  ;;  %v222_v54 = vld [vmem:[#allocation1 + $0x3f] sm:$0xff] }
  0x1e   :  { %824 = vmatpush.bf16.msra.mxu0 %v1395_v29  ;;  %v1456_v48 = vld [vmem:[%s1845_s1 + $0x1e8] sm:$0xff]  ;;  %v1447_v56 = vld [vmem:[%s1845_s1 + $0x1a0] sm:$0xff]  ;;  %v1430_v58 = vld [vmem:[%s1845_s1 + $0x118] sm:$0xff] }
  0x1f   :  { %837 = vmatpush.bf16.msra.mxu1 %v1403_v30  ;;  %v16_v52 = vld [vmem:[%s1844_s0 + $0x8] sm:$0xf]  ;;  %v220_v55 = vld [vmem:[#allocation1 + $0x2d] sm:$0xff]  ;;  %v1455_v57 = vld [vmem:[%s1845_s1 + $0x1e0] sm:$0xff] }
  0x20   :  { %850 = vmatpush.bf16.msra.mxu2 %v1411_v31  ;;  %v219_v53 = vld [vmem:[#allocation1 + $0x24] sm:$0xff]  ;;  %v1438_v59 = vld [vmem:[%s1845_s1 + $0x158] sm:$0xff]  ;;  %v1429_v62 = vld [vmem:[%s1845_s1 + $0x110] sm:$0xff] }
  0x21   :  { %863 = vmatpush.bf16.msra.mxu3 %v1419_v32  ;;  %825 = vmatmul.bf16.vlgmr.msra.gmra.mxu0 %v215_v39  ;;  %224 = vst [vmem:[#allocation1] ss:$9 sm:$0xff] %v16_v52  ;;  %v1446_v60 = vld [vmem:[%s1845_s1 + $0x198] sm:$0xff]  ;;  %v1437_v63 = vld [vmem:[%s1845_s1 + $0x150] sm:$0xff]  ;;  %v1428_v2 = vld [vmem:[%s1845_s1 + $0x108] sm:$0xff] }
  0x22   :  { %869 = vmatpush.bf16.msrb.mxu0 %v1434_v33  ;;  %838 = vmatmul.bf16.vlgmr.msra.gmra.mxu1 %v216_v42  ;;  %v1454_v61 = vld [vmem:[%s1845_s1 + $0x1d8] sm:$0xff]  ;;  %v1445_v0 = vld [vmem:[%s1845_s1 + $0x190] sm:$0xff]  ;;  %v1436_v3 = vld [vmem:[%s1845_s1 + $0x148] sm:$0xff] }
  0x23   :  { %882 = vmatpush.bf16.msrb.mxu1 %v1442_v34  ;;  %851 = vmatmul.bf16.vlgmr.msra.gmra.mxu2 %v217_v38  ;;  %v1453_v1 = vld [vmem:[%s1845_s1 + $0x1d0] sm:$0xff]  ;;  %v1444_v4 = vld [vmem:[%s1845_s1 + $0x188] sm:$0xff]  ;;  %v1427_v6 = vld [vmem:[%s1845_s1 + $0x100] sm:$0xff] }
  0x24   :  { %895 = vmatpush.bf16.msrb.mxu2 %v1450_v35  ;;  %864 = vmatmul.bf16.vlgmr.msra.gmra.mxu3 %v218_v41  ;;  %v1452_v5 = vld [vmem:[%s1845_s1 + $0x1c8] sm:$0xff]  ;;  %v1435_v7 = vld [vmem:[%s1845_s1 + $0x140] sm:$0xff]  ;;  %v1466_v10 = vld [vmem:[%s1845_s1 + $0x238] sm:$0xff] }
  0x25   :  { %908 = vmatpush.bf16.msrb.mxu3 %v1458_v36  ;;  %v1443_v8 = vld [vmem:[%s1845_s1 + $0x180] sm:$0xff]  ;;  %v1474_v11 = vld [vmem:[%s1845_s1 + $0x278] sm:$0xff]  ;;  %v1465_v14 = vld [vmem:[%s1845_s1 + $0x230] sm:$0xff] }
  0x26   :  { %870 = vmatpush.bf16.msrb.mxu0 %v1433_v37  ;;  %v1451_v9 = vld [vmem:[%s1845_s1 + $0x1c0] sm:$0xff]  ;;  %v1482_v12 = vld [vmem:[%s1845_s1 + $0x2b8] sm:$0xff]  ;;  %v1473_v15 = vld [vmem:[%s1845_s1 + $0x270] sm:$0xff] }
  0x27   :  { %883 = vmatpush.bf16.msrb.mxu1 %v1441_v40  ;;  %v1490_v13 = vld [vmem:[%s1845_s1 + $0x2f8] sm:$0xff]  ;;  %v1481_v16 = vld [vmem:[%s1845_s1 + $0x2b0] sm:$0xff]  ;;  %v1464_v18 = vld [vmem:[%s1845_s1 + $0x228] sm:$0xff] }
  0x28   :  { %896 = vmatpush.bf16.msrb.mxu2 %v1449_v43  ;;  %v1489_v17 = vld [vmem:[%s1845_s1 + $0x2f0] sm:$0xff]  ;;  %v1472_v19 = vld [vmem:[%s1845_s1 + $0x268] sm:$0xff]  ;;  %v1463_v22 = vld [vmem:[%s1845_s1 + $0x220] sm:$0xff] }
  0x29   :  { %909 = vmatpush.bf16.msrb.mxu3 %v1457_v44  ;;  %v1480_v20 = vld [vmem:[%s1845_s1 + $0x2a8] sm:$0xff]  ;;  %v1471_v23 = vld [vmem:[%s1845_s1 + $0x260] sm:$0xff]  ;;  %v1462_v26 = vld [vmem:[%s1845_s1 + $0x218] sm:$0xff] }
  0x2a   :  { %871 = vmatpush.bf16.msrb.mxu0 %v1432_v45  ;;  %v1488_v21 = vld [vmem:[%s1845_s1 + $0x2e8] sm:$0xff]  ;;  %v1479_v24 = vld [vmem:[%s1845_s1 + $0x2a0] sm:$0xff]  ;;  %v1470_v27 = vld [vmem:[%s1845_s1 + $0x258] sm:$0xff] }
  0x2b   :  { %884 = vmatpush.bf16.msrb.mxu1 %v1440_v46  ;;  %v1487_v25 = vld [vmem:[%s1845_s1 + $0x2e0] sm:$0xff]  ;;  %v1478_v28 = vld [vmem:[%s1845_s1 + $0x298] sm:$0xff]  ;;  %v1461_v30 = vld [vmem:[%s1845_s1 + $0x210] sm:$0xff] }
  0x2c   :  { %897 = vmatpush.bf16.msrb.mxu2 %v1448_v47  ;;  %v1486_v29 = vld [vmem:[%s1845_s1 + $0x2d8] sm:$0xff]  ;;  %v1469_v31 = vld [vmem:[%s1845_s1 + $0x250] sm:$0xff]  ;;  %v1460_v34 = vld [vmem:[%s1845_s1 + $0x208] sm:$0xff] }
  0x2d   :  { %910 = vmatpush.bf16.msrb.mxu3 %v1456_v48  ;;  %v1477_v32 = vld [vmem:[%s1845_s1 + $0x290] sm:$0xff]  ;;  %v1468_v35 = vld [vmem:[%s1845_s1 + $0x248] sm:$0xff]  ;;  %v1459_v38 = vld [vmem:[%s1845_s1 + $0x200] sm:$0xff] }
  0x2e   :  { %872 = vmatpush.bf16.msrb.mxu0 %v1431_v49  ;;  %v1485_v33 = vld [vmem:[%s1845_s1 + $0x2d0] sm:$0xff]  ;;  %v1476_v36 = vld [vmem:[%s1845_s1 + $0x288] sm:$0xff]  ;;  %v1467_v39 = vld [vmem:[%s1845_s1 + $0x240] sm:$0xff] }
  0x2f   :  { %885 = vmatpush.bf16.msrb.mxu1 %v1439_v50  ;;  %v1484_v37 = vld [vmem:[%s1845_s1 + $0x2c8] sm:$0xff]  ;;  %v1475_v40 = vld [vmem:[%s1845_s1 + $0x280] sm:$0xff]  ;;  %v227_v44 = vld [vmem:[#allocation1 + $0x12] sm:$0xff] }
  0x30   :  { %898 = vmatpush.bf16.msrb.mxu2 %v1447_v56  ;;  %v1483_v41 = vld [vmem:[%s1845_s1 + $0x2c0] sm:$0xff]  ;;  %v226_v43 = vld [vmem:[#allocation1 + $0x9] sm:$0xff] }
  0x31   :  { %911 = vmatpush.bf16.msrb.mxu3 %v1455_v57  ;;  %v225_v42 = vld [vmem:[#allocation1] sm:$0xff] }
  0x32   :  { %873 = vmatpush.bf16.msrb.mxu0 %v1430_v58  ;;  %v228_v45 = vld [vmem:[#allocation1 + $0x1b] sm:$0xff] }
  0x33   :  { %886 = vmatpush.bf16.msrb.mxu1 %v1438_v59 }
  0x34   :  { %899 = vmatpush.bf16.msrb.mxu2 %v1446_v60 }
  0x35   :  { %912 = vmatpush.bf16.msrb.mxu3 %v1454_v61 }
  0x36   :  { %874 = vmatpush.bf16.msrb.mxu0 %v1429_v62 }
  0x37   :  { %887 = vmatpush.bf16.msrb.mxu1 %v1437_v63 }
  0x38   :  { %900 = vmatpush.bf16.msrb.mxu2 %v1445_v0 }
  0x39   :  { %913 = vmatpush.bf16.msrb.mxu3 %v1453_v1 }
  0x3a   :  { %875 = vmatpush.bf16.msrb.mxu0 %v1428_v2 }
  0x3b   :  { %888 = vmatpush.bf16.msrb.mxu1 %v1436_v3 }
  0x3c   :  { %901 = vmatpush.bf16.msrb.mxu2 %v1444_v4 }
  0x3d   :  { %914 = vmatpush.bf16.msrb.mxu3 %v1452_v5 }
  0x3e   :  { %876 = vmatpush.bf16.msrb.mxu0 %v1427_v6 }
  0x3f   :  { %889 = vmatpush.bf16.msrb.mxu1 %v1435_v7 }
  0x40   :  { %902 = vmatpush.bf16.msrb.mxu2 %v1443_v8 }
  0x41   :  { %915 = vmatpush.bf16.msrb.mxu3 %v1451_v9  ;;  %877 = vmatmul.bf16.vlgmr.msrb.gmra.mxu0 %v219_v53 }
  0x42   :  { %921 = vmatpush.bf16.msra.mxu0 %v1466_v10  ;;  %890 = vmatmul.bf16.vlgmr.msrb.gmra.mxu1 %v220_v55 }
  0x43   :  { %934 = vmatpush.bf16.msra.mxu1 %v1474_v11  ;;  %903 = vmatmul.bf16.vlgmr.msrb.gmra.mxu2 %v221_v51 }
  0x44   :  { %947 = vmatpush.bf16.msra.mxu2 %v1482_v12  ;;  %916 = vmatmul.bf16.vlgmr.msrb.gmra.mxu3 %v222_v54  ;;  %v1492_v54 = vld [vmem:[%s1846_s2] ss:$0 sm:$0xff]  ;;  %s1523_s2 = smov [#allocation2]  }
  0x45   :  { %960 = vmatpush.bf16.msra.mxu3 %v1490_v13  ;;  %s999_s16 = sshll.u32 %s1523_s2, 4  ;;  %s1000_s16 = int_to_ptr.vmem [resolvable:$true] %s999_s16 }
  0x46   :  { %922 = vmatpush.bf16.msra.mxu0 %v1465_v14 }
  0x47   :  { %935 = vmatpush.bf16.msra.mxu1 %v1473_v15 }
  0x48   :  { %948 = vmatpush.bf16.msra.mxu2 %v1481_v16 }
  0x49   :  { %961 = vmatpush.bf16.msra.mxu3 %v1489_v17 }
  0x4a   :  { %923 = vmatpush.bf16.msra.mxu0 %v1464_v18 }
  0x4b   :  { %936 = vmatpush.bf16.msra.mxu1 %v1472_v19 }
  0x4c   :  { %949 = vmatpush.bf16.msra.mxu2 %v1480_v20 }
  0x4d   :  { %962 = vmatpush.bf16.msra.mxu3 %v1488_v21 }
  0x4e   :  { %924 = vmatpush.bf16.msra.mxu0 %v1463_v22 }
  0x4f   :  { %937 = vmatpush.bf16.msra.mxu1 %v1471_v23 }
  0x50   :  { %950 = vmatpush.bf16.msra.mxu2 %v1479_v24 }
  0x51   :  { %963 = vmatpush.bf16.msra.mxu3 %v1487_v25 }
  0x52   :  { %925 = vmatpush.bf16.msra.mxu0 %v1462_v26 }
  0x53   :  { %938 = vmatpush.bf16.msra.mxu1 %v1470_v27 }
  0x54   :  { %951 = vmatpush.bf16.msra.mxu2 %v1478_v28 }
  0x55   :  { %964 = vmatpush.bf16.msra.mxu3 %v1486_v29 }
  0x56   :  { %926 = vmatpush.bf16.msra.mxu0 %v1461_v30 }
  0x57   :  { %939 = vmatpush.bf16.msra.mxu1 %v1469_v31 }
  0x58   :  { %952 = vmatpush.bf16.msra.mxu2 %v1477_v32 }
  0x59   :  { %965 = vmatpush.bf16.msra.mxu3 %v1485_v33 }
  0x5a   :  { %927 = vmatpush.bf16.msra.mxu0 %v1460_v34 }
  0x5b   :  { %940 = vmatpush.bf16.msra.mxu1 %v1468_v35 }
  0x5c   :  { %953 = vmatpush.bf16.msra.mxu2 %v1476_v36 }
  0x5d   :  { %966 = vmatpush.bf16.msra.mxu3 %v1484_v37 }
  0x5e   :  { %928 = vmatpush.bf16.msra.mxu0 %v1459_v38 }
  0x5f   :  { %941 = vmatpush.bf16.msra.mxu1 %v1467_v39 }
  0x60   :  { %954 = vmatpush.bf16.msra.mxu2 %v1475_v40 }
  0x61   :  { %967 = vmatpush.bf16.msra.mxu3 %v1483_v41  ;;  %929 = vmatmul.bf16.vlgmr.msra.gmra.mxu0 %v225_v42 }
  0x62   :  { %942 = vmatmul.bf16.vlgmr.msra.gmra.mxu1 %v226_v43 }
  0x63   :  { %955 = vmatmul.bf16.vlgmr.msra.gmra.mxu2 %v227_v44 }
  0x64   :  { %968 = vmatmul.bf16.vlgmr.msra.gmra.mxu3 %v228_v45 }
  0x9e   :  { %v826_v46 = vpop.f32.mrf.mxu0 }
  0x9f   :  { %v839_v47 = vpop.f32.mrf.mxu1  ;;  %v827_v56 = vadd.f32 %v1492_v54, %v826_v46 }
  0xa1   :  { %v840_v58 = vadd.f32 %v839_v47, %v827_v56 }
  0xa6   :  { %v852_v48 = vpop.f32.mrf.mxu2  ;;  %v828_v50 = vpop.f32.mrf.mxu0 }
  0xa7   :  { %v865_v49 = vpop.f32.mrf.mxu3  ;;  %v841_v51 = vpop.f32.mrf.mxu1  ;;  %v853_v62 = vadd.f32 %v852_v48, %v840_v58 }
  0xa9   :  { %v866_v0 = vadd.f32 %v865_v49, %v853_v62 }
  0xae   :  { %v854_v52 = vpop.f32.mrf.mxu2 }
  0xaf   :  { %v867_v53 = vpop.f32.mrf.mxu3 }
  0xbe   :  { %v878_v55 = vpop.f32.mrf.mxu0 }
  0xbf   :  { %v891_v57 = vpop.f32.mrf.mxu1  ;;  %v879_v3 = vadd.f32 %v878_v55, %v866_v0 }
  0xc1   :  { %v892_v4 = vadd.f32 %v891_v57, %v879_v3 }
  0xc6   :  { %v904_v59 = vpop.f32.mrf.mxu2  ;;  %v880_v61 = vpop.f32.mrf.mxu0 }
  0xc7   :  { %v917_v60 = vpop.f32.mrf.mxu3  ;;  %v893_v63 = vpop.f32.mrf.mxu1  ;;  %v905_v5 = vadd.f32 %v904_v59, %v892_v4 }
  0xc9   :  { %v918_v6 = vadd.f32 %v917_v60, %v905_v5 }
  0xce   :  { %v906_v1 = vpop.f32.mrf.mxu2 }
  0xcf   :  { %v919_v2 = vpop.f32.mrf.mxu3 }
  0xde   :  { %v930_v7 = vpop.f32.mrf.mxu0 }
  0xdf   :  { %v943_v8 = vpop.f32.mrf.mxu1  ;;  %v931_v9 = vadd.f32 %v930_v7, %v918_v6 }
  0xe1   :  { %v944_v10 = vadd.f32 %v943_v8, %v931_v9 }
  0xe6   :  { %v956_v11 = vpop.f32.mrf.mxu2  ;;  %v932_v14 = vpop.f32.mrf.mxu0 }
  0xe7   :  { %v969_v12 = vpop.f32.mrf.mxu3  ;;  %v957_v13 = vadd.f32 %v956_v11, %v944_v10  ;;  %v945_v15 = vpop.f32.mrf.mxu1 }
  0xe9   :  { %v970_v16 = vadd.f32 %v969_v12, %v957_v13 }
  0xeb   :  { %v1394_v17 = vmul.f32 -1.442695, %v970_v16 }
  0xed   :  { %1493 = vpow2.f32 %v1394_v17 }
  0xee   :  { %v958_v18 = vpop.f32.mrf.mxu2 }
  0xef   :  { %v971_v19 = vpop.f32.mrf.mxu3 }
  0xf3   :  { %v1494_v20 = vpop.eup %1493 }
  0xf4   :  { %v976_v21 = vadd.f32 1.0, %v1494_v20 }
  0xf6   :  { %1495 = vrcp.f32 %v976_v21  ;;  %v988_v25 = vand.u32 2147483648, %v976_v21  ;;  %v986_v27 = vand.u32 2147483647, %v976_v21  ;;  %vm982_vm1 = vweird.f32 %v976_v21 }
  0xf8   :  { %v989_v29 = vor.u32 1.1754944e-38, %v988_v25  ;;  %vm987_vm3 = vcmp.eq.f32.partialorder %v986_v27, 8.507059e+37 }
  0xfc   :  { %v1496_v22 = vpop.eup %1495 }
  0xfd   :  { %v978_v23 = vmul.f32 %v1496_v22, %v976_v21  ;;  %vm983_vm0 = vweird.f32 %v1496_v22 }
  0xfe   :  { %vm984_vm2 = vmor %vm982_vm1, %vm983_vm0 }
  0xff   :  { %v979_v24 = vsub.f32 1.0, %v978_v23 }
 0x101   :  { %v980_v26 = vmul.f32 %v1496_v22, %v979_v24 }
 0x103   :  { %v981_v28 = vadd.f32 %v1496_v22, %v980_v26 }
 0x105   :  { %v985_v30 = vsel %vm984_vm2, %v1496_v22, %v981_v28 }
 0x106   :  { %v990_v31 = vsel %vm987_vm3, %v989_v29, %v985_v30 }
 0x107   :  { %v992_v32 = vmul.f32 10.0, %v990_v31 }
 0x109   :  { %993 = vst [vmem:[#allocation2] sm:$0x3] %v992_v32 }
 0x10a   :  { %1004 = dma.vmem_to_hbm [thread:$0]  %s1000_s16, 32, %s1002_s19, [#allocation3]  }
 0x10b   :  { %1521 = dma.done.wait [#allocation3], 32  }
 0x10c   :  { %1522 = vsyncadd [#allocation3], 4294967264 }
 0x10d   :  { %1009 = vsyncpa [#allocation3], 1 }

// kernel: video_rating_forward.3
= control target key start
LH: loop header
LB: loop body
LE: loop exit
PB: predicated region body
PF: predicated region fallthrough
CT: control target
= control target key end

     0   :  { %8 = vsyncpa [#allocation4], 0  ;;  %s2606_s12 = smov 0   ;;  %s3126_s0 = inlined_call_operand.vmem [shape: bf16[2,3,16,48], index: 0, kind: input, shape index: {}]   ;;  %s3127_s1 = inlined_call_operand.hbm [shape: bf16[9,48,256], index: 1, kind: input, shape index: {}]   ;;  %s3128_s2 = inlined_call_operand.vmem [shape: f32[1,128], index: 2, kind: input, shape index: {}]   ;;  %s3129_s3 = inlined_call_operand.vmem [shape: bf16[2,3,8,128], index: 3, kind: output, shape index: {}]  }
   0x1 LB: > { %s124_s15 = sshll.u32 %s3127_s1, 4  ;;  %s2096_s16 = sadd.s32 4294967295, %s2580_s12   ;;  %s2580_s12 = sphi %s2606_s12, %s14_s12   ;;  %s125_s15 = int_to_ptr.hbm [resolvable:$true] %s124_s15 }
   0x2   : > { %p2098_p0 = scmp.ge.s32.totalorder %s2580_s12, 1  ;;  %p113_p1 = scmp.lt.s32.totalorder %s2580_s12, 3 }
   0x3   : > { %p2525_p2 = scmp.eq.s32.totalorder %s2096_s16, 0  ;;  %s2582_s17 = smov [#allocation3]  }
   0x4   : > { %p114_p3 = pnand %p2098_p0, %p113_p1  ;;  %s126_s18 = sshll.u32 %s2582_s17, 4  ;;  %s127_s18 = int_to_ptr.vmem [resolvable:$true] %s126_s18 }
   0x5   : > { %s2583_s19 = smov 128   ;;  %s2584_s20 = smov 8  }
   0x6   : > { %p2521_p4 = pneg %p114_p3  ;;  %153 = sbr.rel (%p114_p3) target bundleno = 434 (0x1b2), region = 32 }
   0x8   : > { %p2522_p5 = pnand %p2525_p2, %p2521_p4 }
   0xa   : > { %2524 = dma.hbm_to_vmem [thread:$0]  (!%p2522_p5), %s125_s15, 6912, %s127_s18, [#allocation4], %s2583_s19, %s2583_s19, %s2584_s20  }
   0xb   : > { %2575 = dma.done.wait (%p2525_p2), [#allocation4], 6912  }
   0xc   : > { %2577 = vsyncadd (%p2525_p2), [#allocation4], 4294960384  ;;  %p178_p6 = scmp.lt.s32.totalorder %s2096_s16, 1  ;;  %vm189_vm0 = vcmask 388096   ;;  %vm192_vm1 = vcmask 385024   ;;  %v2585_v0 = vmov 0  }
   0xd   : > { %194 = vst.msk [vmem:[#allocation2 + $0xc] sm:$0xf] %vm189_vm0, %v2585_v0  ;;  %vm212_vm2 = vsmask.f32 256  ;;  %v2123_v1 = vld [vmem:[#allocation3 + $0x50] sm:$0xf] }
   0xe   : > { %s3141_s16 = smov (!%p178_p6, %s2096_s16), 1  ;;  %195 = vst.msk [vmem:[#allocation2 + $0x10] sm:$0xf] %vm189_vm0, %v2585_v0  ;;  %v2460_v2 = vld [vmem:[#allocation3 + $0x54] sm:$0xf0]  ;;  %vm2657_vm7 = vmand %vm192_vm1, %vm212_vm2  ;;  %vm438_vm10 = vcmask 392192  }
   0xf   : > { %196 = vst.msk [vmem:[#allocation2 + $0x14] sm:$0x1] %vm192_vm1, %v2585_v0  ;;  %s2515_s21 = smul.u32 24, %s3141_s16  ;;  %v2459_v3 = vld [vmem:[#allocation3 + $0x54] sm:$0xf]  ;;  %v2124_v4 = vor.u32 %v2460_v2, %v2123_v1  ;;  %vm607_vm12 = vcmask 1042432  }
  0x10   : > { %190 = vst.msk [vmem:[#allocation2] sm:$0xf] %vm189_vm0, %v2585_v0  ;;  %v2125_v5 = vld [vmem:[#allocation3 + $0x58] sm:$0xf0]  ;;  %v2115_v6 = vld [vmem:[#allocation3 + $0x40] sm:$0xf] }
  0x11   : > { %191 = vst.msk [vmem:[#allocation2 + $0x4] sm:$0xf] %vm189_vm0, %v2585_v0  ;;  %v2458_v7 = vld [vmem:[#allocation3 + $0x44] sm:$0xf0]  ;;  %s2635_s24 = scalar_lea.vmem %s3126_s0, %s2515_s21  ;;  %v2128_v8 = vor.u32 %v2459_v3, %v2125_v5  ;;  %v2457_v9 = vld [vmem:[#allocation3 + $0x44] sm:$0xf]  ;;  %2509 = vmatpush.bf16.msra.mxu2 %v2124_v4  ;;  %453 = vmatpush.bf16.msra.mxu0 %v2124_v4 }
  0x12   : > { %193 = vst.msk [vmem:[#allocation2 + $0x8] sm:$0x1] %vm192_vm1, %v2585_v0  ;;  %v2117_v10 = vld [vmem:[#allocation3 + $0x48] sm:$0xf0]  ;;  %vm213_vm3 = vsmask.f32 4368  ;;  %v2116_v11 = vor.u32 %v2458_v7, %v2115_v6 }
  0x13   : > { %v2107_v12 = vld [vmem:[#allocation3 + $0x30] sm:$0xf]  ;;  %v2456_v13 = vld [vmem:[#allocation3 + $0x34] sm:$0xf0]  ;;  %vm277_vm4 = vsmask.f32 7938  ;;  %2512 = vmatpush.bf16.msra.mxu3 %v2128_v8  ;;  %v2120_v14 = vor.u32 %v2457_v9, %v2117_v10  ;;  %477 = vmatpush.bf16.msra.mxu1 %v2128_v8  ;;  %vm2641_vm5 = vmor %vm212_vm2, %vm213_vm3 }
  0x14   : > { %v2455_v15 = vld [vmem:[#allocation3 + $0x34] sm:$0xf]  ;;  %v206_v16 = vld [vmem:[%s2635_s24] sm:$0xf]  ;;  %v207_v17 = vld [vmem:[%s2635_s24 + $0x4] sm:$0xf]  ;;  %v2108_v27 = vor.u32 %v2456_v13, %v2107_v12 }
  0x15   : > { %v2109_v18 = vld [vmem:[#allocation3 + $0x38] sm:$0xf0]  ;;  %v216_v19 = vshrl.u32 %v206_v16, 16  ;;  %v219_v20 = vshll.u32 %v206_v16, 16  ;;  %v224_v21 = vshrl.u32 %v207_v17, 16  ;;  %v227_v22 = vshll.u32 %v207_v17, 16  ;;  %2510 = vmatpush.bf16.msra.mxu2 %v2116_v11  ;;  %vm2649_vm6 = vmand %vm189_vm0, %vm277_vm4  ;;  %454 = vmatpush.bf16.msra.mxu0 %v2116_v11 }
  0x16   : > { %v279_v24 = vld [vmem:[#allocation2 + $0xc] sm:$0xf]  ;;  %v285_v25 = vld [vmem:[#allocation2 + $0x14] sm:$0x1]  ;;  %197 = vst.msk [vmem:[#allocation2 + $0x18] sm:$0xf] %vm189_vm0, %v2585_v0  ;;  %v2112_v32 = vor.u32 %v2455_v15, %v2109_v18 }
  0x17   : > { %v2165_v26 = vld [vmem:[#allocation3 + $0x20] sm:$0xf]  ;;  %v218_v28 = vrot.slane %v216_v19, 7  ;;  %v226_v29 = vrot.slane %v224_v21, 7  ;;  %198 = vst.msk [vmem:[#allocation2 + $0x1c] sm:$0xf] %vm189_vm0, %v2585_v0  ;;  %2513 = vmatpush.bf16.msra.mxu3 %v2120_v14  ;;  %478 = vmatpush.bf16.msra.mxu1 %v2120_v14 }
  0x18   : > { %v2454_v31 = vld [vmem:[#allocation3 + $0x24] sm:$0xf0]  ;;  %199 = vst.msk [vmem:[#allocation2 + $0x20] sm:$0x1] %vm192_vm1, %v2585_v0  ;;  %v2453_v35 = vld [vmem:[#allocation3 + $0x24] sm:$0xf] }
  0x19   : > { %v2166_v34 = vor.u32 %v2454_v31, %v2165_v26  ;;  %v2167_v36 = vld [vmem:[#allocation3 + $0x28] sm:$0xf0]  ;;  %v221_v37 = vor.u32 %v219_v20, %v218_v28  ;;  %v222_v38 = vrot.slane %v218_v28, 4  ;;  %v229_v39 = vor.u32 %v227_v22, %v226_v29  ;;  %200 = vst.msk [vmem:[#allocation2 + $0x24] sm:$0xf] %vm189_vm0, %v2585_v0  ;;  %2511 = vmatpush.bf16.msra.mxu2 %v2108_v27  ;;  %s2516_s27 = smul.u32 12, %s3141_s16 }
  0x1a   : > { %v231_v40 = vrot.slane %v226_v29, 4  ;;  %vm317_vm8 = vsmask.f32 3328  ;;  %vm318_vm9 = vsmask.f32 7440  ;;  %v2170_v42 = vor.u32 %v2453_v35, %v2167_v36  ;;  %455 = vmatpush.bf16.msra.mxu0 %v2108_v27 }
  0x1b   : > { %v2157_v41 = vld [vmem:[#allocation3 + $0x10] sm:$0xf]  ;;  %201 = vst.msk [vmem:[#allocation2 + $0x28] sm:$0xf] %vm189_vm0, %v2585_v0  ;;  %v2452_v43 = vld [vmem:[#allocation3 + $0x14] sm:$0xf0]  ;;  %v230_v45 = vsel %vm2641_vm5, %v222_v38, %v229_v39  ;;  %v280_v46 = vsel %vm2649_vm6, %v221_v37, %v279_v24  ;;  %2514 = vmatpush.bf16.msra.mxu3 %v2112_v32  ;;  %479 = vmatpush.bf16.msra.mxu1 %v2112_v32  ;;  %vm2695_vm11 = vmor %vm317_vm8, %vm318_vm9  ;;  %s3082_s30 = scalar_lea.vmem %s3129_s3, %s2516_s27 }
  0x1c   : > { %v2451_v44 = vld [vmem:[#allocation3 + $0x14] sm:$0xf]  ;;  %v286_v47 = vsel %vm2657_vm7, %v231_v40, %v285_v25  ;;  %202 = vst.msk [vmem:[#allocation2 + $0x2c] sm:$0x1] %vm192_vm1, %v2585_v0  ;;  %v2159_v48 = vld [vmem:[#allocation3 + $0x18] sm:$0xf0]  ;;  %v2158_v50 = vor.u32 %v2452_v43, %v2157_v41 }
  0x1d   : > { %v302_v49 = vld [vmem:[#allocation2] sm:$0xf]  ;;  %281 = vst [vmem:[#allocation2 + $0xc] sm:$0xf] %v280_v46  ;;  %555 = vmatpush.bf16.msrb.mxu2 %v2166_v34  ;;  %v2162_v51 = vor.u32 %v2451_v44, %v2159_v48  ;;  %v2675_v52 = vld [vmem:[#allocation2 + $0x4] sm:$0xf] }
  0x1e   : > { %v2677_v53 = vld [vmem:[#allocation2 + $0x8] sm:$0x1]  ;;  %282 = vst.msk [vmem:[#allocation2 + $0x10] sm:$0xf] %vm189_vm0, %v230_v45  ;;  %v321_v54 = vshrl.u32 %v302_v49, 16  ;;  %v324_v55 = vshll.u32 %v302_v49, 16 }
  0x1f   : > { %579 = vmatpush.bf16.msrb.mxu3 %v2170_v42  ;;  %v330_v56 = vshll.u32 %v2675_v52, 16  ;;  %v334_v57 = vshrl.u32 %v2675_v52, 16  ;;  %287 = vst [vmem:[#allocation2 + $0x14] sm:$0x1] %v286_v47  ;;  %v340_v58 = vshll.u32 %v2677_v53, 16  ;;  %vm608_vm13 = vcmask 1046532  }
  0x20   : > { %v208_v59 = vld [vmem:[%s2635_s24 + $0x8] sm:$0xf]  ;;  %203 = vst.msk [vmem:[#allocation2 + $0x30] sm:$0xf] %vm189_vm0, %v2585_v0  ;;  %v323_v60 = vrot.slane %v321_v54, 4  ;;  %v326_v61 = vrot.slane %v324_v55, 5  ;;  %vm2723_vm14 = vmor %vm607_vm12, %vm608_vm13 }
  0x21   : > { %v332_v62 = vrot.slane %v330_v56, 5  ;;  %v336_v63 = vrot.slane %v334_v57, 4  ;;  %204 = vst.msk [vmem:[#allocation2 + $0x34] sm:$0xf] %vm189_vm0, %v2585_v0  ;;  %556 = vmatpush.bf16.msrb.mxu2 %v2158_v50  ;;  %v342_v1 = vrot.slane %v340_v58, 5  ;;  %v233_v3 = vshrl.u32 %v208_v59, 16 }
  0x22   : > { %v209_v2 = vld [vmem:[%s2635_s24 + $0xc] sm:$0xf]  ;;  %205 = vst.msk [vmem:[#allocation2 + $0x38] sm:$0x1] %vm192_vm1, %v2585_v0  ;;  %v327_v4 = vor.u32 %v326_v61, %v323_v60  ;;  %v236_v6 = vshll.u32 %v208_v59, 16  ;;  %vm1972_vm15 = vcmask 1041409  }
  0x23   : > { %580 = vmatpush.bf16.msrb.mxu3 %v2162_v51  ;;  %v337_v5 = vor.u32 %v336_v63, %v332_v62  ;;  %v241_v7 = vshrl.u32 %v209_v2, 16  ;;  %v235_v8 = vrot.slane %v233_v3, 7  ;;  %v244_v13 = vshll.u32 %v209_v2, 16  ;;  %v288_v14 = vld [vmem:[#allocation2 + $0x18] sm:$0xf] }
  0x24   : > { %v304_v9 = vld [vmem:[#allocation2 + $0xc] sm:$0xf]  ;;  %v328_v10 = vrot.slane %v327_v4, 4  ;;  %v2198_v20 = vld [vmem:[#allocation3 + $0x80] sm:$0xf]  ;;  %vm1978_vm1 = vcmask 1043459  }
  0x25   : > { %v338_v11 = vrot.slane %v337_v5, 4  ;;  %v243_v12 = vrot.slane %v241_v7, 7  ;;  %v2691_v15 = vld [vmem:[#allocation2 + $0x10] sm:$0xf]  ;;  %v345_v0 = vshrl.u32 %v304_v9, 16  ;;  %v348_v17 = vshll.u32 %v304_v9, 16 }
  0x26   : > { %v238_v18 = vor.u32 %v236_v6, %v235_v8  ;;  %v239_v19 = vrot.slane %v235_v8, 4  ;;  %v2699_v21 = vld [vmem:[#allocation2 + $0x14] sm:$0x1]  ;;  %v354_v22 = vshll.u32 %v2691_v15, 16  ;;  %v358_v24 = vshrl.u32 %v2691_v15, 16 }
  0x27   : > { %v333_v25 = vsel %vm2695_vm11, %v328_v10, %v332_v62  ;;  %v343_v26 = vsel %vm2695_vm11, %v338_v11, %v342_v1  ;;  %v292_v27 = vld [vmem:[#allocation2 + $0x20] sm:$0x1]  ;;  %v2466_v28 = vld [vmem:[#allocation3 + $0x84] sm:$0xf0]  ;;  %v347_v29 = vrot.slane %v345_v0, 4  ;;  %v350_v31 = vrot.slane %v348_v17, 5 }
  0x28   : > { %v364_v32 = vshll.u32 %v2699_v21, 16  ;;  %v399_v34 = vunpack.c.l.b16 %v333_v25  ;;  %v2465_v35 = vld [vmem:[#allocation3 + $0x84] sm:$0xf]  ;;  %v356_v36 = vrot.slane %v354_v22, 5  ;;  %v360_v37 = vrot.slane %v358_v24, 4 }
  0x29   : > { %v400_v38 = vunpack.c.l.b16 %v343_v26  ;;  %v246_v39 = vor.u32 %v244_v13, %v243_v12  ;;  %v2200_v40 = vld [vmem:[#allocation3 + $0x88] sm:$0xf0]  ;;  %v2149_v41 = vld [vmem:[#allocation3] sm:$0xf]  ;;  %v351_v42 = vor.u32 %v350_v31, %v347_v29  ;;  %v248_v44 = vrot.slane %v243_v12, 4 }
  0x2a   : > { %v366_v43 = vrot.slane %v364_v32, 5  ;;  %v289_v45 = vsel %vm2649_vm6, %v238_v18, %v288_v14  ;;  %v2450_v46 = vld [vmem:[#allocation3 + $0x4] sm:$0xf0]  ;;  %v2449_v47 = vld [vmem:[#allocation3 + $0x4] sm:$0xf]  ;;  %v361_v48 = vor.u32 %v360_v37, %v356_v36  ;;  %v2199_v51 = vor.u32 %v2466_v28, %v2198_v20 }
  0x2b   : > { %v405_v49 = vpack.c.b16 %v400_v38, %v399_v34  ;;  %v247_v50 = vsel %vm2641_vm5, %v239_v19, %v246_v39  ;;  %290 = vst [vmem:[#allocation2 + $0x18] sm:$0xf] %v289_v45  ;;  %v2151_v54 = vld [vmem:[#allocation3 + $0x8] sm:$0xf0]  ;;  %v2190_v55 = vld [vmem:[#allocation3 + $0x70] sm:$0xf]  ;;  %v293_v57 = vsel %vm2657_vm7, %v248_v44, %v292_v27  ;;  %v2203_v58 = vor.u32 %v2465_v35, %v2200_v40 }
  0x2c   : > { %v352_v56 = vrot.slane %v351_v42, 4  ;;  %291 = vst.msk [vmem:[#allocation2 + $0x1c] sm:$0xf] %vm189_vm0, %v247_v50  ;;  %v2150_v59 = vor.u32 %v2450_v46, %v2149_v41  ;;  %v2464_v60 = vld [vmem:[#allocation3 + $0x74] sm:$0xf0]  ;;  %v362_v61 = vrot.slane %v361_v48, 4  ;;  %v2154_v62 = vor.u32 %v2449_v47, %v2151_v54  ;;  %691 = vmatpush.bf16.msrb.mxu0 %v2199_v51 }
  0x2d   : > { %2129 = vmatmul.msk.bf16.vlgmr.msra.gmra.mxu0 %vm438_vm10, %v405_v49  ;;  %294 = vst [vmem:[#allocation2 + $0x20] sm:$0x1] %v293_v57  ;;  %2132 = vmatmul.msk.bf16.vlgmr.msra.gmra.mxu1 %vm438_vm10, %v405_v49  ;;  %v2463_v63 = vld [vmem:[#allocation3 + $0x74] sm:$0xf]  ;;  %v2191_v2 = vor.u32 %v2464_v60, %v2190_v55  ;;  %v2192_v3 = vld [vmem:[#allocation3 + $0x78] sm:$0xf0] }
  0x2e   : > { %v357_v1 = vsel %vm2695_vm11, %v352_v56, %v356_v36  ;;  %715 = vmatpush.bf16.msrb.mxu1 %v2203_v58  ;;  %v2182_v4 = vld [vmem:[#allocation3 + $0x60] sm:$0xf]  ;;  %v2462_v5 = vld [vmem:[#allocation3 + $0x64] sm:$0xf0]  ;;  %v367_v6 = vsel %vm2695_vm11, %v362_v61, %v366_v43  ;;  %557 = vmatpush.bf16.msrb.mxu2 %v2150_v59  ;;  %v2195_v8 = vor.u32 %v2463_v63, %v2192_v3  ;;  %v2461_v9 = vld [vmem:[#allocation3 + $0x64] sm:$0xf] }
  0x2f   : > { %v401_v7 = vunpack.c.l.b16 %v357_v1  ;;  %581 = vmatpush.bf16.msrb.mxu3 %v2154_v62  ;;  %v2184_v10 = vld [vmem:[#allocation3 + $0x68] sm:$0xf0]  ;;  %v598_v11 = vld [vmem:[#allocation2] sm:$0xe]  ;;  %v402_v12 = vunpack.c.l.b16 %v367_v6  ;;  %v615_v14 = vrot.slane %v2677_v53, 5  ;;  %v612_v17 = vrot.slane %v2675_v52, 5 }
  0x30   : > { %v2177_v13 = vrot.slane %v598_v11, 9  ;;  %692 = vmatpush.bf16.msrb.mxu0 %v2191_v2  ;;  %v2183_v20 = vor.u32 %v2462_v5, %v2182_v4  ;;  %v2187_v22 = vor.u32 %v2461_v9, %v2184_v10  ;;  %v2240_v32 = vld [vmem:[#allocation3 + $0xb0] sm:$0xf]  ;;  %v2475_v38 = vld [vmem:[#allocation3 + $0xb4] sm:$0xf0]  ;;  %v619_v61 = vrot.slane %v2691_v15, 5 }
  0x31   : > { %v406_v18 = vpack.c.b16 %v402_v12, %v401_v7  ;;  %v614_v27 = vrot.slane %v612_v17, 4  ;;  %v2241_v42 = vor.u32 %v2475_v38, %v2240_v32  ;;  %v2474_v43 = vld [vmem:[#allocation3 + $0xb4] sm:$0xf]  ;;  %v2242_v44 = vld [vmem:[#allocation3 + $0xb8] sm:$0xf0]  ;;  %v622_v5 = vrot.slane %v2699_v21, 5 }
  0x32   : > { %v306_v19 = vld [vmem:[#allocation2 + $0x18] sm:$0xf]  ;;  %716 = vmatpush.bf16.msrb.mxu1 %v2195_v8  ;;  %v613_v53 = vsel %vm2723_vm14, %v2177_v13, %v612_v17  ;;  %v2245_v46 = vor.u32 %v2474_v43, %v2242_v44  ;;  %v2270_v47 = vld [vmem:[#allocation3 + $0xe0] sm:$0xf]  ;;  %v2481_v48 = vld [vmem:[#allocation3 + $0xe4] sm:$0xf0] }
  0x33   : > { %v2728_v24 = vld [vmem:[#allocation2 + $0x1c] sm:$0xf]  ;;  %v369_v25 = vshrl.u32 %v306_v19, 16  ;;  %v372_v26 = vshll.u32 %v306_v19, 16  ;;  %2130 = vmatmul.msk.bf16.vlgmr.msra.gmra.mxu2 %vm438_vm10, %v406_v18  ;;  %2133 = vmatmul.msk.bf16.vlgmr.msra.gmra.mxu3 %vm438_vm10, %v406_v18  ;;  %v638_v31 = vunpack.c.l.b16 %v613_v53  ;;  %v616_v37 = vsel %vm2723_vm14, %v614_v27, %v615_v14  ;;  %v2480_v54 = vld [vmem:[#allocation3 + $0xe4] sm:$0xf] }
  0x34   : > { %v2734_v28 = vld [vmem:[#allocation2 + $0x20] sm:$0x1]  ;;  %v378_v52 = vshll.u32 %v2728_v24, 16  ;;  %v382_v29 = vshrl.u32 %v2728_v24, 16  ;;  %693 = vmatpush.bf16.msrb.mxu0 %v2183_v20  ;;  %v639_v41 = vunpack.c.l.b16 %v616_v37  ;;  %818 = vmatpush.bf16.msra.mxu2 %v2241_v42  ;;  %v2271_v51 = vor.u32 %v2481_v48, %v2270_v47  ;;  %v2272_v55 = vld [vmem:[#allocation3 + $0xe8] sm:$0xf0] }
  0x35   : > { %v371_v34 = vrot.slane %v369_v25, 4  ;;  %v374_v35 = vrot.slane %v372_v26, 5  ;;  %v388_v36 = vshll.u32 %v2734_v28, 16  ;;  %842 = vmatpush.bf16.msra.mxu3 %v2245_v46  ;;  %v2275_v58 = vor.u32 %v2480_v54, %v2272_v55  ;;  %v599_v1 = vld [vmem:[#allocation2 + $0xc] sm:$0xe]  ;;  %v2446_v32 = vld [vmem:[#allocation2] sm:$0xff] }
  0x36   : > { %v380_v39 = vrot.slane %v378_v52, 5  ;;  %v384_v40 = vrot.slane %v382_v29, 4  ;;  %717 = vmatpush.bf16.msrb.mxu1 %v2187_v22  ;;  %v644_v57 = vpack.c.b16 %v639_v41, %v638_v31  ;;  %v2178_v3 = vrot.slane %v599_v1, 9  ;;  %v2232_v8 = vld [vmem:[#allocation3 + $0xa0] sm:$0xf] }
  0x37   : > { %v375_v45 = vor.u32 %v374_v35, %v371_v34  ;;  %v390_v50 = vrot.slane %v388_v36, 5  ;;  %v621_v4 = vrot.slane %v619_v61, 4  ;;  %v2473_v9 = vld [vmem:[#allocation3 + $0xa4] sm:$0xf0]  ;;  %v2472_v10 = vld [vmem:[#allocation3 + $0xa4] sm:$0xf] }
  0x38   : > { %v385_v49 = vor.u32 %v384_v40, %v380_v39  ;;  %1014 = vmatpush.bf16.msra.mxu0 %v2271_v51  ;;  %v620_v7 = vsel %vm2723_vm14, %v2178_v3, %v619_v61  ;;  %v2233_v13 = vor.u32 %v2473_v9, %v2232_v8  ;;  %v2234_v14 = vld [vmem:[#allocation3 + $0xa8] sm:$0xf0]  ;;  %v2262_v17 = vld [vmem:[#allocation3 + $0xd0] sm:$0xf]  ;;  %v2479_v21 = vld [vmem:[#allocation3 + $0xd4] sm:$0xf0] }
  0x39   : > { %v376_v56 = vrot.slane %v375_v45, 4  ;;  %v623_v15 = vsel %vm2723_vm14, %v621_v4, %v622_v5  ;;  %v640_v11 = vunpack.c.l.b16 %v620_v7  ;;  %v2237_v18 = vor.u32 %v2472_v10, %v2234_v14  ;;  %v2478_v20 = vld [vmem:[#allocation3 + $0xd4] sm:$0xf]  ;;  %v2264_v22 = vld [vmem:[#allocation3 + $0xd8] sm:$0xf0] }
  0x3a   : > { %v386_v59 = vrot.slane %v385_v49, 4  ;;  %1038 = vmatpush.bf16.msra.mxu1 %v2275_v58  ;;  %v641_v12 = vunpack.c.l.b16 %v623_v15  ;;  %v2263_v19 = vor.u32 %v2479_v21, %v2262_v17  ;;  %819 = vmatpush.bf16.msra.mxu2 %v2233_v13  ;;  %v2267_v25 = vor.u32 %v2478_v20, %v2264_v22  ;;  %v600_v27 = vld [vmem:[#allocation2 + $0x18] sm:$0xe]  ;;  %v2471_v36 = vld [vmem:[#allocation3 + $0x94] sm:$0xf0]  ;;  %v2447_v5 = vld [vmem:[#allocation2 + $0xc] sm:$0xff] }
  0x3b   : > { %v381_v60 = vsel %vm2695_vm11, %v376_v56, %v380_v39  ;;  %843 = vmatpush.bf16.msra.mxu3 %v2237_v18  ;;  %v626_v53 = vrot.slane %v2728_v24, 5  ;;  %v2179_v52 = vrot.slane %v600_v27, 9  ;;  %v629_v31 = vrot.slane %v2734_v28, 5  ;;  %v2224_v24 = vld [vmem:[#allocation3 + $0x90] sm:$0xf] }
  0x3c   : > { %v391_v62 = vsel %vm2695_vm11, %v386_v59, %v390_v50  ;;  %v403_v63 = vunpack.c.l.b16 %v381_v60  ;;  %1015 = vmatpush.bf16.msra.mxu0 %v2263_v19  ;;  %v645_v26 = vpack.c.b16 %v641_v12, %v640_v11  ;;  %v2470_v37 = vld [vmem:[#allocation3 + $0x94] sm:$0xf]  ;;  %v2225_v40 = vor.u32 %v2471_v36, %v2224_v24  ;;  %v2226_v41 = vld [vmem:[#allocation3 + $0x98] sm:$0xf0]  ;;  %v2254_v42 = vld [vmem:[#allocation3 + $0xc0] sm:$0xf] }
  0x3d   : > { %v404_v2 = vunpack.c.l.b16 %v391_v62  ;;  %2204 = vmatmul.msk.bf16.vlgmr.msrb.gmra.mxu0 %vm438_vm10, %v644_v57  ;;  %2207 = vmatmul.msk.bf16.vlgmr.msrb.gmra.mxu1 %vm438_vm10, %v644_v57  ;;  %v628_v29 = vrot.slane %v626_v53, 4  ;;  %v627_v34 = vsel %vm2723_vm14, %v2179_v52, %v626_v53  ;;  %v2477_v28 = vld [vmem:[#allocation3 + $0xc4] sm:$0xf0]  ;;  %v2229_v43 = vor.u32 %v2470_v37, %v2226_v41  ;;  %v2476_v45 = vld [vmem:[#allocation3 + $0xc4] sm:$0xf] }
  0x3e   : > { %1039 = vmatpush.bf16.msra.mxu1 %v2267_v25  ;;  %v642_v38 = vunpack.c.l.b16 %v627_v34  ;;  %v2255_v44 = vor.u32 %v2477_v28, %v2254_v42  ;;  %v2256_v46 = vld [vmem:[#allocation3 + $0xc8] sm:$0xf0]  ;;  %820 = vmatpush.bf16.msra.mxu2 %v2225_v40  ;;  %v873_v48 = vld [vmem:[#allocation2 + $0xc] sm:$0xf]  ;;  %v2765_v49 = vld [vmem:[#allocation2 + $0x10] sm:$0xf] }
  0x3f   : > { %v407_v6 = vpack.c.b16 %v404_v2, %v403_v63  ;;  %v630_v35 = vsel %vm2723_vm14, %v628_v29, %v629_v31  ;;  %v2259_v47 = vor.u32 %v2476_v45, %v2256_v46  ;;  %844 = vmatpush.bf16.msra.mxu3 %v2229_v43  ;;  %v883_v50 = vshrl.u32 %v873_v48, 16  ;;  %v2769_v57 = vld [vmem:[#allocation2 + $0x14] sm:$0x1]  ;;  %v2303_v15 = vld [vmem:[#allocation3 + $0x110] sm:$0xf] }
  0x40   : > { %v643_v39 = vunpack.c.l.b16 %v630_v35  ;;  %1016 = vmatpush.bf16.msra.mxu0 %v2255_v44  ;;  %v886_v51 = vshll.u32 %v873_v48, 16  ;;  %v892_v54 = vshll.u32 %v2765_v49, 16  ;;  %v896_v55 = vshrl.u32 %v2765_v49, 16  ;;  %v2487_v8 = vld [vmem:[#allocation3 + $0x114] sm:$0xf0] }
  0x41   : > { %v885_v58 = vrot.slane %v883_v50, 4  ;;  %v902_v62 = vshll.u32 %v2769_v57, 16  ;;  %v2486_v9 = vld [vmem:[#allocation3 + $0x114] sm:$0xf]  ;;  %v2304_v12 = vor.u32 %v2487_v8, %v2303_v15  ;;  %v2305_v13 = vld [vmem:[#allocation3 + $0x118] sm:$0xf0] }
  0x42   : > { %v646_v56 = vpack.c.b16 %v643_v39, %v642_v38  ;;  %1040 = vmatpush.bf16.msra.mxu1 %v2259_v47  ;;  %v888_v59 = vrot.slane %v886_v51, 5  ;;  %v894_v60 = vrot.slane %v892_v54, 5  ;;  %v898_v61 = vrot.slane %v896_v55, 4  ;;  %v2345_v14 = vld [vmem:[#allocation3 + $0x140] sm:$0xf] }
  0x43   : > { %2131 = vmatmul.msk.bf16.gmra.mxu2 %vm438_vm10, %v407_v6  ;;  %2134 = vmatmul.msk.bf16.gmra.mxu3 %vm438_vm10, %v407_v6  ;;  %v904_v4 = vrot.slane %v902_v62, 5  ;;  %v2496_v17 = vld [vmem:[#allocation3 + $0x144] sm:$0xf0]  ;;  %v2308_v21 = vor.u32 %v2486_v9, %v2305_v13  ;;  %v2495_v19 = vld [vmem:[#allocation3 + $0x144] sm:$0xf]  ;;  %vm1981_vm2 = vcmask 1044484  }
  0x44   : > { %v889_v63 = vor.u32 %v888_v59, %v885_v58  ;;  %v899_v1 = vor.u32 %v898_v61, %v894_v60  ;;  %v2346_v18 = vor.u32 %v2496_v17, %v2345_v14  ;;  %v2347_v20 = vld [vmem:[#allocation3 + $0x148] sm:$0xf0]  ;;  %v876_v25 = vld [vmem:[#allocation2 + $0x18] sm:$0xf]  ;;  %v210_v53 = vld [vmem:[%s2635_s24 + $0x10] sm:$0xf] }
  0x45   : > { %v2350_v22 = vor.u32 %v2495_v19, %v2347_v20  ;;  %v907_v27 = vshrl.u32 %v876_v25, 16  ;;  %v910_v52 = vshll.u32 %v876_v25, 16  ;;  %v250_v35 = vshrl.u32 %v210_v53, 16  ;;  %v2786_v36 = vld [vmem:[#allocation2 + $0x20] sm:$0x1]  ;;  %v2448_v59 = vld [vmem:[#allocation2 + $0x18] sm:$0xff] }
  0x46   : > { %v890_v2 = vrot.slane %v889_v63, 4  ;;  %v900_v3 = vrot.slane %v899_v1, 4  ;;  %1290 = vmatpush.bf16.msrb.mxu0 %v2346_v18  ;;  %v926_v41 = vshll.u32 %v2786_v36, 16  ;;  %v253_v28 = vshll.u32 %v210_v53, 16  ;;  %v295_v50 = vld [vmem:[#allocation2 + $0x24] sm:$0xf] }
  0x47   : > { %1314 = vmatpush.bf16.msrb.mxu1 %v2350_v22  ;;  %v909_v37 = vrot.slane %v907_v27, 4  ;;  %v912_v38 = vrot.slane %v910_v52, 5  ;;  %v252_v42 = vrot.slane %v250_v35, 7  ;;  %v299_v62 = vld [vmem:[#allocation2 + $0x2c] sm:$0x1]  ;;  %vm1984_vm3 = vcmask 1045509  }
  0x48   : > { %v895_v6 = vsel %vm2695_vm11, %v890_v2, %v894_v60  ;;  %v905_v7 = vsel %vm2695_vm11, %v900_v3, %v904_v4  ;;  %v928_v55 = vrot.slane %v926_v41, 5  ;;  %v2295_v23 = vld [vmem:[#allocation3 + $0x100] sm:$0xf]  ;;  %v2485_v30 = vld [vmem:[#allocation3 + $0x104] sm:$0xf0]  ;;  %vm1987_vm4 = vcmask 1046534  }
  0x49   : > { %v961_v10 = vunpack.c.l.b16 %v895_v6  ;;  %v962_v11 = vunpack.c.l.b16 %v905_v7  ;;  %v913_v44 = vor.u32 %v912_v38, %v909_v37  ;;  %v255_v47 = vor.u32 %v253_v28, %v252_v42  ;;  %v2484_v3 = vld [vmem:[#allocation3 + $0x104] sm:$0xf]  ;;  %v2297_v7 = vld [vmem:[#allocation3 + $0x108] sm:$0xf0]  ;;  %v2337_v15 = vld [vmem:[#allocation3 + $0x130] sm:$0xf] }
  0x4a   : > { %v256_v48 = vrot.slane %v252_v42, 4  ;;  %v2296_v6 = vor.u32 %v2485_v30, %v2295_v23  ;;  %v2494_v8 = vld [vmem:[#allocation3 + $0x134] sm:$0xf0]  ;;  %v2300_v9 = vor.u32 %v2484_v3, %v2297_v7  ;;  %v2467_v37 = vld [vmem:[#allocation2 + $0xc] sm:$0xff] }
  0x4b   : > { %v967_v34 = vpack.c.b16 %v962_v11, %v961_v10  ;;  %v914_v51 = vrot.slane %v913_v44, 4  ;;  %v296_v58 = vsel %vm2649_vm6, %v255_v47, %v295_v50  ;;  %v2338_v10 = vor.u32 %v2494_v8, %v2337_v15  ;;  %v2493_v11 = vld [vmem:[#allocation3 + $0x134] sm:$0xf]  ;;  %v2483_v41 = vld [vmem:[#allocation3 + $0xf4] sm:$0xf0] }
  0x4c   : > { %297 = vst [vmem:[#allocation2 + $0x24] sm:$0xf] %v296_v58  ;;  %v2482_v42 = vld [vmem:[#allocation3 + $0xf4] sm:$0xf]  ;;  %v2492_v47 = vld [vmem:[#allocation3 + $0x124] sm:$0xf0] }
  0x4d   : > { %2205 = vmatmul.msk.bf16.gmra.mxu0 %vm438_vm10, %v645_v26  ;;  %2208 = vmatmul.msk.bf16.gmra.mxu1 %vm438_vm10, %v645_v26  ;;  %v2780_v26 = vld [vmem:[#allocation2 + $0x1c] sm:$0xf]  ;;  %v2375_v30 = vld [vmem:[#allocation3 + $0x170] sm:$0xf]  ;;  %v2502_v3 = vld [vmem:[#allocation3 + $0x174] sm:$0xf0] }
  0x4e   : > { %v916_v29 = vshll.u32 %v2780_v26, 16  ;;  %v920_v31 = vshrl.u32 %v2780_v26, 16  ;;  %1291 = vmatpush.bf16.msrb.mxu0 %v2338_v10  ;;  %v2408_v15 = vld [vmem:[#allocation3 + $0x1a0] sm:$0xf]  ;;  %v2508_v8 = vld [vmem:[#allocation3 + $0x1a4] sm:$0xf0] }
  0x4f   : > { %v2409_v10 = vor.u32 %v2508_v8, %v2408_v15  ;;  %v1346_v15 = vld [vmem:[#allocation2 + $0x1c] sm:$0xf] }
  0x50   : > { %v918_v39 = vrot.slane %v916_v29, 5  ;;  %v922_v40 = vrot.slane %v920_v31, 4  ;;  %v1555_v8 = vrot.slane %v1346_v15, 5 }
  0x52   : > { %v923_v45 = vor.u32 %v922_v40, %v918_v39  ;;  %v919_v63 = vsel %vm2695_vm11, %v914_v51, %v918_v39  ;;  %v2287_v40 = vld [vmem:[#allocation3 + $0xf0] sm:$0xf]  ;;  %v2491_v51 = vld [vmem:[#allocation3 + $0x124] sm:$0xf] }
  0x53   : > { %2171 = vmatmul.msk.bf16.vlgmr.msrb.gmra.mxu2 %vm438_vm10, %v2446_v32  ;;  %2174 = vmatmul.msk.bf16.vlgmr.msrb.gmra.mxu3 %vm438_vm10, %v2446_v32  ;;  %v211_v32 = vld [vmem:[%s2635_s24 + $0x14] sm:$0xf]  ;;  %v963_v4 = vunpack.c.l.b16 %v919_v63  ;;  %v879_v13 = vld [vmem:[#allocation2 + $0x24] sm:$0xf]  ;;  %v2288_v44 = vor.u32 %v2483_v41, %v2287_v40  ;;  %v2402_v40 = vld [vmem:[#allocation3 + $0x198] sm:$0xf0] }
  0x54   : > { %1162 = vmatpush.bf16.msrb.mxu2 %v2304_v12  ;;  %1186 = vmatpush.bf16.msrb.mxu3 %v2308_v21  ;;  %v258_v24 = vshrl.u32 %v211_v32, 16  ;;  %v261_v46 = vshll.u32 %v211_v32, 16  ;;  %v924_v54 = vrot.slane %v923_v45, 4  ;;  %v2339_v12 = vld [vmem:[#allocation3 + $0x138] sm:$0xf0]  ;;  %v931_v17 = vshrl.u32 %v879_v13, 16 }
  0x55   : > { %v2342_v33 = vor.u32 %v2493_v11, %v2339_v12  ;;  %v934_v21 = vshll.u32 %v879_v13, 16  ;;  %v2289_v45 = vld [vmem:[#allocation3 + $0xf8] sm:$0xf0]  ;;  %v2410_v11 = vld [vmem:[#allocation3 + $0x1a8] sm:$0xf0]  ;;  %v1090_v13 = vrot.slane %v2780_v26, 5 }
  0x56   : > { %v260_v43 = vrot.slane %v258_v24, 7  ;;  %v929_v1 = vsel %vm2695_vm11, %v924_v54, %v928_v55  ;;  %v933_v25 = vrot.slane %v931_v17, 4  ;;  %v2331_v54 = vld [vmem:[#allocation3 + $0x128] sm:$0xf0]  ;;  %v1069_v55 = vld [vmem:[#allocation2 + $0xc] sm:$0xe] }
  0x57   : > { %1315 = vmatpush.bf16.msrb.mxu1 %v2342_v33  ;;  %v936_v53 = vrot.slane %v934_v21, 5  ;;  %v2282_v58 = vrot.slane %v1069_v55, 9  ;;  %v2488_v12 = vld [vmem:[#allocation2 + $0x18] sm:$0xff] }
  0x58   : > { %v265_v61 = vrot.slane %v260_v43, 4  ;;  %1163 = vmatpush.bf16.msrb.mxu2 %v2296_v6  ;;  %1187 = vmatpush.bf16.msrb.mxu3 %v2300_v9  ;;  %v2377_v6 = vld [vmem:[#allocation3 + $0x178] sm:$0xf0]  ;;  %v2507_v9 = vld [vmem:[#allocation3 + $0x1a4] sm:$0xf] }
  0x59   : > { %v937_v31 = vor.u32 %v936_v53, %v933_v25  ;;  %v2413_v33 = vor.u32 %v2507_v9, %v2410_v11  ;;  %v1070_v17 = vld [vmem:[#allocation2 + $0x18] sm:$0xe]  ;;  %v2367_v26 = vld [vmem:[#allocation3 + $0x160] sm:$0xf] }
  0x5a   : > { %v300_v2 = vsel %vm2657_vm7, %v265_v61, %v299_v62  ;;  %v2283_v21 = vrot.slane %v1070_v17, 9  ;;  %v1541_v9 = vld [vmem:[#allocation2 + $0x18] sm:$0xe] }
  0x5b   : > { %301 = vst [vmem:[#allocation2 + $0x2c] sm:$0x1] %v300_v2  ;;  %v2387_v11 = vrot.slane %v1541_v9, 9 }
  0x5c   : > { %1164 = vmatpush.bf16.msrb.mxu2 %v2288_v44 }
  0x5d   : > { %2206 = vmatmul.msk.bf16.gmra.mxu0 %vm438_vm10, %v646_v56  ;;  %2209 = vmatmul.msk.bf16.gmra.mxu1 %vm438_vm10, %v646_v56  ;;  %v263_v56 = vor.u32 %v261_v46, %v260_v43  ;;  %v2329_v46 = vld [vmem:[#allocation3 + $0x120] sm:$0xf] }
  0x5e   : > { %v2330_v50 = vor.u32 %v2492_v47, %v2329_v46 }
  0x5f   : > { %v264_v60 = vsel %vm2641_vm5, %v256_v48, %v263_v56  ;;  %v2292_v48 = vor.u32 %v2482_v42, %v2289_v45  ;;  %v2334_v56 = vor.u32 %v2491_v51, %v2331_v54  ;;  %v1071_v45 = vld [vmem:[#allocation2 + $0x24] sm:$0xe]  ;;  %vm1990_vm5 = vcmask 1047559  }
  0x60   : > { %298 = vst.msk [vmem:[#allocation2 + $0x28] sm:$0xf] %vm189_vm0, %v264_v60  ;;  %v1086_v60 = vrot.slane %v2769_v57, 5  ;;  %1292 = vmatpush.bf16.msrb.mxu0 %v2330_v50  ;;  %v2468_v57 = vld [vmem:[#allocation2 + $0x18] sm:$0xff]  ;;  %v2284_v46 = vrot.slane %v1071_v45, 9  ;;  %vm1975_vm0 = vcmask 1042434  }
  0x61   : > { %1188 = vmatpush.bf16.msrb.mxu3 %v2292_v48  ;;  %1316 = vmatpush.bf16.msrb.mxu1 %v2334_v56 }
  0x62   : > { %v2808_v22 = vld [vmem:[#allocation2 + $0x2c] sm:$0x1] }
  0x63   : > { %2172 = vmatmul.msk.bf16.gmra.mxu2 %vm438_vm10, %v2447_v5  ;;  %2175 = vmatmul.msk.bf16.gmra.mxu3 %vm438_vm10, %v2447_v5  ;;  %v964_v5 = vunpack.c.l.b16 %v929_v1  ;;  %v950_v29 = vshll.u32 %v2808_v22, 16  ;;  %v1100_v48 = vrot.slane %v2808_v22, 5  ;;  %v2359_v22 = vld [vmem:[#allocation3 + $0x150] sm:$0xf] }
  0x64   : > { %v2901_v45 = vld [vmem:[#allocation2 + $0x2c] sm:$0x1] }
  0x65   : > { %v968_v18 = vpack.c.b16 %v964_v5, %v963_v4  ;;  %v952_v35 = vrot.slane %v950_v29, 5  ;;  %v2501_v4 = vld [vmem:[#allocation3 + $0x174] sm:$0xf]  ;;  %v2376_v5 = vor.u32 %v2502_v3, %v2375_v30  ;;  %v2503_v30 = vld [vmem:[#allocation3 + $0x184] sm:$0xf] }
  0x66   : > { %v2380_v7 = vor.u32 %v2501_v4, %v2377_v6  ;;  %v2490_v3 = vld [vmem:[#allocation2 + $0x30] sm:$0xff] }
  0x67   : > { %v2804_v14 = vld [vmem:[#allocation2 + $0x28] sm:$0xf] }
  0x68   : > { %v940_v19 = vshll.u32 %v2804_v14, 16  ;;  %v944_v20 = vshrl.u32 %v2804_v14, 16  ;;  %v2469_v53 = vld [vmem:[#allocation2 + $0x24] sm:$0xff]  ;;  %v1097_v44 = vrot.slane %v2804_v14, 5 }
  0x69   : > { %v2489_v41 = vld [vmem:[#allocation2 + $0x24] sm:$0xff] }
  0x6a   : > { %v942_v27 = vrot.slane %v940_v19, 5  ;;  %v946_v52 = vrot.slane %v944_v20, 4  ;;  %v1093_v19 = vrot.slane %v2786_v36, 5  ;;  %v1091_v20 = vsel %vm2723_vm14, %v2283_v21, %v1090_v13  ;;  %v2369_v36 = vld [vmem:[#allocation3 + $0x168] sm:$0xf0] }
  0x6b   : > { %v1099_v47 = vrot.slane %v1097_v44, 4  ;;  %v1098_v50 = vsel %vm2723_vm14, %v2284_v46, %v1097_v44  ;;  %v1542_v44 = vld [vmem:[#allocation2 + $0x24] sm:$0xe] }
  0x6c   : > { %v947_v32 = vor.u32 %v946_v52, %v942_v27  ;;  %v1113_v54 = vunpack.c.l.b16 %v1098_v50  ;;  %v2388_v46 = vrot.slane %v1542_v44, 9 }
  0x6d   : > { %2276 = vmatmul.msk.bf16.vlgmr.msra.gmra.mxu0 %vm438_vm10, %v967_v34  ;;  %2279 = vmatmul.msk.bf16.vlgmr.msra.gmra.mxu1 %vm438_vm10, %v967_v34  ;;  %v938_v34 = vrot.slane %v937_v31, 4  ;;  %v2500_v31 = vld [vmem:[#allocation3 + $0x164] sm:$0xf0]  ;;  %v1101_v51 = vsel %vm2723_vm14, %v1099_v47, %v1100_v48  ;;  %v1565_v48 = vrot.slane %v2901_v45, 5 }
  0x6e   : > { %v948_v24 = vrot.slane %v947_v32, 4  ;;  %1634 = vmatpush.bf16.msra.mxu0 %v2409_v10  ;;  %1658 = vmatpush.bf16.msra.mxu1 %v2413_v33  ;;  %v2499_v32 = vld [vmem:[#allocation3 + $0x164] sm:$0xf]  ;;  %v1114_v55 = vunpack.c.l.b16 %v1101_v51 }
  0x6f   : > { %v943_v38 = vsel %vm2695_vm11, %v938_v34, %v942_v27  ;;  %v1111_v27 = vunpack.c.l.b16 %v1091_v20  ;;  %v2368_v34 = vor.u32 %v2500_v31, %v2367_v26  ;;  %v1347_v10 = vld [vmem:[#allocation2 + $0x20] sm:$0x1] }
  0x70   : > { %v953_v39 = vsel %vm2695_vm11, %v948_v24, %v952_v35  ;;  %v965_v28 = vunpack.c.l.b16 %v943_v38  ;;  %v2372_v35 = vor.u32 %v2499_v32, %v2369_v36  ;;  %v2400_v24 = vld [vmem:[#allocation3 + $0x190] sm:$0xf]  ;;  %v2505_v38 = vld [vmem:[#allocation3 + $0x194] sm:$0xf]  ;;  %v1558_v33 = vrot.slane %v1347_v10, 5 }
  0x71   : > { %v966_v43 = vunpack.c.l.b16 %v953_v39  ;;  %v2405_v42 = vor.u32 %v2505_v38, %v2402_v40  ;;  %v1368_v36 = vshrl.u32 %v1346_v15, 16 }
  0x73   : > { %2173 = vmatmul.msk.bf16.gmra.mxu2 %vm438_vm10, %v2448_v59  ;;  %2176 = vmatmul.msk.bf16.gmra.mxu3 %vm438_vm10, %v2448_v59  ;;  %v1083_v59 = vrot.slane %v2765_v49, 5  ;;  %v969_v61 = vpack.c.b16 %v966_v43, %v965_v28 }
  0x74   : > { %1659 = vmatpush.bf16.msra.mxu1 %v2405_v42 }
  0x75   : > { %v1084_v62 = vsel %vm2723_vm14, %v2282_v58, %v1083_v59  ;;  %v1085_v63 = vrot.slane %v1083_v59, 4  ;;  %v2859_v58 = vpack.c.b16 %v1114_v55, %v1113_v54  ;;  %v2498_v59 = vld [vmem:[#allocation3 + $0x154] sm:$0xf0] }
  0x76   : > { %v1109_v1 = vunpack.c.l.b16 %v1084_v62  ;;  %v2361_v62 = vld [vmem:[#allocation3 + $0x158] sm:$0xf0] }
  0x77   : > { %v1087_v2 = vsel %vm2723_vm14, %v1085_v63, %v1086_v60  ;;  %v2497_v60 = vld [vmem:[#allocation3 + $0x154] sm:$0xf] }
  0x78   : > { %v1110_v23 = vunpack.c.l.b16 %v1087_v2  ;;  %v2364_v63 = vor.u32 %v2497_v60, %v2361_v62 }
  0x7a   : > { %v2827_v49 = vpack.c.b16 %v1110_v23, %v1109_v1  ;;  %v2392_v23 = vld [vmem:[#allocation3 + $0x180] sm:$0xf] }
  0x7d   : > { %2277 = vmatmul.msk.bf16.gmra.mxu0 %vm438_vm10, %v968_v18  ;;  %2280 = vmatmul.msk.bf16.gmra.mxu1 %vm438_vm10, %v968_v18  ;;  %v1092_v18 = vrot.slane %v1090_v13, 4 }
  0x7f   : > { %v1094_v25 = vsel %vm2723_vm14, %v1092_v18, %v1093_v19  ;;  %v1556_v19 = vsel %vm2723_vm14, %v2387_v11, %v1555_v8 }
  0x80   : > { %v1112_v52 = vunpack.c.l.b16 %v1094_v25  ;;  %v1345_v25 = vld [vmem:[#allocation2 + $0x18] sm:$0xf] }
  0x81   : > { %v1358_v32 = vshll.u32 %v1345_v25, 16 }
  0x82   : > { %v2839_v29 = vpack.c.b16 %v1112_v52, %v1111_v27  ;;  %v1355_v52 = vshrl.u32 %v1345_v25, 16 }
  0x83   : > { %2246 = vmatmul.msk.bf16.vlgmr.msra.gmra.mxu2 %vm438_vm10, %v2467_v37  ;;  %2249 = vmatmul.msk.bf16.vlgmr.msra.gmra.mxu3 %vm438_vm10, %v2467_v37  ;;  %v2506_v37 = vld [vmem:[#allocation3 + $0x194] sm:$0xf0]  ;;  %v1360_v40 = vrot.slane %v1358_v32, 5 }
  0x84   : > { %1486 = vmatpush.bf16.msra.mxu2 %v2376_v5  ;;  %1510 = vmatpush.bf16.msra.mxu3 %v2380_v7  ;;  %v2401_v39 = vor.u32 %v2506_v37, %v2400_v24  ;;  %v2394_v5 = vld [vmem:[#allocation3 + $0x188] sm:$0xf0]  ;;  %v1357_v38 = vrot.slane %v1355_v52, 4 }
  0x85   : > { %v2397_v7 = vor.u32 %v2503_v30, %v2394_v5  ;;  %v1348_v30 = vld [vmem:[#allocation2 + $0x24] sm:$0xf] }
  0x86   : > { %1635 = vmatpush.bf16.msra.mxu0 %v2401_v39  ;;  %v1349_v39 = vld [vmem:[#allocation2 + $0x28] sm:$0xf]  ;;  %v1361_v54 = vor.u32 %v1360_v40, %v1357_v38  ;;  %v1379_v9 = vshrl.u32 %v1348_v30, 16  ;;  %v2938_v40 = vld [vmem:[#allocation2 + $0x38] sm:$0x1] }
  0x87   : > { %1660 = vmatpush.bf16.msra.mxu1 %v2397_v7  ;;  %v1562_v42 = vrot.slane %v1349_v39, 5 }
  0x88   : > { %1487 = vmatpush.bf16.msra.mxu2 %v2368_v34  ;;  %1511 = vmatpush.bf16.msra.mxu3 %v2372_v35  ;;  %v1364_v34 = vshll.u32 %v1346_v15, 16 }
  0x89   : > { %v1564_v47 = vrot.slane %v1562_v42, 4 }
  0x8b   : > { %v1566_v62 = vsel %vm2723_vm14, %v1564_v47, %v1565_v48 }
  0x8c   : > { %1512 = vmatpush.bf16.msra.mxu3 %v2364_v63  ;;  %v1362_v63 = vrot.slane %v1361_v54, 4 }
  0x8d   : > { %2278 = vmatmul.msk.bf16.gmra.mxu0 %vm438_vm10, %v969_v61  ;;  %2281 = vmatmul.msk.bf16.gmra.mxu1 %vm438_vm10, %v969_v61  ;;  %v2360_v61 = vor.u32 %v2498_v59, %v2359_v22  ;;  %v1374_v22 = vshll.u32 %v1347_v10, 16  ;;  %v1382_v10 = vshll.u32 %v1348_v30, 16  ;;  %v1351_v30 = vld [vmem:[#allocation2 + $0x30] sm:$0xf] }
  0x8f   : > { %1488 = vmatpush.bf16.msra.mxu2 %v2360_v61  ;;  %v1563_v61 = vsel %vm2723_vm14, %v2388_v46, %v1562_v42 }
  0x93   : > { %2247 = vmatmul.msk.bf16.gmra.mxu2 %vm438_vm10, %v2468_v57  ;;  %2250 = vmatmul.msk.bf16.gmra.mxu3 %vm438_vm10, %v2468_v57  ;;  %v2504_v57 = vld [vmem:[#allocation3 + $0x184] sm:$0xf0] }
  0x94   : > { %v2393_v4 = vor.u32 %v2504_v57, %v2392_v23  ;;  %v1376_v57 = vrot.slane %v1374_v22, 5 }
  0x96   : > { %1636 = vmatpush.bf16.msra.mxu0 %v2393_v4  ;;  %v1584_v4 = vunpack.c.l.b16 %v1566_v62 }
  0x9d   : > { %2351 = vmatmul.msk.bf16.vlgmr.msrb.gmra.mxu0 %vm438_vm10, %v2488_v12  ;;  %2354 = vmatmul.msk.bf16.vlgmr.msrb.gmra.mxu1 %vm438_vm10, %v2488_v12  ;;  %v1557_v12 = vrot.slane %v1555_v8, 4 }
  0x9f   : > { %v1559_v20 = vsel %vm2723_vm14, %v1557_v12, %v1558_v33  ;;  %v1388_v33 = vshll.u32 %v1349_v39, 16 }
  0xa0   : > { %v1582_v27 = vunpack.c.l.b16 %v1559_v20 }
  0xa3   : > { %2248 = vmatmul.msk.bf16.gmra.mxu2 %vm438_vm10, %v2469_v53  ;;  %2251 = vmatmul.msk.bf16.gmra.mxu3 %vm438_vm10, %v2469_v53  ;;  %v1581_v53 = vunpack.c.l.b16 %v1556_v19  ;;  %v1392_v19 = vshrl.u32 %v1349_v39, 16  ;;  %v1543_v39 = vld [vmem:[#allocation2 + $0x30] sm:$0xe] }
  0xa5   : > { %v1587_v35 = vpack.c.b16 %v1582_v27, %v1581_v53  ;;  %v1352_v27 = vld [vmem:[#allocation2 + $0x34] sm:$0xf]  ;;  %v1394_v38 = vrot.slane %v1392_v19, 4 }
  0xaa   : > { %v2843_v28 = vpop.f32.mrf.mxu0  ;;  %v2845_v43 = vpop.f32.mrf.mxu1 }
  0xad   : > { %2352 = vmatmul.msk.bf16.gmra.mxu0 %vm438_vm10, %v2489_v41  ;;  %2355 = vmatmul.msk.bf16.gmra.mxu1 %vm438_vm10, %v2489_v41  ;;  %v1366_v41 = vrot.slane %v1364_v34, 5 }
  0xaf   : > { %v1367_v15 = vsel %vm2695_vm11, %v1362_v63, %v1366_v41 }
  0xb0   : > { %v1433_v20 = vunpack.c.l.b16 %v1367_v15 }
  0xb2   : > { %v2855_v56 = vpop.f32.mrf.mxu0  ;;  %v2857_v14 = vpop.f32.mrf.mxu1 }
  0xb3   : > { %2309 = vmatmul.msk.bf16.vlgmr.msrb.gmra.mxu2 %vm438_vm10, %v2827_v49  ;;  %2312 = vmatmul.msk.bf16.vlgmr.msrb.gmra.mxu3 %vm438_vm10, %v2827_v49 }
  0xb6   : > { %v2865_v1 = vpop.f32.mrf.mxu2  ;;  %v2867_v2 = vpop.f32.mrf.mxu3 }
  0xba   : > { %v2869_v6 = vpop.f32.mrf.mxu0  ;;  %v2871_v49 = vpop.f32.mrf.mxu1 }
  0xbd   : > { %2353 = vmatmul.msk.bf16.gmra.mxu0 %vm438_vm10, %v2490_v3  ;;  %2356 = vmatmul.msk.bf16.gmra.mxu1 %vm438_vm10, %v2490_v3  ;;  %v1583_v3 = vunpack.c.l.b16 %v1563_v61 }
  0xbe   : > { %v2875_v13 = vpop.f32.mrf.mxu2  ;;  %v2877_v17 = vpop.f32.mrf.mxu3 }
  0xc2   : > { %v2879_v21 = vpop.f32.mrf.mxu0  ;;  %v2881_v18 = vpop.f32.mrf.mxu1 }
  0xc3   : > { %2310 = vmatmul.msk.bf16.gmra.mxu2 %vm438_vm10, %v2839_v29  ;;  %2313 = vmatmul.msk.bf16.gmra.mxu3 %vm438_vm10, %v2839_v29  ;;  %v1370_v29 = vrot.slane %v1368_v36, 4  ;;  %v1381_v36 = vrot.slane %v1379_v9, 4  ;;  %v1406_v9 = vshll.u32 %v1351_v30, 16 }
  0xc5   : > { %v1371_v55 = vor.u32 %v1370_v29, %v1366_v41  ;;  %v2389_v41 = vrot.slane %v1543_v39, 9 }
  0xc6   : > { %v2891_v26 = vpop.f32.mrf.mxu2  ;;  %v2893_v31 = vpop.f32.mrf.mxu3 }
  0xc7   : > { %v1372_v23 = vrot.slane %v1371_v55, 4  ;;  %v1398_v55 = vshll.u32 %v2901_v45, 16 }
  0xc9   : > { %v1377_v8 = vsel %vm2695_vm11, %v1372_v23, %v1376_v57  ;;  %v1400_v57 = vrot.slane %v1398_v55, 5 }
  0xca   : > { %v2895_v24 = vpop.f32.mrf.mxu0  ;;  %v2897_v37 = vpop.f32.mrf.mxu1  ;;  %v1434_v34 = vunpack.c.l.b16 %v1377_v8  ;;  %v1403_v8 = vshrl.u32 %v1351_v30, 16 }
  0xcc   : > { %v1439_v44 = vpack.c.b16 %v1434_v34, %v1433_v20 }
  0xcd   : > { %2414 = vmatmul.msk.bf16.vlgmr.msra.gmra.mxu0 %vm438_vm10, %v1587_v35  ;;  %2417 = vmatmul.msk.bf16.vlgmr.msra.gmra.mxu1 %vm438_vm10, %v1587_v35  ;;  %v1569_v35 = vrot.slane %v1352_v27, 5 }
  0xce   : > { %v2904_v50 = vpop.f32.mrf.mxu2  ;;  %v2906_v51 = vpop.f32.mrf.mxu3 }
  0xcf   : > { %v1571_v29 = vrot.slane %v1569_v35, 4  ;;  %v1570_v62 = vsel %vm2723_vm14, %v2389_v41, %v1569_v35 }
  0xd2   : > { %v2908_v59 = vpop.f32.mrf.mxu0  ;;  %v2910_v60 = vpop.f32.mrf.mxu1 }
  0xd3   : > { %2311 = vmatmul.msk.bf16.gmra.mxu2 %vm438_vm10, %v2859_v58  ;;  %2314 = vmatmul.msk.bf16.gmra.mxu3 %vm438_vm10, %v2859_v58  ;;  %v1588_v58 = vpack.c.b16 %v1584_v4, %v1583_v3  ;;  %v1585_v3 = vunpack.c.l.b16 %v1570_v62 }
  0xd6   : > { %v559_v5 = vpop.f32.mrf.mxu2  ;;  %v583_v7 = vpop.f32.mrf.mxu3 }
  0xd7   : > { %v560_v11 = vadd.f32 %v559_v5, %v2843_v28  ;;  %v584_v12 = vadd.f32 %v583_v7, %v2845_v43  ;;  %v1384_v28 = vrot.slane %v1382_v10, 5  ;;  %v1390_v43 = vrot.slane %v1388_v33, 5 }
  0xd8   : > { %v1412_v10 = vshll.u32 %v1352_v27, 16 }
  0xd9   : > { %v2931_v52 = vadd.f32 %v2869_v6, %v560_v11  ;;  %v2934_v32 = vadd.f32 %v2871_v49, %v584_v12  ;;  %v1572_v6 = vrot.slane %v2938_v40, 5  ;;  %v1385_v46 = vor.u32 %v1384_v28, %v1381_v36 }
  0xda   : > { %v2926_v25 = vpop.f32.mrf.mxu0  ;;  %v2928_v53 = vpop.f32.mrf.mxu1  ;;  %v1395_v54 = vor.u32 %v1394_v38, %v1390_v43  ;;  %v1416_v11 = vshrl.u32 %v1352_v27, 16  ;;  %v1405_v36 = vrot.slane %v1403_v8, 4  ;;  %v1414_v28 = vrot.slane %v1412_v10, 5 }
  0xdb   : > { %v1573_v63 = vsel %vm2723_vm14, %v1571_v29, %v1572_v6  ;;  %v1422_v29 = vshll.u32 %v2938_v40, 16 }
  0xdc   : > { %v1396_v45 = vrot.slane %v1395_v54, 4  ;;  %v1586_v4 = vunpack.c.l.b16 %v1573_v63  ;;  %v1418_v35 = vrot.slane %v1416_v11, 4 }
  0xdd   : > { %2415 = vmatmul.msk.bf16.gmra.mxu0 %vm438_vm10, %v1588_v58  ;;  %2418 = vmatmul.msk.bf16.gmra.mxu1 %vm438_vm10, %v1588_v58 }
  0xde   : > { %v561_v42 = vpop.f32.mrf.mxu2  ;;  %v585_v49 = vpop.f32.mrf.mxu3  ;;  %v1401_v15 = vsel %vm2695_vm11, %v1396_v45, %v1400_v57  ;;  %v1589_v12 = vpack.c.b16 %v1586_v4, %v1585_v3  ;;  %v1419_v41 = vor.u32 %v1418_v35, %v1414_v28 }
  0xdf   : > { %v562_v47 = vadd.f32 %v561_v42, %v2855_v56  ;;  %v586_v48 = vadd.f32 %v585_v49, %v2857_v14  ;;  %v1386_v14 = vrot.slane %v1385_v46, 4  ;;  %v1436_v34 = vunpack.c.l.b16 %v1401_v15 }
  0xe0   : > { %v1420_v46 = vrot.slane %v1419_v41, 4 }
  0xe1   : > { %v2953_v23 = vadd.f32 %v2879_v21, %v562_v47  ;;  %v2956_v56 = vadd.f32 %v2881_v18, %v586_v48  ;;  %v1391_v0 = vsel %vm2695_vm11, %v1386_v14, %v1390_v43  ;;  %v1424_v47 = vrot.slane %v1422_v29, 5 }
  0xe2   : > { %v2944_v22 = vpop.f32.mrf.mxu0  ;;  %v2946_v61 = vpop.f32.mrf.mxu1  ;;  %v1435_v20 = vunpack.c.l.b16 %v1391_v0 }
  0xe3   : > { %2381 = vmatmul.msk.bf16.vlgmr.msra.gmra.mxu2 %vm438_vm10, %v1439_v44  ;;  %2384 = vmatmul.msk.bf16.vlgmr.msra.gmra.mxu3 %vm438_vm10, %v1439_v44 }
  0xe4   : > { %v1440_v39 = vpack.c.b16 %v1436_v34, %v1435_v20 }
  0xe6   : > { %v564_v5 = vpop.f32.mrf.mxu2  ;;  %v588_v7 = vpop.f32.mrf.mxu3 }
  0xe7   : > { %v565_v21 = vadd.f32 %v564_v5, %v2865_v1  ;;  %v589_v18 = vadd.f32 %v588_v7, %v2867_v2  ;;  %v1408_v2 = vrot.slane %v1406_v9, 5 }
  0xe9   : > { %v2967_v19 = vadd.f32 %v2895_v24, %v565_v21  ;;  %v2970_v58 = vadd.f32 %v2897_v37, %v589_v18  ;;  %v1409_v37 = vor.u32 %v1408_v2, %v1405_v36 }
  0xea   : > { %v1018_v33 = vpop.f32.mrf.mxu0  ;;  %v1042_v1 = vpop.f32.mrf.mxu1 }
  0xeb   : > { %v1410_v44 = vrot.slane %v1409_v37, 4 }
  0xed   : > { %2416 = vmatmul.msk.bf16.gmra.mxu0 %vm438_vm10, %v1589_v12  ;;  %2419 = vmatmul.msk.bf16.gmra.mxu1 %vm438_vm10, %v1589_v12 }
  0xee   : > { %v566_v27 = vpop.f32.mrf.mxu2  ;;  %v590_v43 = vpop.f32.mrf.mxu3 }
  0xef   : > { %v567_v38 = vadd.f32 %v566_v27, %v2875_v13  ;;  %v591_v24 = vadd.f32 %v590_v43, %v2877_v17 }
  0xf1   : > { %v740_v6 = vadd.f32 %v2908_v59, %v567_v38  ;;  %v741_v42 = vadd.f32 %v2910_v60, %v591_v24  ;;  %v1415_v59 = vsel %vm2695_vm11, %v1410_v44, %v1414_v28  ;;  %v1425_v60 = vsel %vm2695_vm11, %v1420_v46, %v1424_v47 }
  0xf2   : > { %v1020_v49 = vpop.f32.mrf.mxu0  ;;  %v1044_v13 = vpop.f32.mrf.mxu1  ;;  %v1437_v63 = vunpack.c.l.b16 %v1415_v59  ;;  %v1438_v14 = vunpack.c.l.b16 %v1425_v60 }
  0xf3   : > { %2382 = vmatmul.msk.bf16.gmra.mxu2 %vm438_vm10, %v1440_v39  ;;  %2385 = vmatmul.msk.bf16.gmra.mxu3 %vm438_vm10, %v1440_v39 }
  0xf6   : > { %v569_v48 = vpop.f32.mrf.mxu2  ;;  %v593_v17 = vpop.f32.mrf.mxu3 }
  0xf7   : > { %v570_v54 = vadd.f32 %v569_v48, %v2891_v26  ;;  %v594_v55 = vadd.f32 %v593_v17, %v2893_v31  ;;  %v1441_v31 = vpack.c.b16 %v1438_v14, %v1437_v63 }
  0xf9   : > { %v742_v40 = vadd.f32 %v2926_v25, %v570_v54  ;;  %v743_v62 = vadd.f32 %v2928_v53, %v594_v55 }
  0xfa   : > { %v1023_v45 = vpop.f32.mrf.mxu0  ;;  %v1047_v4 = vpop.f32.mrf.mxu1 }
  0xfe   : > { %v571_v57 = vpop.f32.mrf.mxu2  ;;  %v595_v30 = vpop.f32.mrf.mxu3 }
  0xff   : > { %v572_v3 = vadd.f32 %v571_v57, %v2904_v50  ;;  %v596_v26 = vadd.f32 %v595_v30, %v2906_v51 }
 0x101   : > { %v744_v5 = vadd.f32 %v2944_v22, %v572_v3  ;;  %v745_v16 = vadd.f32 %v2946_v61, %v596_v26 }
 0x102   : > { %v1025_v21 = vpop.f32.mrf.mxu0  ;;  %v1049_v50 = vpop.f32.mrf.mxu1 }
 0x103   : > { %2383 = vmatmul.msk.bf16.gmra.mxu2 %vm438_vm10, %v1441_v31  ;;  %2386 = vmatmul.msk.bf16.gmra.mxu3 %vm438_vm10, %v1441_v31 }
 0x106   : > { %v822_v25 = vpop.f32.mrf.mxu2  ;;  %v846_v53 = vpop.f32.mrf.mxu3 }
 0x107   : > { %v861_v7 = vadd.f32 %v822_v25, %v2931_v52  ;;  %v862_v0 = vadd.f32 %v846_v53, %v2934_v32 }
 0x109   : > { %v1057_v18 = vadd.f32 %v1018_v33, %v861_v7  ;;  %v1058_v51 = vadd.f32 %v1042_v1, %v862_v0 }
 0x10a   : > { %v1028_v9 = vpop.f32.mrf.mxu0  ;;  %v1052_v12 = vpop.f32.mrf.mxu1 }
 0x10e   : > { %v824_v15 = vpop.f32.mrf.mxu2  ;;  %v848_v8 = vpop.f32.mrf.mxu3 }
 0x10f   : > { %v863_v22 = vadd.f32 %v824_v15, %v2953_v23  ;;  %v864_v61 = vadd.f32 %v848_v8, %v2956_v56  ;;  %v3016_v15 = vld [vmem:[%s3128_s2] ss:$0 sm:$0xff] }
 0x111   : > { %v1059_v10 = vadd.f32 %v1020_v49, %v863_v22  ;;  %v1060_v11 = vadd.f32 %v1044_v13, %v864_v61 }
 0x112   : > { %v1030_v33 = vpop.f32.mrf.mxu0  ;;  %v1054_v1 = vpop.f32.mrf.mxu1 }
 0x116   : > { %v827_v20 = vpop.f32.mrf.mxu2  ;;  %v851_v34 = vpop.f32.mrf.mxu3 }
 0x117   : > { %v865_v52 = vadd.f32 %v827_v20, %v2967_v19  ;;  %v866_v32 = vadd.f32 %v851_v34, %v2970_v58 }
 0x119   : > { %v1061_v36 = vadd.f32 %v1023_v45, %v865_v52  ;;  %v1062_v2 = vadd.f32 %v1047_v4, %v866_v32 }
 0x11a   : > { %v1294_v38 = vpop.f32.mrf.mxu0  ;;  %v1318_v29 = vpop.f32.mrf.mxu1 }
 0x11e   : > { %v829_v28 = vpop.f32.mrf.mxu2  ;;  %v853_v35 = vpop.f32.mrf.mxu3 }
 0x11f   : > { %v867_v27 = vadd.f32 %v829_v28, %v740_v6  ;;  %v868_v23 = vadd.f32 %v853_v35, %v741_v42 }
 0x121   : > { %v1063_v43 = vadd.f32 %v1025_v21, %v867_v27  ;;  %v1064_v56 = vadd.f32 %v1049_v50, %v868_v23 }
 0x122   : > { %v1296_v13 = vpop.f32.mrf.mxu0  ;;  %v1320_v48 = vpop.f32.mrf.mxu1 }
 0x126   : > { %v832_v24 = vpop.f32.mrf.mxu2  ;;  %v856_v39 = vpop.f32.mrf.mxu3 }
 0x127   : > { %v869_v37 = vadd.f32 %v832_v24, %v742_v40  ;;  %v870_v41 = vadd.f32 %v856_v39, %v743_v62 }
 0x129   : > { %v1065_v49 = vadd.f32 %v1028_v9, %v869_v37  ;;  %v3001_v19 = vadd.f32 %v1052_v12, %v870_v41 }
 0x12a   : > { %v1299_v55 = vpop.f32.mrf.mxu0  ;;  %v1323_v59 = vpop.f32.mrf.mxu1 }
 0x12e   : > { %v834_v58 = vpop.f32.mrf.mxu2  ;;  %v858_v44 = vpop.f32.mrf.mxu3 }
 0x12f   : > { %v871_v46 = vadd.f32 %v834_v58, %v744_v5  ;;  %v872_v47 = vadd.f32 %v858_v44, %v745_v16 }
 0x131   : > { %v3003_v17 = vadd.f32 %v1030_v33, %v871_v46  ;;  %v3005_v6 = vadd.f32 %v1054_v1, %v872_v47  ;;  %v3033_v47 = vrot.slane %v3016_v15, 4 }
 0x132   : > { %v1301_v62 = vpop.f32.mrf.mxu0  ;;  %v1325_v63 = vpop.f32.mrf.mxu1 }
 0x136   : > { %v1166_v42 = vpop.f32.mrf.mxu2  ;;  %v1190_v54 = vpop.f32.mrf.mxu3 }
 0x137   : > { %v1205_v7 = vadd.f32 %v1166_v42, %v1057_v18  ;;  %v1206_v0 = vadd.f32 %v1190_v54, %v1058_v51  ;;  %v3019_v18 = vrot.slane %v3016_v15, 2 }
 0x139   : > { %v1333_v8 = vadd.f32 %v1294_v38, %v1205_v7  ;;  %v1334_v22 = vadd.f32 %v1318_v29, %v1206_v0 }
 0x13a   : > { %v1304_v57 = vpop.f32.mrf.mxu0  ;;  %v1328_v26 = vpop.f32.mrf.mxu1 }
 0x13e   : > { %v1168_v60 = vpop.f32.mrf.mxu2  ;;  %v1192_v40 = vpop.f32.mrf.mxu3 }
 0x13f   : > { %v1207_v61 = vadd.f32 %v1168_v60, %v1059_v10  ;;  %v1208_v20 = vadd.f32 %v1192_v40, %v1060_v11  ;;  %v3024_v11 = vrot.slane %v3016_v15, 1  ;;  %v3040_v40 = vrot.slane %v3016_v15, 6 }
 0x141   : > { %v1335_v24 = vadd.f32 %v1296_v13, %v1207_v61  ;;  %v1336_v38 = vadd.f32 %v1320_v48, %v1208_v20 }
 0x142   : > { %v3007_v5 = vpop.f32.mrf.mxu0  ;;  %v3009_v16 = vpop.f32.mrf.mxu1 }
 0x146   : > { %v1171_v14 = vpop.f32.mrf.mxu2  ;;  %v1195_v45 = vpop.f32.mrf.mxu3 }
 0x147   : > { %v1209_v34 = vadd.f32 %v1171_v14, %v1061_v36  ;;  %v1210_v33 = vadd.f32 %v1195_v45, %v1062_v2  ;;  %v3027_v36 = vrot.slane %v3019_v18, 1 }
 0x149   : > { %v3021_v39 = vadd.f32 %v1299_v55, %v1209_v34  ;;  %v3029_v2 = vadd.f32 %v1323_v59, %v1210_v33 }
 0x14a   : > { %v1638_v21 = vpop.f32.mrf.mxu0  ;;  %v1662_v50 = vpop.f32.mrf.mxu1 }
 0x14e   : > { %v1173_v30 = vpop.f32.mrf.mxu2  ;;  %v1197_v3 = vpop.f32.mrf.mxu3 }
 0x14f   : > { %v1211_v28 = vadd.f32 %v1173_v30, %v1063_v43  ;;  %v1212_v35 = vadd.f32 %v1197_v3, %v1064_v56 }
 0x151   : > { %v3037_v13 = vadd.f32 %v1325_v63, %v1212_v35  ;;  %v3046_v63 = vrot.slane %v3033_v47, 1 }
 0x152   : > { %v1640_v23 = vpop.f32.mrf.mxu0  ;;  %v1664_v56 = vpop.f32.mrf.mxu1 }
 0x156   : > { %v1176_v31 = vpop.f32.mrf.mxu2  ;;  %v1200_v4 = vpop.f32.mrf.mxu3 }
 0x157   : > { %v1213_v10 = vadd.f32 %v1176_v31, %v1065_v49  ;;  %v1214_v58 = vadd.f32 %v1200_v4, %v3001_v19  ;;  %v3035_v49 = vadd.f32 %v1301_v62, %v1211_v28 }
 0x159   : > { %v3042_v14 = vadd.f32 %v1304_v57, %v1213_v10  ;;  %v3048_v4 = vadd.f32 %v1328_v26, %v1214_v58 }
 0x15a   : > { %v1643_v20 = vpop.f32.mrf.mxu0 }
 0x15e   : > { %v1178_v25 = vpop.f32.mrf.mxu2  ;;  %v3011_v53 = vpop.f32.mrf.mxu3 }
 0x15f   : > { %v3059_v61 = vadd.f32 %v3011_v53, %v3005_v6 }
 0x166   : > { %v1490_v9 = vpop.f32.mrf.mxu2  ;;  %v1514_v12 = vpop.f32.mrf.mxu3 }
 0x167   : > { %v1529_v52 = vadd.f32 %v1490_v9, %v1333_v8  ;;  %v1530_v32 = vadd.f32 %v1514_v12, %v1334_v22  ;;  %v3055_v22 = vrot.slane %v3040_v40, 1 }
 0x169   : > { %v1677_v51 = vadd.f32 %v1638_v21, %v1529_v52  ;;  %v1678_v1 = vadd.f32 %v1662_v50, %v1530_v32  ;;  %v1215_v50 = vadd.f32 %v1178_v25, %v3003_v17 }
 0x16b   : > { %v1689_v27 = vmax.f32 %v1677_v51, %v1678_v1 }
 0x16d   : > { %v1701_v37 = vrot.slane %v1689_v27, 2  ;;  %v1702_v41 = vrot.slane %v1689_v27, 4  ;;  %v1703_v29 = vrot.slane %v1689_v27, 6  ;;  %v2420_v43 = vrot.slane %v1689_v27, 9 }
 0x16e   : > { %v1492_v44 = vpop.f32.mrf.mxu2  ;;  %v1516_v46 = vpop.f32.mrf.mxu3 }
 0x16f   : > { %v2421_v48 = vrot.slane %v1701_v37, 9  ;;  %v2422_v42 = vrot.slane %v1702_v41, 9  ;;  %v2423_v54 = vrot.slane %v1703_v29, 9  ;;  %v1809_v55 = vmax.f32 %v1689_v27, %v2420_v43  ;;  %v1667_v27 = vpop.f32.mrf.mxu1 }
 0x170   : > { %v1531_v59 = vadd.f32 %v1492_v44, %v1335_v24  ;;  %v1532_v60 = vadd.f32 %v1516_v46, %v1336_v38 }
 0x171   : > { %v1810_v19 = vmax.f32 %v1701_v37, %v2421_v48  ;;  %v1811_v45 = vmax.f32 %v1702_v41, %v2422_v42  ;;  %v1812_v30 = vmax.f32 %v1703_v29, %v2423_v54  ;;  %v1851_v3 = vadd.f32 %v3016_v15, %v1809_v55 }
 0x172   : > { %v1679_v62 = vadd.f32 %v1640_v23, %v1531_v59  ;;  %v1680_v31 = vadd.f32 %v1664_v56, %v1532_v60  ;;  %v3063_v41 = vadd.f32 %v3007_v5, %v1215_v50 }
 0x173   : > { %v1852_v7 = vadd.f32 %v3024_v11, %v1810_v19  ;;  %v1853_v0 = vadd.f32 %v3019_v18, %v1811_v45  ;;  %v1854_v21 = vadd.f32 %v3027_v36, %v1812_v30  ;;  %v1875_v57 = vmax.f32 %v1851_v3, 0.0 }
 0x174   : > { %v1690_v8 = vmax.f32 %v1679_v62, %v1680_v31 }
 0x175   : > { %v1876_v26 = vmax.f32 %v1852_v7, 0.0  ;;  %v1877_v9 = vmax.f32 %v1853_v0, 0.0  ;;  %v1878_v12 = vmax.f32 %v1854_v21, 0.0  ;;  %v1899_v25 = vpack.c.bf16 %v1875_v57, %v1875_v57 }
 0x176   : > { %v1704_v34 = vrot.slane %v1690_v8, 2  ;;  %v1705_v52 = vrot.slane %v1690_v8, 4  ;;  %v1706_v32 = vrot.slane %v1690_v8, 6  ;;  %v2424_v33 = vrot.slane %v1690_v8, 9  ;;  %v1495_v51 = vpop.f32.mrf.mxu2  ;;  %v1519_v17 = vpop.f32.mrf.mxu3 }
 0x177   : > { %v1900_v1 = vpack.c.bf16 %v1876_v26, %v1876_v26  ;;  %v1901_v28 = vpack.c.bf16 %v1877_v9, %v1877_v9  ;;  %v1902_v35 = vpack.c.bf16 %v1878_v12, %v1878_v12  ;;  %v1533_v37 = vadd.f32 %v1495_v51, %v3021_v39  ;;  %v1645_v9 = vpop.f32.mrf.mxu0 }
 0x178   : > { %v2425_v23 = vrot.slane %v1704_v34, 9  ;;  %v2426_v24 = vrot.slane %v1705_v52, 9  ;;  %v2427_v6 = vrot.slane %v1706_v32, 9  ;;  %v1813_v53 = vmax.f32 %v1690_v8, %v2424_v33 }
 0x179   : > { %v1948_v38 = vunpack.c.l.b16 %v1900_v1  ;;  %v1949_v10 = vunpack.c.l.b16 %v1901_v28  ;;  %v1947_v44 = vunpack.c.l.b16 %v1899_v25  ;;  %v1950_v46 = vunpack.c.l.b16 %v1902_v35 }
 0x17a   : > { %v1814_v29 = vmax.f32 %v1704_v34, %v2425_v23  ;;  %v1815_v43 = vmax.f32 %v1705_v52, %v2426_v24  ;;  %v1816_v56 = vmax.f32 %v1706_v32, %v2427_v6  ;;  %v1855_v58 = vadd.f32 %v3033_v47, %v1813_v53  ;;  %v1669_v52 = vpop.f32.mrf.mxu1 }
 0x17b   : > { %v1971_v48 = vrot.slane %v1948_v38, 7  ;;  %v1974_v5 = vrot.slane %v1949_v10, 6  ;;  %v1681_v59 = vadd.f32 %v1643_v20, %v1533_v37  ;;  %v1534_v60 = vadd.f32 %v1519_v17, %v3029_v2 }
 0x17c   : > { %v1856_v42 = vadd.f32 %v3046_v63, %v1814_v29  ;;  %v1857_v54 = vadd.f32 %v3040_v40, %v1815_v43  ;;  %v1858_v55 = vadd.f32 %v3055_v22, %v1816_v56  ;;  %v1879_v39 = vmax.f32 %v1855_v58, 0.0 }
 0x17d   : > { %v1973_v19 = vsel %vm1972_vm15, %v1971_v48, %v1947_v44  ;;  %v1977_v7 = vrot.slane %v1950_v46, 5  ;;  %v1682_v21 = vadd.f32 %v1667_v27, %v1534_v60 }
 0x17e   : > { %v1880_v45 = vmax.f32 %v1856_v42, 0.0  ;;  %v1881_v30 = vmax.f32 %v1857_v54, 0.0  ;;  %v1882_v3 = vmax.f32 %v1858_v55, 0.0  ;;  %v1497_v62 = vpop.f32.mrf.mxu2  ;;  %v1521_v31 = vpop.f32.mrf.mxu3  ;;  %v1903_v0 = vpack.c.bf16 %v1879_v39, %v1879_v39 }
 0x17f   : > { %v1535_v57 = vadd.f32 %v1497_v62, %v3035_v49  ;;  %v1536_v12 = vadd.f32 %v1521_v31, %v3037_v13  ;;  %v1976_v2 = vsel %vm1975_vm0, %v1974_v5, %v1973_v19  ;;  %v1691_v34 = vmax.f32 %v1681_v59, %v1682_v21 }
 0x180   : > { %v1904_v50 = vpack.c.bf16 %v1880_v45, %v1880_v45  ;;  %v1905_v8 = vpack.c.bf16 %v1881_v30, %v1881_v30  ;;  %v1906_v26 = vpack.c.bf16 %v1882_v3, %v1882_v3  ;;  %v1951_v20 = vunpack.c.l.b16 %v1903_v0  ;;  %v1648_v0 = vpop.f32.mrf.mxu0 }
 0x181   : > { %v1683_v32 = vadd.f32 %v1645_v9, %v1535_v57  ;;  %v1684_v25 = vadd.f32 %v1669_v52, %v1536_v12  ;;  %v1707_v28 = vrot.slane %v1691_v34, 2  ;;  %v1708_v49 = vrot.slane %v1691_v34, 4 }
 0x182   : > { %v1952_v33 = vunpack.c.l.b16 %v1904_v50  ;;  %v1953_v51 = vunpack.c.l.b16 %v1905_v8  ;;  %v1954_v17 = vunpack.c.l.b16 %v1906_v26  ;;  %v1980_v1 = vrot.slane %v1951_v20, 4 }
 0x183   : > { %v1709_v35 = vrot.slane %v1691_v34, 6  ;;  %v1979_v27 = vsel %vm1978_vm1, %v1977_v7, %v1976_v2  ;;  %v2428_v13 = vrot.slane %v1691_v34, 9  ;;  %v2429_v53 = vrot.slane %v1707_v28, 9 }
 0x184   : > { %v1983_v23 = vrot.slane %v1952_v33, 3  ;;  %v1986_v24 = vrot.slane %v1953_v51, 2  ;;  %v1982_v6 = vsel %vm1981_vm2, %v1980_v1, %v1979_v27  ;;  %v2430_v38 = vrot.slane %v1708_v49, 9  ;;  %v1672_v33 = vpop.f32.mrf.mxu1 }
 0x185   : > { %v2431_v10 = vrot.slane %v1709_v35, 9  ;;  %v1989_v29 = vrot.slane %v1954_v17, 1  ;;  %v1817_v43 = vmax.f32 %v1691_v34, %v2428_v13  ;;  %v1692_v56 = vmax.f32 %v1683_v32, %v1684_v25 }
 0x186   : > { %v1985_v37 = vsel %vm1984_vm3, %v1983_v23, %v1982_v6  ;;  %v1500_v58 = vpop.f32.mrf.mxu2  ;;  %v1818_v46 = vmax.f32 %v1707_v28, %v2429_v53  ;;  %v1819_v48 = vmax.f32 %v1708_v49, %v2430_v38  ;;  %v1524_v30 = vpop.f32.mrf.mxu3  ;;  %v1344_v1 = vadd.f32 %v3009_v16, %v3059_v61 }
 0x187   : > { %v1988_v44 = vsel %vm1987_vm4, %v1986_v24, %v1985_v37  ;;  %v1820_v42 = vmax.f32 %v1709_v35, %v2431_v10  ;;  %v1859_v55 = vadd.f32 %v3016_v15, %v1817_v43  ;;  %v1710_v39 = vrot.slane %v1692_v56, 2 }
 0x188   : > { %v1991_v54 = vsel %vm1990_vm5, %v1989_v29, %v1988_v44  ;;  %v1711_v5 = vrot.slane %v1692_v56, 4  ;;  %v1860_v60 = vadd.f32 %v3024_v11, %v1818_v46  ;;  %v1861_v19 = vadd.f32 %v3019_v18, %v1819_v48 }
 0x189   : > { %v2020_v59 = vpack.c.b16 %v1991_v54, %v1991_v54  ;;  %v1862_v45 = vadd.f32 %v3027_v36, %v1820_v42  ;;  %v1883_v3 = vmax.f32 %v1859_v55, 0.0  ;;  %v1712_v62 = vrot.slane %v1692_v56, 6 }
 0x18a   : > { %v2432_v31 = vrot.slane %v1692_v56, 9  ;;  %v2433_v7 = vrot.slane %v1710_v39, 9  ;;  %v1884_v21 = vmax.f32 %v1860_v60, 0.0  ;;  %v1885_v57 = vmax.f32 %v1861_v19, 0.0 }
 0x18b   : > { %2026 = vst [vmem:[%s3082_s30] sm:$0xf] %v2020_v59  ;;  %v1886_v50 = vmax.f32 %v1862_v45, 0.0  ;;  %v2434_v8 = vrot.slane %v1711_v5, 9  ;;  %v1907_v26 = vpack.c.bf16 %v1883_v3, %v1883_v3  ;;  %v2435_v9 = vrot.slane %v1712_v62, 9 }
 0x18c   : > { %v1821_v12 = vmax.f32 %v1692_v56, %v2432_v31  ;;  %v1822_v2 = vmax.f32 %v1710_v39, %v2433_v7  ;;  %v1908_v20 = vpack.c.bf16 %v1884_v21, %v1884_v21  ;;  %v1909_v34 = vpack.c.bf16 %v1885_v57, %v1885_v57 }
 0x18d   : > { %v1910_v52 = vpack.c.bf16 %v1886_v50, %v1886_v50  ;;  %v1823_v32 = vmax.f32 %v1711_v5, %v2434_v8  ;;  %v1824_v51 = vmax.f32 %v1712_v62, %v2435_v9  ;;  %v1955_v28 = vunpack.c.l.b16 %v1907_v26  ;;  %v1650_v5 = vpop.f32.mrf.mxu0 }
 0x18e   : > { %v1863_v17 = vadd.f32 %v3033_v47, %v1821_v12  ;;  %v1864_v25 = vadd.f32 %v3046_v63, %v1822_v2  ;;  %v1956_v49 = vunpack.c.l.b16 %v1908_v20  ;;  %v1957_v35 = vunpack.c.l.b16 %v1909_v34  ;;  %v1502_v53 = vpop.f32.mrf.mxu2  ;;  %v1526_v54 = vpop.f32.mrf.mxu3 }
 0x18f   : > { %v1865_v27 = vadd.f32 %v3040_v40, %v1823_v32  ;;  %v1866_v23 = vadd.f32 %v3055_v22, %v1824_v51  ;;  %v1537_v6 = vadd.f32 %v1500_v58, %v3042_v14  ;;  %v1958_v38 = vunpack.c.l.b16 %v1910_v52 }
 0x190   : > { %v1887_v24 = vmax.f32 %v1863_v17, 0.0  ;;  %v1888_v13 = vmax.f32 %v1864_v25, 0.0  ;;  %v1992_v10 = vrot.slane %v1956_v49, 7  ;;  %v1994_v37 = vrot.slane %v1957_v35, 6 }
 0x191   : > { %v1889_v29 = vmax.f32 %v1865_v27, 0.0  ;;  %v1890_v43 = vmax.f32 %v1866_v23, 0.0  ;;  %v1685_v16 = vadd.f32 %v1648_v0, %v1537_v6  ;;  %v1538_v48 = vadd.f32 %v1524_v30, %v3048_v4 }
 0x192   : > { %v1911_v56 = vpack.c.bf16 %v1887_v24, %v1887_v24  ;;  %v1912_v44 = vpack.c.bf16 %v1888_v13, %v1888_v13  ;;  %v1993_v61 = vsel %vm1972_vm15, %v1992_v10, %v1955_v28  ;;  %v1539_v42 = vadd.f32 %v1502_v53, %v3063_v41  ;;  %v1674_v41 = vpop.f32.mrf.mxu1 }
 0x193   : > { %v1913_v46 = vpack.c.bf16 %v1889_v29, %v1889_v29  ;;  %v1995_v55 = vsel %vm1975_vm0, %v1994_v37, %v1993_v61  ;;  %v1914_v14 = vpack.c.bf16 %v1890_v43, %v1890_v43  ;;  %v1996_v59 = vrot.slane %v1958_v38, 5 }
 0x194   : > { %v1959_v58 = vunpack.c.l.b16 %v1911_v56  ;;  %v1960_v39 = vunpack.c.l.b16 %v1912_v44  ;;  %v1686_v19 = vadd.f32 %v1672_v33, %v1538_v48  ;;  %v1687_v45 = vadd.f32 %v1650_v5, %v1539_v42 }
 0x195   : > { %v1961_v60 = vunpack.c.l.b16 %v1913_v46  ;;  %v1962_v3 = vunpack.c.l.b16 %v1914_v14  ;;  %v1540_v7 = vadd.f32 %v1526_v54, %v1344_v1  ;;  %v1997_v0 = vsel %vm1978_vm1, %v1996_v59, %v1995_v55 }
 0x196   : > { %v1998_v62 = vrot.slane %v1959_v58, 4  ;;  %v2000_v31 = vrot.slane %v1960_v39, 3  ;;  %v1693_v30 = vmax.f32 %v1685_v16, %v1686_v19 }
 0x197   : > { %v2002_v4 = vrot.slane %v1961_v60, 2  ;;  %v2004_v57 = vrot.slane %v1962_v3, 1  ;;  %v1688_v50 = vadd.f32 %v1674_v41, %v1540_v7 }
 0x198   : > { %v1999_v21 = vsel %vm1981_vm2, %v1998_v62, %v1997_v0  ;;  %v1713_v26 = vrot.slane %v1693_v30, 2  ;;  %v1714_v9 = vrot.slane %v1693_v30, 4  ;;  %v1715_v12 = vrot.slane %v1693_v30, 6 }
 0x199   : > { %v2001_v8 = vsel %vm1984_vm3, %v2000_v31, %v1999_v21  ;;  %v2436_v20 = vrot.slane %v1693_v30, 9  ;;  %v1694_v34 = vmax.f32 %v1687_v45, %v1688_v50 }
 0x19a   : > { %v2003_v2 = vsel %vm1987_vm4, %v2002_v4, %v2001_v8  ;;  %v2437_v32 = vrot.slane %v1713_v26, 9  ;;  %v2438_v33 = vrot.slane %v1714_v9, 9  ;;  %v2439_v51 = vrot.slane %v1715_v12, 9 }
 0x19b   : > { %v2005_v52 = vsel %vm1990_vm5, %v2004_v57, %v2003_v2  ;;  %v1825_v25 = vmax.f32 %v1693_v30, %v2436_v20  ;;  %v1716_v1 = vrot.slane %v1694_v34, 2  ;;  %v1717_v28 = vrot.slane %v1694_v34, 4 }
 0x19c   : > { %v2021_v17 = vpack.c.b16 %v2005_v52, %v2005_v52  ;;  %v1826_v49 = vmax.f32 %v1713_v26, %v2437_v32  ;;  %v1827_v35 = vmax.f32 %v1714_v9, %v2438_v33  ;;  %v1828_v27 = vmax.f32 %v1715_v12, %v2439_v51 }
 0x19d   : > { %v1718_v23 = vrot.slane %v1694_v34, 6  ;;  %v1867_v24 = vadd.f32 %v3016_v15, %v1825_v25  ;;  %v2440_v13 = vrot.slane %v1694_v34, 9  ;;  %v2441_v6 = vrot.slane %v1716_v1, 9 }
 0x19e   : > { %2027 = vst [vmem:[%s3082_s30 + $0x4] sm:$0xf] %v2021_v17  ;;  %v2442_v53 = vrot.slane %v1717_v28, 9  ;;  %v1868_v38 = vadd.f32 %v3024_v11, %v1826_v49  ;;  %v1869_v10 = vadd.f32 %v3019_v18, %v1827_v35  ;;  %v1870_v37 = vadd.f32 %v3027_v36, %v1828_v27 }
 0x19f   : > { %v2443_v29 = vrot.slane %v1718_v23, 9  ;;  %v1891_v43 = vmax.f32 %v1867_v24, 0.0  ;;  %v1829_v56 = vmax.f32 %v1694_v34, %v2440_v13  ;;  %v1830_v44 = vmax.f32 %v1716_v1, %v2441_v6 }
 0x1a0   : > { %v1831_v16 = vmax.f32 %v1717_v28, %v2442_v53  ;;  %v1892_v61 = vmax.f32 %v1868_v38, 0.0  ;;  %v1893_v46 = vmax.f32 %v1869_v10, 0.0  ;;  %v1894_v48 = vmax.f32 %v1870_v37, 0.0 }
 0x1a1   : > { %v1832_v42 = vmax.f32 %v1718_v23, %v2443_v29  ;;  %v1915_v54 = vpack.c.bf16 %v1891_v43, %v1891_v43  ;;  %v1871_v15 = vadd.f32 %v3033_v47, %v1829_v56  ;;  %v1872_v55 = vadd.f32 %v3046_v63, %v1830_v44 }
 0x1a2   : > { %v1873_v11 = vadd.f32 %v3040_v40, %v1831_v16  ;;  %v1916_v14 = vpack.c.bf16 %v1892_v61, %v1892_v61  ;;  %v1917_v18 = vpack.c.bf16 %v1893_v46, %v1893_v46  ;;  %v1918_v58 = vpack.c.bf16 %v1894_v48, %v1894_v48 }
 0x1a3   : > { %v1874_v36 = vadd.f32 %v3055_v22, %v1832_v42  ;;  %v1895_v39 = vmax.f32 %v1871_v15, 0.0  ;;  %v1896_v5 = vmax.f32 %v1872_v55, 0.0  ;;  %v1963_v47 = vunpack.c.l.b16 %v1915_v54 }
 0x1a4   : > { %v1897_v59 = vmax.f32 %v1873_v11, 0.0  ;;  %v1964_v60 = vunpack.c.l.b16 %v1916_v14  ;;  %v1965_v19 = vunpack.c.l.b16 %v1917_v18  ;;  %v1966_v45 = vunpack.c.l.b16 %v1918_v58 }
 0x1a5   : > { %v1898_v3 = vmax.f32 %v1874_v36, 0.0  ;;  %v1919_v62 = vpack.c.bf16 %v1895_v39, %v1895_v39  ;;  %v1920_v31 = vpack.c.bf16 %v1896_v5, %v1896_v5 }
 0x1a6   : > { %v1921_v7 = vpack.c.bf16 %v1897_v59, %v1897_v59  ;;  %v2006_v0 = vrot.slane %v1964_v60, 7  ;;  %v2008_v63 = vrot.slane %v1965_v19, 6  ;;  %v2010_v21 = vrot.slane %v1966_v45, 5 }
 0x1a7   : > { %v1922_v4 = vpack.c.bf16 %v1898_v3, %v1898_v3  ;;  %v1967_v40 = vunpack.c.l.b16 %v1919_v62  ;;  %v1968_v30 = vunpack.c.l.b16 %v1920_v31 }
 0x1a8   : > { %v1969_v41 = vunpack.c.l.b16 %v1921_v7  ;;  %v2007_v22 = vsel %vm1972_vm15, %v2006_v0, %v1963_v47 }
 0x1a9   : > { %v1970_v57 = vunpack.c.l.b16 %v1922_v4  ;;  %v2009_v50 = vsel %vm1975_vm0, %v2008_v63, %v2007_v22  ;;  %v2012_v8 = vrot.slane %v1967_v40, 4  ;;  %v2014_v26 = vrot.slane %v1968_v30, 3 }
 0x1aa   : > { %v2016_v9 = vrot.slane %v1969_v41, 2  ;;  %v2011_v12 = vsel %vm1978_vm1, %v2010_v21, %v2009_v50 }
 0x1ab   : > { %v2013_v2 = vsel %vm1981_vm2, %v2012_v8, %v2011_v12  ;;  %v2018_v34 = vrot.slane %v1970_v57, 1 }
 0x1ac   : > { %v2015_v20 = vsel %vm1984_vm3, %v2014_v26, %v2013_v2 }
 0x1ad   : > { %v2017_v52 = vsel %vm1987_vm4, %v2016_v9, %v2015_v20 }
 0x1ae   : > { %v2019_v32 = vsel %vm1990_vm5, %v2018_v34, %v2017_v52 }
 0x1af   : > { %v2022_v33 = vpack.c.b16 %v2019_v32, %v2019_v32 }
 0x1b1   : > { %2028 = vst [vmem:[%s3082_s30 + $0x8] sm:$0xf] %v2022_v33 }
 0x1b2 PF: > { %s14_s12 = sadd.s32 1, %s2580_s12  }
 0x1b3   : > { %p11_p7 = scmp.ge.s32.totalorder %s14_s12, 4  }
 0x1b5   :  { %13 = sbr.rel (!%p11_p7) target bundleno = 1 (0x1), region = 77 }
 0x1ba   :  { %2050 = vsyncpa [#allocation4], 1 }
 0x1bb   :  { %2052 = vsyncpa [#allocation4 + $0x1], 1 }

// kernel: video_rating_forward.4
= control target key start
LH: loop header
LB: loop body
LE: loop exit
PB: predicated region body
PF: predicated region fallthrough
CT: control target
= control target key end

     0   :  { %8 = vsyncpa [#allocation4], 0  ;;  %s3008_s12 = smov 0   ;;  %s3290_s0 = inlined_call_operand.vmem [shape: bf16[2,3,8,128], index: 0, kind: input, shape index: {}]   ;;  %s3291_s1 = inlined_call_operand.hbm [shape: bf16[9,128,256], index: 1, kind: input, shape index: {}]   ;;  %s3292_s2 = inlined_call_operand.vmem [shape: f32[1,128], index: 2, kind: input, shape index: {}]   ;;  %s3293_s3 = inlined_call_operand.vmem [shape: bf16[2,3,4,128], index: 3, kind: output, shape index: {}]  }
   0x1 LB: > { %s124_s15 = sshll.u32 %s3291_s1, 4  ;;  %s3017_s16 = sadd.s32 4294967295, %s2982_s12   ;;  %s2982_s12 = sphi %s3008_s12, %s14_s12   ;;  %s125_s15 = int_to_ptr.hbm [resolvable:$true] %s124_s15 }
   0x2   : > { %p2136_p0 = scmp.ge.s32.totalorder %s2982_s12, 1  ;;  %p113_p1 = scmp.lt.s32.totalorder %s2982_s12, 3 }
   0x3   : > { %p2927_p2 = scmp.eq.s32.totalorder %s3017_s16, 0  ;;  %s2984_s17 = smov [#allocation3]  }
   0x4   : > { %p114_p3 = pnand %p2136_p0, %p113_p1  ;;  %s126_s18 = sshll.u32 %s2984_s17, 4  ;;  %s127_s18 = int_to_ptr.vmem [resolvable:$true] %s126_s18 }
   0x5   : > { %s2985_s19 = smov 128   ;;  %s2986_s20 = smov 8  }
   0x6   : > { %p2923_p4 = pneg %p114_p3  ;;  %153 = sbr.rel (%p114_p3) target bundleno = 382 (0x17e), region = 32 }
   0x8   : > { %p2924_p5 = pnand %p2927_p2, %p2923_p4 }
   0xa   : > { %2926 = dma.hbm_to_vmem [thread:$0]  (!%p2924_p5), %s125_s15, 18432, %s127_s18, [#allocation4], %s2985_s19, %s2985_s19, %s2986_s20  }
   0xb   : > { %2977 = dma.done.wait (%p2927_p2), [#allocation4], 18432  }
   0xc   : > { %2979 = vsyncadd (%p2927_p2), [#allocation4], 4294948864  ;;  %v2987_v0 = vmov 0   ;;  %p178_p6 = scmp.lt.s32.totalorder %s3017_s16, 1  ;;  %v2201_v1 = vld [vmem:[#allocation3 + $0xf0] sm:$0xf] }
   0xd   : > { %189 = vst [vmem:[#allocation2] sm:$0xf] %v2987_v0  ;;  %v2786_v2 = vld [vmem:[#allocation3 + $0xf4] sm:$0xf0]  ;;  %v2785_v3 = vld [vmem:[#allocation3 + $0xf4] sm:$0xf] }
   0xe   : > { %190 = vst [vmem:[#allocation2 + $0x4] sm:$0x1] %v2987_v0  ;;  %v2202_v4 = vor.u32 %v2786_v2, %v2201_v1  ;;  %v2203_v5 = vld [vmem:[#allocation3 + $0xf8] sm:$0xf0]  ;;  %v2269_v6 = vld [vmem:[#allocation3 + $0x70] sm:$0xf] }
   0xf   : > { %191 = vst [vmem:[#allocation2 + $0x8] sm:$0xf] %v2987_v0  ;;  %v2770_v7 = vld [vmem:[#allocation3 + $0x74] sm:$0xf0]  ;;  %v2206_v8 = vor.u32 %v2785_v3, %v2203_v5  ;;  %v2769_v10 = vld [vmem:[#allocation3 + $0x74] sm:$0xf] }
  0x10   : > { %192 = vst [vmem:[#allocation2 + $0xc] sm:$0x1] %v2987_v0  ;;  %v2270_v9 = vor.u32 %v2770_v7, %v2269_v6  ;;  %v2271_v11 = vld [vmem:[#allocation3 + $0x78] sm:$0xf0]  ;;  %v2193_v12 = vld [vmem:[#allocation3 + $0xe0] sm:$0xf]  ;;  %428 = vmatpush.bf16.msra.mxu0 %v2202_v4 }
  0x11   : > { %193 = vst [vmem:[#allocation2 + $0x10] sm:$0xf] %v2987_v0  ;;  %v2274_v13 = vor.u32 %v2769_v10, %v2271_v11  ;;  %v2784_v14 = vld [vmem:[#allocation3 + $0xe4] sm:$0xf0]  ;;  %v2783_v15 = vld [vmem:[#allocation3 + $0xe4] sm:$0xf]  ;;  %446 = vmatpush.bf16.msra.mxu1 %v2206_v8 }
  0x12   : > { %194 = vst [vmem:[#allocation2 + $0x14] sm:$0x1] %v2987_v0  ;;  %v2195_v16 = vld [vmem:[#allocation3 + $0xe8] sm:$0xf0]  ;;  %554 = vmatpush.bf16.msra.mxu2 %v2270_v9  ;;  %v2194_v17 = vor.u32 %v2784_v14, %v2193_v12  ;;  %v2261_v19 = vld [vmem:[#allocation3 + $0x60] sm:$0xf] }
  0x13   : > { %v2198_v18 = vor.u32 %v2783_v15, %v2195_v16  ;;  %v2768_v20 = vld [vmem:[#allocation3 + $0x64] sm:$0xf0]  ;;  %v2767_v21 = vld [vmem:[#allocation3 + $0x64] sm:$0xf]  ;;  %572 = vmatpush.bf16.msra.mxu3 %v2274_v13  ;;  %v2263_v23 = vld [vmem:[#allocation3 + $0x68] sm:$0xf0] }
  0x14   : > { %v2262_v22 = vor.u32 %v2768_v20, %v2261_v19  ;;  %v2185_v24 = vld [vmem:[#allocation3 + $0xd0] sm:$0xf]  ;;  %v2782_v25 = vld [vmem:[#allocation3 + $0xd4] sm:$0xf0]  ;;  %v2266_v26 = vor.u32 %v2767_v21, %v2263_v23  ;;  %v2781_v27 = vld [vmem:[#allocation3 + $0xd4] sm:$0xf]  ;;  %429 = vmatpush.bf16.msra.mxu0 %v2194_v17 }
  0x15   : > { %v2187_v28 = vld [vmem:[#allocation3 + $0xd8] sm:$0xf0]  ;;  %v2253_v29 = vld [vmem:[#allocation3 + $0x50] sm:$0xf]  ;;  %v2186_v30 = vor.u32 %v2782_v25, %v2185_v24  ;;  %v2766_v31 = vld [vmem:[#allocation3 + $0x54] sm:$0xf0]  ;;  %447 = vmatpush.bf16.msra.mxu1 %v2198_v18 }
  0x16   : > { %v2765_v32 = vld [vmem:[#allocation3 + $0x54] sm:$0xf]  ;;  %v2255_v33 = vld [vmem:[#allocation3 + $0x58] sm:$0xf0]  ;;  %555 = vmatpush.bf16.msra.mxu2 %v2262_v22  ;;  %v2190_v34 = vor.u32 %v2781_v27, %v2187_v28  ;;  %v2254_v35 = vor.u32 %v2766_v31, %v2253_v29  ;;  %v2177_v36 = vld [vmem:[#allocation3 + $0xc0] sm:$0xf] }
  0x17   : > { %v2780_v37 = vld [vmem:[#allocation3 + $0xc4] sm:$0xf0]  ;;  %v2779_v38 = vld [vmem:[#allocation3 + $0xc4] sm:$0xf]  ;;  %573 = vmatpush.bf16.msra.mxu3 %v2266_v26  ;;  %v2258_v39 = vor.u32 %v2765_v32, %v2255_v33  ;;  %v2179_v40 = vld [vmem:[#allocation3 + $0xc8] sm:$0xf0] }
  0x18   : > { %v2245_v41 = vld [vmem:[#allocation3 + $0x40] sm:$0xf]  ;;  %v2764_v42 = vld [vmem:[#allocation3 + $0x44] sm:$0xf0]  ;;  %v2763_v43 = vld [vmem:[#allocation3 + $0x44] sm:$0xf]  ;;  %430 = vmatpush.bf16.msra.mxu0 %v2186_v30  ;;  %v2178_v45 = vor.u32 %v2780_v37, %v2177_v36  ;;  %v2182_v46 = vor.u32 %v2779_v38, %v2179_v40 }
  0x19   : > { %v2247_v44 = vld [vmem:[#allocation3 + $0x48] sm:$0xf0]  ;;  %s3303_s16 = smov (!%p178_p6, %s3017_s16), 1  ;;  %448 = vmatpush.bf16.msra.mxu1 %v2190_v34  ;;  %v2246_v47 = vor.u32 %v2764_v42, %v2245_v41  ;;  %v2169_v48 = vld [vmem:[#allocation3 + $0xb0] sm:$0xf]  ;;  %vm233_vm0 = vcmask 1043456  }
  0x1a   : > { %556 = vmatpush.bf16.msra.mxu2 %v2254_v35  ;;  %v2778_v49 = vld [vmem:[#allocation3 + $0xb4] sm:$0xf0]  ;;  %v2777_v50 = vld [vmem:[#allocation3 + $0xb4] sm:$0xf]  ;;  %v2250_v51 = vor.u32 %v2763_v43, %v2247_v44  ;;  %v2171_v52 = vld [vmem:[#allocation3 + $0xb8] sm:$0xf0] }
  0x1b   : > { %574 = vmatpush.bf16.msra.mxu3 %v2258_v39  ;;  %v2237_v53 = vld [vmem:[#allocation3 + $0x30] sm:$0xf]  ;;  %v2762_v54 = vld [vmem:[#allocation3 + $0x34] sm:$0xf0]  ;;  %v2761_v55 = vld [vmem:[#allocation3 + $0x34] sm:$0xf]  ;;  %v2170_v57 = vor.u32 %v2778_v49, %v2169_v48  ;;  %v2174_v58 = vor.u32 %v2777_v50, %v2171_v52 }
  0x1c   : > { %v2239_v56 = vld [vmem:[#allocation3 + $0x38] sm:$0xf0]  ;;  %s2917_s21 = smul.u32 12, %s3303_s16  ;;  %431 = vmatpush.bf16.msra.mxu0 %v2178_v45  ;;  %vm234_vm1 = vsmask.f32 7938  ;;  %vm239_vm2 = vcmask 1040384   ;;  %v2238_v59 = vor.u32 %v2762_v54, %v2237_v53 }
  0x1d   : > { %449 = vmatpush.bf16.msra.mxu1 %v2182_v46  ;;  %v2161_v60 = vld [vmem:[#allocation3 + $0xa0] sm:$0xf]  ;;  %v2776_v61 = vld [vmem:[#allocation3 + $0xa4] sm:$0xf0]  ;;  %v2775_v62 = vld [vmem:[#allocation3 + $0xa4] sm:$0xf]  ;;  %v2242_v63 = vor.u32 %v2761_v55, %v2239_v56 }
  0x1e   : > { %557 = vmatpush.bf16.msra.mxu2 %v2246_v47  ;;  %v2163_v1 = vld [vmem:[#allocation3 + $0xa8] sm:$0xf0]  ;;  %v2229_v2 = vld [vmem:[#allocation3 + $0x20] sm:$0xf]  ;;  %v2760_v3 = vld [vmem:[#allocation3 + $0x24] sm:$0xf0]  ;;  %s3038_s24 = scalar_lea.vmem %s3290_s0, %s2917_s21  ;;  %v2162_v6 = vor.u32 %v2776_v61, %v2161_v60 }
  0x1f   : > { %575 = vmatpush.bf16.msra.mxu3 %v2250_v51  ;;  %v2759_v4 = vld [vmem:[#allocation3 + $0x24] sm:$0xf]  ;;  %v2231_v5 = vld [vmem:[#allocation3 + $0x28] sm:$0xf0]  ;;  %vm240_vm3 = vsmask.f32 256  ;;  %v2166_v10 = vor.u32 %v2775_v62, %v2163_v1  ;;  %v2230_v11 = vor.u32 %v2760_v3, %v2229_v2  ;;  %vm3057_vm4 = vmand %vm233_vm0, %vm234_vm1 }
  0x20   : > { %432 = vmatpush.bf16.msra.mxu0 %v2170_v57  ;;  %v2153_v7 = vld [vmem:[#allocation3 + $0x90] sm:$0xf]  ;;  %v2774_v8 = vld [vmem:[#allocation3 + $0x94] sm:$0xf0]  ;;  %v2773_v9 = vld [vmem:[#allocation3 + $0x94] sm:$0xf]  ;;  %v2234_v15 = vor.u32 %v2759_v4, %v2231_v5 }
  0x21   : > { %450 = vmatpush.bf16.msra.mxu1 %v2174_v58  ;;  %v2155_v12 = vld [vmem:[#allocation3 + $0x98] sm:$0xf0]  ;;  %v2221_v13 = vld [vmem:[#allocation3 + $0x10] sm:$0xf]  ;;  %v2758_v14 = vld [vmem:[#allocation3 + $0x14] sm:$0xf0]  ;;  %v2154_v28 = vor.u32 %v2774_v8, %v2153_v7 }
  0x22   : > { %558 = vmatpush.bf16.msra.mxu2 %v2238_v59  ;;  %v2757_v16 = vld [vmem:[#allocation3 + $0x14] sm:$0xf]  ;;  %v2223_v17 = vld [vmem:[#allocation3 + $0x18] sm:$0xf0]  ;;  %v199_v18 = vld [vmem:[%s3038_s24] sm:$0xf]  ;;  %v2158_v29 = vor.u32 %v2773_v9, %v2155_v12  ;;  %v2222_v33 = vor.u32 %v2758_v14, %v2221_v13 }
  0x23   : > { %576 = vmatpush.bf16.msra.mxu3 %v2242_v63  ;;  %v3041_v19 = vld [vmem:[#allocation3 + $0x80] sm:$0xf]  ;;  %v3043_v20 = vld [vmem:[#allocation3 + $0x84] sm:$0xf0]  ;;  %v3045_v21 = vld [vmem:[#allocation3 + $0x84] sm:$0xf]  ;;  %v2226_v40 = vor.u32 %v2757_v16, %v2223_v17 }
  0x24   : > { %v3047_v22 = vld [vmem:[#allocation3 + $0x88] sm:$0xf0]  ;;  %v3049_v23 = vld [vmem:[#allocation3] sm:$0xf]  ;;  %v3051_v24 = vld [vmem:[#allocation3 + $0x4] sm:$0xf0]  ;;  %433 = vmatpush.bf16.msra.mxu0 %v2162_v6  ;;  %v2146_v48 = vor.u32 %v3043_v20, %v3041_v19 }
  0x25   : > { %v203_v25 = vshrl.u32 %v199_v18, 16  ;;  %v206_v26 = vshll.u32 %v199_v18, 16  ;;  %v257_v27 = vld [vmem:[#allocation2] sm:$0xf]  ;;  %v236_v30 = vld [vmem:[#allocation2 + $0x8] sm:$0xf]  ;;  %451 = vmatpush.bf16.msra.mxu1 %v2166_v10  ;;  %vm3064_vm5 = vmand %vm239_vm2, %vm240_vm3  ;;  %v2150_v49 = vor.u32 %v3045_v21, %v3047_v22  ;;  %v2214_v50 = vor.u32 %v3051_v24, %v3049_v23 }
  0x26   : > { %v242_v31 = vld [vmem:[#allocation2 + $0xc] sm:$0x1]  ;;  %v3053_v32 = vld [vmem:[#allocation2 + $0x4] sm:$0x1]  ;;  %559 = vmatpush.bf16.msra.mxu2 %v2230_v11  ;;  %v2215_v35 = vld [vmem:[#allocation3 + $0x8] sm:$0xf0] }
  0x27   : > { %v2755_v34 = vld [vmem:[#allocation3 + $0x4] sm:$0xf]  ;;  %v205_v36 = vrot.slane %v203_v25, 7  ;;  %v283_v38 = vshrl.u32 %v257_v27, 16  ;;  %v286_v39 = vshll.u32 %v257_v27, 16  ;;  %577 = vmatpush.bf16.msra.mxu3 %v2234_v15  ;;  %v292_v42 = vshll.u32 %v3053_v32, 16 }
  0x28   : > { %195 = vst [vmem:[#allocation2 + $0x18] sm:$0xf] %v2987_v0  ;;  %v2336_v43 = vld [vmem:[#allocation3 + $0x170] sm:$0xf]  ;;  %434 = vmatpush.bf16.msra.mxu0 %v2154_v28  ;;  %vm279_vm6 = vsmask.f32 3328  ;;  %v2218_v58 = vor.u32 %v2755_v34, %v2215_v35 }
  0x29   : > { %196 = vst [vmem:[#allocation2 + $0x1c] sm:$0x1] %v2987_v0  ;;  %v208_v44 = vor.u32 %v206_v26, %v205_v36  ;;  %v209_v45 = vrot.slane %v205_v36, 4  ;;  %v285_v46 = vrot.slane %v283_v38, 4  ;;  %v288_v47 = vrot.slane %v286_v39, 5  ;;  %452 = vmatpush.bf16.msra.mxu1 %v2158_v29  ;;  %s2918_s27 = smul.u32 6, %s3303_s16 }
  0x2a   : > { %197 = vst [vmem:[#allocation2 + $0x20] sm:$0xf] %v2987_v0  ;;  %vm280_vm7 = vsmask.f32 7440  ;;  %v2802_v51 = vld [vmem:[#allocation3 + $0x174] sm:$0xf0]  ;;  %560 = vmatpush.bf16.msra.mxu2 %v2222_v33 }
  0x2b   : > { %198 = vst [vmem:[#allocation2 + $0x24] sm:$0x1] %v2987_v0  ;;  %v237_v52 = vsel %vm3057_vm4, %v208_v44, %v236_v30  ;;  %v243_v53 = vsel %vm3064_vm5, %v209_v45, %v242_v31  ;;  %v289_v54 = vor.u32 %v288_v47, %v285_v46  ;;  %v2801_v55 = vld [vmem:[#allocation3 + $0x174] sm:$0xf]  ;;  %v2338_v56 = vld [vmem:[#allocation3 + $0x178] sm:$0xf0]  ;;  %578 = vmatpush.bf16.msra.mxu3 %v2226_v40  ;;  %vm3090_vm8 = vmor %vm279_vm6, %vm280_vm7  ;;  %s3269_s30 = scalar_lea.vmem %s3293_s3, %s2918_s27 }
  0x2c   : > { %v2404_v57 = vld [vmem:[#allocation3 + $0x1f0] sm:$0xf]  ;;  %238 = vst [vmem:[#allocation2 + $0x8] sm:$0xf] %v237_v52  ;;  %v2337_v59 = vor.u32 %v2802_v51, %v2336_v43  ;;  %v2819_v60 = vld [vmem:[#allocation3 + $0x1f4] sm:$0xf0]  ;;  %v2341_v63 = vor.u32 %v2801_v55, %v2338_v56  ;;  %435 = vmatpush.bf16.msra.mxu0 %v2146_v48 }
  0x2d   : > { %v2818_v61 = vld [vmem:[#allocation3 + $0x1f4] sm:$0xf]  ;;  %244 = vst [vmem:[#allocation2 + $0xc] sm:$0x1] %v243_v53  ;;  %v3082_v0 = vrot.slane %v289_v54, 4  ;;  %v3084_v62 = vrot.slane %v292_v42, 5  ;;  %v2405_v1 = vor.u32 %v2819_v60, %v2404_v57  ;;  %453 = vmatpush.bf16.msra.mxu1 %v2150_v49 }
  0x2e   : > { %v2406_v2 = vld [vmem:[#allocation3 + $0x1f8] sm:$0xf0]  ;;  %v2328_v4 = vld [vmem:[#allocation3 + $0x160] sm:$0xf]  ;;  %v2800_v5 = vld [vmem:[#allocation3 + $0x164] sm:$0xf0]  ;;  %561 = vmatpush.bf16.msra.mxu2 %v2214_v50 }
  0x2f   : > { %v2409_v3 = vor.u32 %v2818_v61, %v2406_v2  ;;  %v2799_v6 = vld [vmem:[#allocation3 + $0x164] sm:$0xf]  ;;  %v2209_v7 = vld [vmem:[#allocation2] sm:$0xf]  ;;  %v2330_v8 = vld [vmem:[#allocation3 + $0x168] sm:$0xf0]  ;;  %579 = vmatpush.bf16.msra.mxu3 %v2218_v58  ;;  %v2329_v11 = vor.u32 %v2800_v5, %v2328_v4  ;;  %v295_v49 = vsel %vm3090_vm8, %v3082_v0, %v3084_v62 }
  0x30   : > { %v2396_v9 = vld [vmem:[#allocation3 + $0x1e0] sm:$0xf]  ;;  %v2817_v10 = vld [vmem:[#allocation3 + $0x1e4] sm:$0xf0]  ;;  %718 = vmatpush.bf16.msrb.mxu0 %v2337_v59  ;;  %v2816_v12 = vld [vmem:[#allocation3 + $0x1e4] sm:$0xf]  ;;  %v2333_v15 = vor.u32 %v2799_v6, %v2330_v8 }
  0x31   : > { %v2398_v13 = vld [vmem:[#allocation3 + $0x1e8] sm:$0xf0]  ;;  %v2320_v14 = vld [vmem:[#allocation3 + $0x150] sm:$0xf]  ;;  %736 = vmatpush.bf16.msrb.mxu1 %v2341_v63  ;;  %v2397_v16 = vor.u32 %v2817_v10, %v2396_v9  ;;  %v2798_v17 = vld [vmem:[#allocation3 + $0x154] sm:$0xf0] }
  0x32   : > { %870 = vmatpush.bf16.msrb.mxu2 %v2405_v1  ;;  %v2797_v18 = vld [vmem:[#allocation3 + $0x154] sm:$0xf]  ;;  %v2322_v19 = vld [vmem:[#allocation3 + $0x158] sm:$0xf0]  ;;  %v2388_v20 = vld [vmem:[#allocation3 + $0x1d0] sm:$0xf]  ;;  %v2401_v25 = vor.u32 %v2816_v12, %v2398_v13  ;;  %v2321_v31 = vor.u32 %v2798_v17, %v2320_v14 }
  0x33   : > { %888 = vmatpush.bf16.msrb.mxu3 %v2409_v3  ;;  %v2815_v21 = vld [vmem:[#allocation3 + $0x1d4] sm:$0xf0]  ;;  %v2814_v22 = vld [vmem:[#allocation3 + $0x1d4] sm:$0xf]  ;;  %v258_v23 = vld [vmem:[#allocation2 + $0x8] sm:$0xf]  ;;  %v2325_v36 = vor.u32 %v2797_v18, %v2322_v19  ;;  %v341_v3 = vunpack.c.l.b16 %v295_v49 }
  0x34   : > { %v2754_v24 = vld [vmem:[#allocation2 + $0x4] sm:$0xf0]  ;;  %v2390_v26 = vld [vmem:[#allocation3 + $0x1d8] sm:$0xf0]  ;;  %v3086_v27 = vld [vmem:[#allocation2 + $0xc] sm:$0x1]  ;;  %719 = vmatpush.bf16.msrb.mxu0 %v2329_v11  ;;  %v2389_v38 = vor.u32 %v2815_v21, %v2388_v20 }
  0x35   : > { %v297_v28 = vshrl.u32 %v258_v23, 16  ;;  %v300_v29 = vshll.u32 %v258_v23, 16  ;;  %v2210_v30 = vor.u32 %v2754_v24, %v2209_v7  ;;  %v2312_v33 = vld [vmem:[#allocation3 + $0x140] sm:$0xf]  ;;  %v306_v35 = vshll.u32 %v3086_v27, 16  ;;  %737 = vmatpush.bf16.msrb.mxu1 %v2333_v15 }
  0x36   : > { %871 = vmatpush.bf16.msrb.mxu2 %v2397_v16  ;;  %v2796_v39 = vld [vmem:[#allocation3 + $0x144] sm:$0xf0]  ;;  %v2795_v40 = vld [vmem:[#allocation3 + $0x144] sm:$0xf]  ;;  %v2314_v44 = vld [vmem:[#allocation3 + $0x148] sm:$0xf0]  ;;  %v2393_v47 = vor.u32 %v2814_v22, %v2390_v26 }
  0x37   : > { %v299_v42 = vrot.slane %v297_v28, 4  ;;  %v302_v43 = vrot.slane %v300_v29, 5  ;;  %562 = vmatmul.bf16.vlgmr.msra.gmra.mxu2 %v2210_v30  ;;  %580 = vmatmul.bf16.vlgmr.msra.gmra.mxu3 %v2210_v30  ;;  %v2380_v45 = vld [vmem:[#allocation3 + $0x1c0] sm:$0xf]  ;;  %v308_v46 = vrot.slane %v306_v35, 5  ;;  %v2313_v51 = vor.u32 %v2796_v39, %v2312_v33 }
  0x38   : > { %889 = vmatpush.bf16.msrb.mxu3 %v2401_v25  ;;  %v2813_v48 = vld [vmem:[#allocation3 + $0x1c4] sm:$0xf0]  ;;  %720 = vmatpush.bf16.msrb.mxu0 %v2321_v31  ;;  %v2812_v52 = vld [vmem:[#allocation3 + $0x1c4] sm:$0xf]  ;;  %v2382_v53 = vld [vmem:[#allocation3 + $0x1c8] sm:$0xf0]  ;;  %v2317_v55 = vor.u32 %v2795_v40, %v2314_v44 }
  0x39   : > { %v303_v50 = vor.u32 %v302_v43, %v299_v42  ;;  %v200_v54 = vld [vmem:[%s3038_s24 + $0x4] sm:$0xf]  ;;  %738 = vmatpush.bf16.msrb.mxu1 %v2325_v36  ;;  %v2381_v56 = vor.u32 %v2813_v48, %v2380_v45  ;;  %v2304_v59 = vld [vmem:[#allocation3 + $0x130] sm:$0xf]  ;;  %v245_v61 = vld [vmem:[#allocation2 + $0x10] sm:$0xf]  ;;  %v2385_v0 = vor.u32 %v2812_v52, %v2382_v53 }
  0x3a   : > { %872 = vmatpush.bf16.msrb.mxu2 %v2389_v38  ;;  %v211_v57 = vshrl.u32 %v200_v54, 16  ;;  %v214_v58 = vshll.u32 %v200_v54, 16  ;;  %v248_v63 = vld [vmem:[#allocation2 + $0x14] sm:$0x1]  ;;  %v2794_v1 = vld [vmem:[#allocation3 + $0x134] sm:$0xf0] }
  0x3b   : > { %v304_v60 = vrot.slane %v303_v50, 4  ;;  %v2793_v2 = vld [vmem:[#allocation3 + $0x134] sm:$0xf]  ;;  %v2306_v4 = vld [vmem:[#allocation3 + $0x138] sm:$0xf0]  ;;  %v2305_v7 = vor.u32 %v2794_v1, %v2304_v59  ;;  %vm599_vm9 = vcmask 1042432  }
  0x3c   : > { %890 = vmatpush.bf16.msrb.mxu3 %v2393_v47  ;;  %v213_v62 = vrot.slane %v211_v57, 7  ;;  %v2372_v5 = vld [vmem:[#allocation3 + $0x1b0] sm:$0xf]  ;;  %721 = vmatpush.bf16.msrb.mxu0 %v2313_v51  ;;  %v2811_v8 = vld [vmem:[#allocation3 + $0x1b4] sm:$0xf0]  ;;  %v2309_v16 = vor.u32 %v2793_v2, %v2306_v4  ;;  %vm600_vm10 = vcmask 1046532  }
  0x3d   : > { %v309_v6 = vsel %vm3090_vm8, %v304_v60, %v308_v46  ;;  %v2810_v9 = vld [vmem:[#allocation3 + $0x1b4] sm:$0xf]  ;;  %v2374_v10 = vld [vmem:[#allocation3 + $0x1b8] sm:$0xf0]  ;;  %739 = vmatpush.bf16.msrb.mxu1 %v2317_v55  ;;  %v2296_v14 = vld [vmem:[#allocation3 + $0x120] sm:$0xf]  ;;  %v2373_v17 = vor.u32 %v2811_v8, %v2372_v5 }
  0x3e   : > { %v342_v11 = vunpack.c.l.b16 %v309_v6  ;;  %873 = vmatpush.bf16.msrb.mxu2 %v2381_v56  ;;  %v216_v12 = vor.u32 %v214_v58, %v213_v62  ;;  %v217_v13 = vrot.slane %v213_v62, 4  ;;  %v2792_v15 = vld [vmem:[#allocation3 + $0x124] sm:$0xf0]  ;;  %v2791_v18 = vld [vmem:[#allocation3 + $0x124] sm:$0xf]  ;;  %v2377_v22 = vor.u32 %v2810_v9, %v2374_v10  ;;  %vm3122_vm11 = vmor %vm599_vm9, %vm600_vm10 }
  0x3f   : > { %v2298_v23 = vld [vmem:[#allocation3 + $0x128] sm:$0xf0]  ;;  %v2364_v24 = vld [vmem:[#allocation3 + $0x1a0] sm:$0xf]  ;;  %v2809_v25 = vld [vmem:[#allocation3 + $0x1a4] sm:$0xf0]  ;;  %v2297_v26 = vor.u32 %v2792_v15, %v2296_v14 }
  0x40   : > { %v344_v19 = vpack.c.b16 %v342_v11, %v341_v3  ;;  %891 = vmatpush.bf16.msrb.mxu3 %v2385_v0  ;;  %v246_v20 = vsel %vm3057_vm4, %v216_v12, %v245_v61  ;;  %v249_v21 = vsel %vm3064_vm5, %v217_v13, %v248_v63  ;;  %722 = vmatpush.bf16.msrb.mxu0 %v2305_v7  ;;  %v2808_v28 = vld [vmem:[#allocation3 + $0x1a4] sm:$0xf]  ;;  %v2366_v29 = vld [vmem:[#allocation3 + $0x1a8] sm:$0xf0]  ;;  %v2288_v30 = vld [vmem:[#allocation3 + $0x110] sm:$0xf] }
  0x41   : > { %247 = vst [vmem:[#allocation2 + $0x10] sm:$0xf] %v246_v20  ;;  %v2790_v31 = vld [vmem:[#allocation3 + $0x114] sm:$0xf0]  ;;  %740 = vmatpush.bf16.msrb.mxu1 %v2309_v16  ;;  %v2301_v33 = vor.u32 %v2791_v18, %v2298_v23  ;;  %v2365_v35 = vor.u32 %v2809_v25, %v2364_v24  ;;  %v2789_v36 = vld [vmem:[#allocation3 + $0x114] sm:$0xf]  ;;  %v2369_v38 = vor.u32 %v2808_v28, %v2366_v29 }
  0x42   : > { %436 = vmatmul.bf16.vlgmr.msra.gmra.mxu0 %v344_v19  ;;  %454 = vmatmul.bf16.vlgmr.msra.gmra.mxu1 %v344_v19  ;;  %250 = vst [vmem:[#allocation2 + $0x14] sm:$0x1] %v249_v21  ;;  %v2290_v39 = vld [vmem:[#allocation3 + $0x118] sm:$0xf0]  ;;  %v2356_v40 = vld [vmem:[#allocation3 + $0x190] sm:$0xf]  ;;  %v2289_v43 = vor.u32 %v2790_v31, %v2288_v30 }
  0x43   : > { %874 = vmatpush.bf16.msrb.mxu2 %v2373_v17  ;;  %v2807_v42 = vld [vmem:[#allocation3 + $0x194] sm:$0xf0]  ;;  %v2806_v44 = vld [vmem:[#allocation3 + $0x194] sm:$0xf]  ;;  %v2358_v45 = vld [vmem:[#allocation3 + $0x198] sm:$0xf0]  ;;  %v2293_v49 = vor.u32 %v2789_v36, %v2290_v39 }
  0x44   : > { %892 = vmatpush.bf16.msrb.mxu3 %v2377_v22  ;;  %723 = vmatpush.bf16.msrb.mxu0 %v2297_v26  ;;  %v2280_v46 = vld [vmem:[#allocation3 + $0x100] sm:$0xf]  ;;  %v2788_v47 = vld [vmem:[#allocation3 + $0x104] sm:$0xf0]  ;;  %v2787_v48 = vld [vmem:[#allocation3 + $0x104] sm:$0xf]  ;;  %v2357_v50 = vor.u32 %v2807_v42, %v2356_v40  ;;  %v2361_v55 = vor.u32 %v2806_v44, %v2358_v45 }
  0x45   : > { %741 = vmatpush.bf16.msrb.mxu1 %v2301_v33  ;;  %v2282_v51 = vld [vmem:[#allocation3 + $0x108] sm:$0xf0]  ;;  %v2348_v52 = vld [vmem:[#allocation3 + $0x180] sm:$0xf]  ;;  %v2805_v53 = vld [vmem:[#allocation3 + $0x184] sm:$0xf0]  ;;  %v2281_v2 = vor.u32 %v2788_v47, %v2280_v46 }
  0x46   : > { %v2804_v56 = vld [vmem:[#allocation3 + $0x184] sm:$0xf]  ;;  %v2350_v57 = vld [vmem:[#allocation3 + $0x188] sm:$0xf0]  ;;  %v2468_v63 = vld [vmem:[#allocation3 + $0x270] sm:$0xf]  ;;  %v2285_v3 = vor.u32 %v2787_v48, %v2282_v51  ;;  %v2349_v7 = vor.u32 %v2805_v53, %v2348_v52 }
  0x47   : > { %875 = vmatpush.bf16.msrb.mxu2 %v2365_v35  ;;  %v2835_v0 = vld [vmem:[#allocation3 + $0x274] sm:$0xf0]  ;;  %v2834_v62 = vld [vmem:[#allocation3 + $0x274] sm:$0xf]  ;;  %v2470_v8 = vld [vmem:[#allocation3 + $0x278] sm:$0xf0]  ;;  %v2353_v11 = vor.u32 %v2804_v56, %v2350_v57 }
  0x48   : > { %v259_v54 = vld [vmem:[#allocation2 + $0x10] sm:$0xf]  ;;  %893 = vmatpush.bf16.msrb.mxu3 %v2369_v38  ;;  %724 = vmatpush.bf16.msrb.mxu0 %v2289_v43  ;;  %v2535_v9 = vld [vmem:[#allocation3 + $0x2f0] sm:$0xf]  ;;  %v2469_v12 = vor.u32 %v2835_v0, %v2468_v63  ;;  %v2851_v13 = vld [vmem:[#allocation3 + $0x2f4] sm:$0xf0]  ;;  %v2473_v16 = vor.u32 %v2834_v62, %v2470_v8 }
  0x49   : > { %v3106_v58 = vld [vmem:[#allocation2 + $0x14] sm:$0x1]  ;;  %v311_v59 = vshrl.u32 %v259_v54, 16  ;;  %v314_v60 = vshll.u32 %v259_v54, 16  ;;  %v469_v61 = vunpack.c.l.b16 %v259_v54  ;;  %742 = vmatpush.bf16.msrb.mxu1 %v2293_v49  ;;  %v2850_v14 = vld [vmem:[#allocation3 + $0x2f4] sm:$0xf]  ;;  %v2536_v17 = vor.u32 %v2851_v13, %v2535_v9 }
  0x4a   : > { %v320_v1 = vshll.u32 %v3106_v58, 16  ;;  %v2537_v18 = vld [vmem:[#allocation3 + $0x2f8] sm:$0xf0]  ;;  %v2460_v19 = vld [vmem:[#allocation3 + $0x260] sm:$0xf]  ;;  %v604_v47 = vrot.slane %v3053_v32, 5 }
  0x4b   : > { %v313_v4 = vrot.slane %v311_v59, 4  ;;  %v316_v5 = vrot.slane %v314_v60, 5  ;;  %v471_v6 = vpack.c.b16 %v469_v61, %v469_v61  ;;  %876 = vmatpush.bf16.msrb.mxu2 %v2357_v50  ;;  %v2833_v20 = vld [vmem:[#allocation3 + $0x264] sm:$0xf0]  ;;  %v2540_v21 = vor.u32 %v2850_v14, %v2537_v18  ;;  %v2832_v22 = vld [vmem:[#allocation3 + $0x264] sm:$0xf] }
  0x4c   : > { %v322_v10 = vrot.slane %v320_v1, 5  ;;  %894 = vmatpush.bf16.msrb.mxu3 %v2361_v55  ;;  %725 = vmatpush.bf16.msrb.mxu0 %v2281_v2  ;;  %v2462_v23 = vld [vmem:[#allocation3 + $0x268] sm:$0xf0]  ;;  %v2527_v24 = vld [vmem:[#allocation3 + $0x2e0] sm:$0xf]  ;;  %v2461_v30 = vor.u32 %v2833_v20, %v2460_v19  ;;  %v608_v48 = vrot.slane %v3086_v27, 5 }
  0x4d   : > { %v317_v15 = vor.u32 %v316_v5, %v313_v4  ;;  %567 = vmatmul.bf16.gmra.mxu2 %v471_v6  ;;  %585 = vmatmul.bf16.gmra.mxu3 %v471_v6  ;;  %v3109_v26 = vld [vmem:[#allocation2] sm:$0xe]  ;;  %v2849_v28 = vld [vmem:[#allocation3 + $0x2e4] sm:$0xf0]  ;;  %v3111_v29 = vld [vmem:[#allocation2 + $0x8] sm:$0xe]  ;;  %v2465_v36 = vor.u32 %v2832_v22, %v2462_v23 }
  0x4e   : > { %743 = vmatpush.bf16.msrb.mxu1 %v2285_v3  ;;  %v2848_v31 = vld [vmem:[#allocation3 + $0x2e4] sm:$0xf]  ;;  %v2529_v33 = vld [vmem:[#allocation3 + $0x2e8] sm:$0xf0]  ;;  %v2528_v38 = vor.u32 %v2849_v28, %v2527_v24  ;;  %v2452_v39 = vld [vmem:[#allocation3 + $0x250] sm:$0xf] }
  0x4f   : > { %v318_v25 = vrot.slane %v317_v15, 4  ;;  %877 = vmatpush.bf16.msrb.mxu2 %v2349_v7  ;;  %v2831_v40 = vld [vmem:[#allocation3 + $0x254] sm:$0xf0]  ;;  %v2830_v42 = vld [vmem:[#allocation3 + $0x254] sm:$0xf]  ;;  %v2532_v49 = vor.u32 %v2848_v31, %v2529_v33  ;;  %v2275_v51 = vrot.slane %v3109_v26, 9 }
  0x50   : > { %895 = vmatpush.bf16.msrb.mxu3 %v2353_v11  ;;  %1064 = vmatpush.bf16.msra.mxu0 %v2469_v12  ;;  %v2454_v44 = vld [vmem:[#allocation3 + $0x258] sm:$0xf0]  ;;  %v2519_v45 = vld [vmem:[#allocation3 + $0x2d0] sm:$0xf]  ;;  %v2847_v46 = vld [vmem:[#allocation3 + $0x2d4] sm:$0xf0]  ;;  %v2453_v54 = vor.u32 %v2831_v40, %v2452_v39 }
  0x51   : > { %v323_v35 = vsel %vm3090_vm8, %v318_v25, %v322_v10  ;;  %v2276_v52 = vrot.slane %v3111_v29, 9  ;;  %v2344_v53 = vld [vmem:[#allocation2 + $0x8] sm:$0xf]  ;;  %v2846_v55 = vld [vmem:[#allocation3 + $0x2d4] sm:$0xf]  ;;  %v2457_v59 = vor.u32 %v2830_v42, %v2454_v44  ;;  %v2520_v60 = vor.u32 %v2847_v46, %v2519_v45 }
  0x52   : > { %1082 = vmatpush.bf16.msra.mxu1 %v2473_v16  ;;  %v343_v43 = vunpack.c.l.b16 %v323_v35  ;;  %v2521_v56 = vld [vmem:[#allocation3 + $0x2d8] sm:$0xf0]  ;;  %v2803_v57 = vld [vmem:[#allocation2 + $0xc] sm:$0xf0]  ;;  %v2444_v32 = vld [vmem:[#allocation3 + $0x240] sm:$0xf] }
  0x53   : > { %1231 = vmatpush.bf16.msra.mxu2 %v2536_v17  ;;  %v2829_v61 = vld [vmem:[#allocation3 + $0x244] sm:$0xf0]  ;;  %v2828_v27 = vld [vmem:[#allocation3 + $0x244] sm:$0xf]  ;;  %v2446_v63 = vld [vmem:[#allocation3 + $0x248] sm:$0xf0]  ;;  %v2524_v2 = vor.u32 %v2846_v55, %v2521_v56  ;;  %v2345_v9 = vor.u32 %v2803_v57, %v2344_v53  ;;  %v605_v17 = vsel %vm3122_vm11, %v2275_v51, %v604_v47  ;;  %v609_v18 = vsel %vm3122_vm11, %v2276_v52, %v608_v48 }
  0x54   : > { %1249 = vmatpush.bf16.msra.mxu3 %v2540_v21  ;;  %v345_v50 = vpack.c.b16 %v343_v43, %v343_v43  ;;  %1065 = vmatpush.bf16.msra.mxu0 %v2461_v30  ;;  %v201_v1 = vld [vmem:[%s3038_s24 + $0x8] sm:$0xf]  ;;  %v2511_v3 = vld [vmem:[#allocation3 + $0x2c0] sm:$0xf]  ;;  %v2845_v0 = vld [vmem:[#allocation3 + $0x2c4] sm:$0xf0]  ;;  %v2445_v6 = vor.u32 %v2829_v61, %v2444_v32  ;;  %v2449_v13 = vor.u32 %v2828_v27, %v2446_v63  ;;  %v631_v33 = vunpack.c.l.b16 %v605_v17 }
  0x55   : > { %v219_v62 = vshrl.u32 %v201_v1, 16  ;;  %v222_v4 = vshll.u32 %v201_v1, 16  ;;  %v2844_v7 = vld [vmem:[#allocation3 + $0x2c4] sm:$0xf]  ;;  %v2513_v8 = vld [vmem:[#allocation3 + $0x2c8] sm:$0xf0]  ;;  %v2512_v14 = vor.u32 %v2845_v0, %v2511_v3  ;;  %v632_v35 = vunpack.c.l.b16 %v609_v18 }
  0x56   : > { %1083 = vmatpush.bf16.msra.mxu1 %v2465_v36  ;;  %441 = vmatmul.bf16.gmra.mxu0 %v345_v50  ;;  %v2436_v11 = vld [vmem:[#allocation3 + $0x230] sm:$0xf]  ;;  %v2827_v12 = vld [vmem:[#allocation3 + $0x234] sm:$0xf0]  ;;  %v2826_v16 = vld [vmem:[#allocation3 + $0x234] sm:$0xf]  ;;  %v2516_v19 = vor.u32 %v2844_v7, %v2513_v8 }
  0x57   : > { %1232 = vmatpush.bf16.msra.mxu2 %v2528_v38  ;;  %459 = vmatmul.bf16.gmra.mxu1 %v345_v50  ;;  %v3126_v10 = vrot.slane %v219_v62, 7  ;;  %v251_v15 = vld [vmem:[#allocation2 + $0x18] sm:$0xf]  ;;  %v2438_v21 = vld [vmem:[#allocation3 + $0x238] sm:$0xf0]  ;;  %v2437_v24 = vor.u32 %v2827_v12, %v2436_v11  ;;  %v612_v28 = vrot.slane %v3106_v58, 5  ;;  %v634_v50 = vpack.c.b16 %v632_v35, %v631_v33 }
  0x58   : > { %1250 = vmatpush.bf16.msra.mxu3 %v2532_v49  ;;  %1066 = vmatpush.bf16.msra.mxu0 %v2453_v54  ;;  %v2503_v22 = vld [vmem:[#allocation3 + $0x2b0] sm:$0xf]  ;;  %v2843_v23 = vld [vmem:[#allocation3 + $0x2b4] sm:$0xf0]  ;;  %v2842_v25 = vld [vmem:[#allocation3 + $0x2b4] sm:$0xf]  ;;  %v2441_v36 = vor.u32 %v2826_v16, %v2438_v21 }
  0x59   : > { %v224_v20 = vor.u32 %v222_v4, %v3126_v10  ;;  %v2505_v26 = vld [vmem:[#allocation3 + $0x2b8] sm:$0xf0]  ;;  %v2428_v30 = vld [vmem:[#allocation3 + $0x220] sm:$0xf]  ;;  %v2825_v31 = vld [vmem:[#allocation3 + $0x224] sm:$0xf0]  ;;  %v2504_v38 = vor.u32 %v2843_v23, %v2503_v22 }
  0x5a   : > { %1084 = vmatpush.bf16.msra.mxu1 %v2457_v59  ;;  %v3136_v39 = vld [vmem:[#allocation2 + $0x10] sm:$0xe]  ;;  %v2508_v40 = vor.u32 %v2842_v25, %v2505_v26  ;;  %v2824_v42 = vld [vmem:[#allocation3 + $0x224] sm:$0xf]  ;;  %v2430_v43 = vld [vmem:[#allocation3 + $0x228] sm:$0xf0]  ;;  %v2429_v44 = vor.u32 %v2825_v31, %v2428_v30 }
  0x5b   : > { %1233 = vmatpush.bf16.msra.mxu2 %v2520_v60  ;;  %v252_v29 = vsel %vm3057_vm4, %v224_v20, %v251_v15  ;;  %v2495_v45 = vld [vmem:[#allocation3 + $0x2a0] sm:$0xf]  ;;  %v2841_v37 = vld [vmem:[#allocation3 + $0x2a4] sm:$0xf0]  ;;  %v2840_v46 = vld [vmem:[#allocation3 + $0x2a4] sm:$0xf]  ;;  %v2433_v55 = vor.u32 %v2824_v42, %v2430_v43 }
  0x5c   : > { %1251 = vmatpush.bf16.msra.mxu3 %v2524_v2  ;;  %1067 = vmatpush.bf16.msra.mxu0 %v2445_v6  ;;  %253 = vst [vmem:[#allocation2 + $0x18] sm:$0xf] %v252_v29  ;;  %v2497_v47 = vld [vmem:[#allocation3 + $0x2a8] sm:$0xf0]  ;;  %v2420_v48 = vld [vmem:[#allocation3 + $0x210] sm:$0xf]  ;;  %v2496_v56 = vor.u32 %v2841_v37, %v2495_v45 }
  0x5d   : > { %878 = vmatmul.bf16.vlgmr.msrb.gmra.mxu2 %v2345_v9  ;;  %896 = vmatmul.bf16.vlgmr.msrb.gmra.mxu3 %v2345_v9  ;;  %v2823_v49 = vld [vmem:[#allocation3 + $0x214] sm:$0xf0]  ;;  %v2822_v51 = vld [vmem:[#allocation3 + $0x214] sm:$0xf]  ;;  %v2422_v52 = vld [vmem:[#allocation3 + $0x218] sm:$0xf0]  ;;  %v2500_v27 = vor.u32 %v2840_v46, %v2497_v47 }
  0x5e   : > { %1085 = vmatpush.bf16.msra.mxu1 %v2449_v13  ;;  %v2487_v53 = vld [vmem:[#allocation3 + $0x290] sm:$0xf]  ;;  %v2839_v54 = vld [vmem:[#allocation3 + $0x294] sm:$0xf0]  ;;  %v2838_v57 = vld [vmem:[#allocation3 + $0x294] sm:$0xf]  ;;  %v2421_v63 = vor.u32 %v2823_v49, %v2420_v48  ;;  %v2425_v15 = vor.u32 %v2822_v51, %v2422_v52 }
  0x5f   : > { %1234 = vmatpush.bf16.msra.mxu2 %v2512_v14  ;;  %v2489_v59 = vld [vmem:[#allocation3 + $0x298] sm:$0xf0]  ;;  %v912_v60 = vld [vmem:[#allocation2 + $0x8] sm:$0xf]  ;;  %v914_v32 = vld [vmem:[#allocation2 + $0x10] sm:$0xf]  ;;  %v2488_v16 = vor.u32 %v2839_v54, %v2487_v53 }
  0x60   : > { %1252 = vmatpush.bf16.msra.mxu3 %v2516_v19  ;;  %1068 = vmatpush.bf16.msra.mxu0 %v2437_v24  ;;  %v2277_v61 = vrot.slane %v3136_v39, 9  ;;  %v2412_v1 = vld [vmem:[#allocation3 + $0x200] sm:$0xf]  ;;  %v2821_v2 = vld [vmem:[#allocation3 + $0x204] sm:$0xf0]  ;;  %v919_v3 = vshrl.u32 %v912_v60, 16  ;;  %v2492_v20 = vor.u32 %v2838_v57, %v2489_v59 }
  0x61   : > { %v3139_v62 = vld [vmem:[#allocation3 + $0x204] sm:$0xf]  ;;  %v3141_v4 = vld [vmem:[#allocation3 + $0x208] sm:$0xf0]  ;;  %v922_v7 = vshll.u32 %v912_v60, 16  ;;  %v933_v8 = vshrl.u32 %v914_v32, 16  ;;  %v2413_v21 = vor.u32 %v2821_v2, %v2412_v1 }
  0x62   : > { %1086 = vmatpush.bf16.msra.mxu1 %v2441_v36  ;;  %v3143_v6 = vld [vmem:[#allocation2 + $0xc] sm:$0x1]  ;;  %v2479_v11 = vld [vmem:[#allocation3 + $0x280] sm:$0xf]  ;;  %v2837_v12 = vld [vmem:[#allocation3 + $0x284] sm:$0xf0]  ;;  %v613_v36 = vsel %vm3122_vm11, %v2277_v61, %v612_v28 }
  0x63   : > { %1235 = vmatpush.bf16.msra.mxu2 %v2504_v38  ;;  %v762_v0 = vld [vmem:[#allocation2 + $0x18] sm:$0xf]  ;;  %v3145_v13 = vld [vmem:[#allocation3 + $0x284] sm:$0xf]  ;;  %v2481_v14 = vld [vmem:[#allocation3 + $0x288] sm:$0xf0]  ;;  %v2417_v38 = vor.u32 %v3139_v62, %v3141_v4  ;;  %v633_v57 = vunpack.c.l.b16 %v613_v36 }
  0x64   : > { %1253 = vmatpush.bf16.msra.mxu3 %v2508_v40  ;;  %1069 = vmatpush.bf16.msra.mxu0 %v2429_v44  ;;  %v785_v9 = vunpack.c.l.b16 %v762_v0  ;;  %v936_v17 = vshll.u32 %v914_v32, 16  ;;  %v3147_v18 = vld [vmem:[#allocation2 + $0x8] sm:$0xe]  ;;  %v2603_v19 = vld [vmem:[#allocation3 + $0x370] sm:$0xf]  ;;  %v3149_v22 = vrot.slane %v919_v3, 4  ;;  %v2480_v44 = vor.u32 %v2837_v12, %v2479_v11 }
  0x65   : > { %v928_v23 = vshll.u32 %v3143_v6, 16  ;;  %v3152_v24 = vld [vmem:[#allocation2 + $0x10] sm:$0xe]  ;;  %v2868_v25 = vld [vmem:[#allocation3 + $0x374] sm:$0xf0]  ;;  %v3156_v30 = vrot.slane %v922_v7, 5  ;;  %v2484_v45 = vor.u32 %v3145_v13, %v2481_v14  ;;  %v635_v12 = vpack.c.b16 %v633_v57, %v633_v57 }
  0x66   : > { %726 = vmatmul.bf16.vlgmr.msrb.gmra.mxu0 %v634_v50  ;;  %1087 = vmatpush.bf16.msra.mxu1 %v2433_v55  ;;  %v787_v26 = vpack.c.b16 %v785_v9, %v785_v9  ;;  %v3154_v29 = vld [vmem:[#allocation2 + $0x14] sm:$0x1]  ;;  %v3158_v31 = vrot.slane %v933_v8, 4  ;;  %v2867_v33 = vld [vmem:[#allocation3 + $0x374] sm:$0xf]  ;;  %v2604_v39 = vor.u32 %v2868_v25, %v2603_v19  ;;  %v938_v37 = vrot.slane %v936_v17, 5 }
  0x67   : > { %744 = vmatmul.bf16.vlgmr.msrb.gmra.mxu1 %v634_v50  ;;  %1236 = vmatpush.bf16.msra.mxu2 %v2496_v56  ;;  %v2605_v35 = vld [vmem:[#allocation3 + $0x378] sm:$0xf0]  ;;  %v2667_v40 = vld [vmem:[#allocation3 + $0x3f0] sm:$0xf]  ;;  %v2884_v42 = vld [vmem:[#allocation3 + $0x3f4] sm:$0xf0] }
  0x68   : > { %1254 = vmatpush.bf16.msra.mxu3 %v2500_v27  ;;  %1070 = vmatpush.bf16.msra.mxu0 %v2421_v63  ;;  %v2883_v43 = vld [vmem:[#allocation3 + $0x3f4] sm:$0xf]  ;;  %v2474_v46 = vrot.slane %v3147_v18, 9  ;;  %v2669_v47 = vld [vmem:[#allocation3 + $0x3f8] sm:$0xf0]  ;;  %v1117_v28 = vrot.slane %v3143_v6, 5  ;;  %v2608_v50 = vor.u32 %v2867_v33, %v2605_v35  ;;  %v2668_v52 = vor.u32 %v2884_v42, %v2667_v40 }
  0x69   : > { %v2595_v58 = vld [vmem:[#allocation3 + $0x360] sm:$0xf]  ;;  %v2475_v48 = vrot.slane %v3152_v24, 9  ;;  %v1121_v49 = vrot.slane %v3154_v29, 5  ;;  %v2866_v51 = vld [vmem:[#allocation3 + $0x364] sm:$0xf0]  ;;  %v2672_v53 = vor.u32 %v2883_v43, %v2669_v47  ;;  %v925_v27 = vor.u32 %v3156_v30, %v3149_v22 }
  0x6a   : > { %1088 = vmatpush.bf16.msra.mxu1 %v2425_v15  ;;  %v2865_v54 = vld [vmem:[#allocation3 + $0x364] sm:$0xf]  ;;  %v2597_v55 = vld [vmem:[#allocation3 + $0x368] sm:$0xf0]  ;;  %v2659_v56 = vld [vmem:[#allocation3 + $0x3e0] sm:$0xf]  ;;  %v2596_v59 = vor.u32 %v2866_v51, %v2595_v58  ;;  %v939_v63 = vor.u32 %v938_v37, %v3158_v31  ;;  %v1118_v13 = vsel %vm3122_vm11, %v2474_v46, %v1117_v28 }
  0x6b   : > { %1237 = vmatpush.bf16.msra.mxu2 %v2488_v16  ;;  %v2882_v60 = vld [vmem:[#allocation3 + $0x3e4] sm:$0xf0]  ;;  %v2881_v32 = vld [vmem:[#allocation3 + $0x3e4] sm:$0xf]  ;;  %v2661_v61 = vld [vmem:[#allocation3 + $0x3e8] sm:$0xf0]  ;;  %v2600_v0 = vor.u32 %v2865_v54, %v2597_v55 }
  0x6c   : > { %1255 = vmatpush.bf16.msra.mxu3 %v2492_v20  ;;  %1071 = vmatpush.bf16.msra.mxu0 %v2413_v21  ;;  %v942_v1 = vshll.u32 %v3154_v29, 16  ;;  %v225_v2 = vrot.slane %v3126_v10, 4  ;;  %v3176_v3 = vrot.slane %v928_v23, 5  ;;  %v2587_v62 = vld [vmem:[#allocation3 + $0x350] sm:$0xf]  ;;  %v2660_v6 = vor.u32 %v2882_v60, %v2659_v56 }
  0x6d   : > { %883 = vmatmul.bf16.gmra.mxu2 %v787_v26  ;;  %901 = vmatmul.bf16.gmra.mxu3 %v787_v26  ;;  %v2864_v4 = vld [vmem:[#allocation3 + $0x354] sm:$0xf0]  ;;  %v2664_v7 = vor.u32 %v2881_v32, %v2661_v61  ;;  %v2863_v8 = vld [vmem:[#allocation3 + $0x354] sm:$0xf]  ;;  %v2589_v9 = vld [vmem:[#allocation3 + $0x358] sm:$0xf0]  ;;  %v1122_v10 = vsel %vm3122_vm11, %v2475_v48, %v1121_v49  ;;  %v1144_v29 = vunpack.c.l.b16 %v1118_v13 }
  0x6e   : > { %1089 = vmatpush.bf16.msra.mxu1 %v2417_v38  ;;  %v2651_v11 = vld [vmem:[#allocation3 + $0x3d0] sm:$0xf]  ;;  %v2880_v14 = vld [vmem:[#allocation3 + $0x3d4] sm:$0xf0]  ;;  %v2879_v15 = vld [vmem:[#allocation3 + $0x3d4] sm:$0xf]  ;;  %v2588_v20 = vor.u32 %v2864_v4, %v2587_v62  ;;  %v2592_v22 = vor.u32 %v2863_v8, %v2589_v9  ;;  %v1145_v30 = vunpack.c.l.b16 %v1122_v10 }
  0x6f   : > { %1238 = vmatpush.bf16.msra.mxu2 %v2480_v44  ;;  %v2653_v16 = vld [vmem:[#allocation3 + $0x3d8] sm:$0xf0]  ;;  %v926_v17 = vrot.slane %v925_v27, 4  ;;  %v940_v18 = vrot.slane %v939_v63, 4  ;;  %v944_v19 = vrot.slane %v942_v1, 5  ;;  %v2652_v31 = vor.u32 %v2880_v14, %v2651_v11 }
  0x70   : > { %1384 = vmatpush.bf16.msrb.mxu0 %v2604_v39  ;;  %1256 = vmatpush.bf16.msra.mxu3 %v2484_v45  ;;  %v254_v21 = vld [vmem:[#allocation2 + $0x1c] sm:$0x1]  ;;  %v2579_v23 = vld [vmem:[#allocation3 + $0x340] sm:$0xf]  ;;  %v2862_v24 = vld [vmem:[#allocation3 + $0x344] sm:$0xf0]  ;;  %v2656_v33 = vor.u32 %v2879_v15, %v2653_v16  ;;  %v1147_v28 = vpack.c.b16 %v1145_v30, %v1144_v29 }
  0x71   : > { %v255_v25 = vsel %vm3064_vm5, %v225_v2, %v254_v21  ;;  %v916_v26 = vld [vmem:[#allocation2 + $0x18] sm:$0xf]  ;;  %v2861_v35 = vld [vmem:[#allocation3 + $0x344] sm:$0xf]  ;;  %v2581_v36 = vld [vmem:[#allocation3 + $0x348] sm:$0xf0]  ;;  %v2580_v42 = vor.u32 %v2862_v24, %v2579_v23  ;;  %v931_v47 = vsel %vm3090_vm8, %v926_v17, %v3176_v3  ;;  %v945_v58 = vsel %vm3090_vm8, %v940_v18, %v944_v19 }
  0x72   : > { %1402 = vmatpush.bf16.msrb.mxu1 %v2608_v50  ;;  %256 = vst [vmem:[#allocation2 + $0x1c] sm:$0x1] %v255_v25  ;;  %v2643_v38 = vld [vmem:[#allocation3 + $0x3c0] sm:$0xf]  ;;  %v947_v39 = vshrl.u32 %v916_v26, 16  ;;  %v950_v40 = vshll.u32 %v916_v26, 16  ;;  %v2584_v45 = vor.u32 %v2861_v35, %v2581_v36  ;;  %v977_v1 = vunpack.c.l.b16 %v931_v47 }
  0x73   : > { %1578 = vmatpush.bf16.msrb.mxu2 %v2668_v52  ;;  %v2878_v43 = vld [vmem:[#allocation3 + $0x3c4] sm:$0xf0]  ;;  %v2877_v41 = vld [vmem:[#allocation3 + $0x3c4] sm:$0xf]  ;;  %v2645_v44 = vld [vmem:[#allocation3 + $0x3c8] sm:$0xf0]  ;;  %v978_v2 = vunpack.c.l.b16 %v945_v58 }
  0x74   : > { %1596 = vmatpush.bf16.msrb.mxu3 %v2672_v53  ;;  %1385 = vmatpush.bf16.msrb.mxu0 %v2596_v59  ;;  %v2571_v37 = vld [vmem:[#allocation3 + $0x330] sm:$0xf]  ;;  %v2860_v46 = vld [vmem:[#allocation3 + $0x334] sm:$0xf0]  ;;  %v2859_v49 = vld [vmem:[#allocation3 + $0x334] sm:$0xf]  ;;  %v2644_v51 = vor.u32 %v2878_v43, %v2643_v38  ;;  %v2648_v52 = vor.u32 %v2877_v41, %v2645_v44 }
  0x75   : > { %v1108_v48 = vld [vmem:[#allocation2 + $0x18] sm:$0xe]  ;;  %v2573_v50 = vld [vmem:[#allocation3 + $0x338] sm:$0xf0]  ;;  %v949_v53 = vrot.slane %v947_v39, 4  ;;  %v952_v54 = vrot.slane %v950_v40, 5  ;;  %v2572_v57 = vor.u32 %v2860_v46, %v2571_v37 }
  0x76   : > { %1403 = vmatpush.bf16.msrb.mxu1 %v2600_v0  ;;  %731 = vmatmul.bf16.gmra.mxu0 %v635_v12  ;;  %v2635_v55 = vld [vmem:[#allocation3 + $0x3b0] sm:$0xf]  ;;  %v2876_v56 = vld [vmem:[#allocation3 + $0x3b4] sm:$0xf0]  ;;  %v2875_v59 = vld [vmem:[#allocation3 + $0x3b4] sm:$0xf]  ;;  %v2576_v61 = vor.u32 %v2859_v49, %v2573_v50 }
  0x77   : > { %1579 = vmatpush.bf16.msrb.mxu2 %v2660_v6  ;;  %749 = vmatmul.bf16.gmra.mxu1 %v635_v12  ;;  %v2637_v60 = vld [vmem:[#allocation3 + $0x3b8] sm:$0xf0]  ;;  %v2563_v27 = vld [vmem:[#allocation3 + $0x320] sm:$0xf]  ;;  %v2858_v63 = vld [vmem:[#allocation3 + $0x324] sm:$0xf0]  ;;  %v2636_v0 = vor.u32 %v2876_v56, %v2635_v55  ;;  %v953_v6 = vor.u32 %v952_v54, %v949_v53 }
  0x78   : > { %1597 = vmatpush.bf16.msrb.mxu3 %v2664_v7  ;;  %1386 = vmatpush.bf16.msrb.mxu0 %v2588_v20  ;;  %v2476_v3 = vrot.slane %v1108_v48, 9  ;;  %v2857_v62 = vld [vmem:[#allocation3 + $0x324] sm:$0xf]  ;;  %v2565_v4 = vld [vmem:[#allocation3 + $0x328] sm:$0xf0]  ;;  %v2640_v9 = vor.u32 %v2875_v59, %v2637_v60  ;;  %v2564_v11 = vor.u32 %v2858_v63, %v2563_v27  ;;  %v980_v20 = vpack.c.b16 %v978_v2, %v977_v1 }
  0x79   : > { %v917_v32 = vld [vmem:[#allocation2 + $0x1c] sm:$0x1]  ;;  %v2627_v12 = vld [vmem:[#allocation3 + $0x3a0] sm:$0xf]  ;;  %v2874_v13 = vld [vmem:[#allocation3 + $0x3a4] sm:$0xf0]  ;;  %v2568_v10 = vor.u32 %v2857_v62, %v2565_v4 }
  0x7a   : > { %1404 = vmatpush.bf16.msrb.mxu1 %v2592_v22  ;;  %v956_v7 = vshll.u32 %v917_v32, 16  ;;  %v1125_v8 = vrot.slane %v917_v32, 5  ;;  %v2873_v14 = vld [vmem:[#allocation3 + $0x3a4] sm:$0xf]  ;;  %v2629_v15 = vld [vmem:[#allocation3 + $0x3a8] sm:$0xf0] }
  0x7b   : > { %1580 = vmatpush.bf16.msrb.mxu2 %v2652_v31  ;;  %v2555_v16 = vld [vmem:[#allocation3 + $0x310] sm:$0xf]  ;;  %v2856_v17 = vld [vmem:[#allocation3 + $0x314] sm:$0xf0]  ;;  %v2855_v18 = vld [vmem:[#allocation3 + $0x314] sm:$0xf]  ;;  %v2628_v31 = vor.u32 %v2874_v13, %v2627_v12 }
  0x7c   : > { %1598 = vmatpush.bf16.msrb.mxu3 %v2656_v33  ;;  %1387 = vmatpush.bf16.msrb.mxu0 %v2580_v42  ;;  %v2557_v19 = vld [vmem:[#allocation3 + $0x318] sm:$0xf0]  ;;  %v3189_v21 = vrot.slane %v953_v6, 4  ;;  %v3191_v22 = vrot.slane %v956_v7, 5  ;;  %v1126_v23 = vsel %vm3122_vm11, %v2476_v3, %v1125_v8  ;;  %v2619_v24 = vld [vmem:[#allocation3 + $0x390] sm:$0xf]  ;;  %v2632_v33 = vor.u32 %v2873_v14, %v2629_v15 }
  0x7d   : > { %1239 = vmatmul.bf16.vlgmr.msra.gmra.mxu2 %v1147_v28  ;;  %1257 = vmatmul.bf16.vlgmr.msra.gmra.mxu3 %v1147_v28  ;;  %v2872_v25 = vld [vmem:[#allocation3 + $0x394] sm:$0xf0]  ;;  %v2871_v26 = vld [vmem:[#allocation3 + $0x394] sm:$0xf]  ;;  %v2621_v29 = vld [vmem:[#allocation3 + $0x398] sm:$0xf0]  ;;  %v2556_v39 = vor.u32 %v2856_v17, %v2555_v16  ;;  %v2560_v40 = vor.u32 %v2855_v18, %v2557_v19 }
  0x7e   : > { %1405 = vmatpush.bf16.msrb.mxu1 %v2584_v45  ;;  %v1426_v30 = vld [vmem:[#allocation2 + $0x10] sm:$0xf]  ;;  %v2547_v35 = vld [vmem:[#allocation3 + $0x300] sm:$0xf]  ;;  %v1428_v38 = vld [vmem:[#allocation2 + $0x18] sm:$0xf]  ;;  %v1146_v45 = vunpack.c.l.b16 %v1126_v23  ;;  %v2624_v53 = vor.u32 %v2871_v26, %v2621_v29  ;;  %v959_v63 = vsel %vm3090_vm8, %v3189_v21, %v3191_v22 }
  0x7f   : > { %1581 = vmatpush.bf16.msrb.mxu2 %v2644_v51  ;;  %v2854_v36 = vld [vmem:[#allocation3 + $0x304] sm:$0xf0]  ;;  %v2853_v42 = vld [vmem:[#allocation3 + $0x304] sm:$0xf]  ;;  %v2549_v43 = vld [vmem:[#allocation3 + $0x308] sm:$0xf0] }
  0x80   : > { %1599 = vmatpush.bf16.msrb.mxu3 %v2648_v52  ;;  %1388 = vmatpush.bf16.msrb.mxu0 %v2572_v57  ;;  %v1433_v41 = vshrl.u32 %v1426_v30, 16  ;;  %v1436_v44 = vshll.u32 %v1426_v30, 16  ;;  %v3195_v37 = vld [vmem:[#allocation2 + $0x14] sm:$0x1]  ;;  %v3197_v46 = vld [vmem:[#allocation2 + $0x1c] sm:$0x1]  ;;  %v2620_v52 = vor.u32 %v2872_v25, %v2619_v24  ;;  %v2548_v59 = vor.u32 %v2854_v36, %v2547_v35 }
  0x81   : > { %v1447_v47 = vshrl.u32 %v1428_v38, 16  ;;  %v1450_v58 = vshll.u32 %v1428_v38, 16  ;;  %v2611_v28 = vld [vmem:[#allocation3 + $0x380] sm:$0xf]  ;;  %v2734_v50 = vld [vmem:[#allocation3 + $0x470] sm:$0xf]  ;;  %v2552_v60 = vor.u32 %v2853_v42, %v2549_v43  ;;  %v1148_v1 = vpack.c.b16 %v1146_v45, %v1146_v45 }
  0x82   : > { %1406 = vmatpush.bf16.msrb.mxu1 %v2576_v61  ;;  %v1435_v48 = vrot.slane %v1433_v41, 4  ;;  %v1438_v49 = vrot.slane %v1436_v44, 5  ;;  %v2900_v51 = vld [vmem:[#allocation3 + $0x474] sm:$0xf0]  ;;  %v2899_v56 = vld [vmem:[#allocation3 + $0x474] sm:$0xf] }
  0x83   : > { %1582 = vmatpush.bf16.msrb.mxu2 %v2636_v0  ;;  %v1449_v54 = vrot.slane %v1447_v47, 4  ;;  %v1452_v55 = vrot.slane %v1450_v58, 5  ;;  %v2736_v57 = vld [vmem:[#allocation3 + $0x478] sm:$0xf0]  ;;  %v2870_v32 = vld [vmem:[#allocation3 + $0x384] sm:$0xf0]  ;;  %v2735_v4 = vor.u32 %v2900_v51, %v2734_v50 }
  0x84   : > { %1600 = vmatpush.bf16.msrb.mxu3 %v2640_v9  ;;  %1389 = vmatpush.bf16.msrb.mxu0 %v2564_v11  ;;  %v2869_v61 = vld [vmem:[#allocation3 + $0x384] sm:$0xf]  ;;  %v2613_v27 = vld [vmem:[#allocation3 + $0x388] sm:$0xf0]  ;;  %v1442_v2 = vshll.u32 %v3195_v37, 16  ;;  %v1456_v3 = vshll.u32 %v3197_v46, 16  ;;  %v1439_v0 = vor.u32 %v1438_v49, %v1435_v48  ;;  %v2739_v6 = vor.u32 %v2899_v56, %v2736_v57 }
  0x85   : > { %v1453_v62 = vor.u32 %v1452_v55, %v1449_v54  ;;  %v2726_v7 = vld [vmem:[#allocation3 + $0x460] sm:$0xf]  ;;  %v2612_v8 = vor.u32 %v2870_v32, %v2611_v28  ;;  %v2616_v9 = vor.u32 %v2869_v61, %v2613_v27  ;;  %v2898_v11 = vld [vmem:[#allocation3 + $0x464] sm:$0xf0]  ;;  %v2897_v12 = vld [vmem:[#allocation3 + $0x464] sm:$0xf] }
  0x86   : > { %1407 = vmatpush.bf16.msrb.mxu1 %v2568_v10  ;;  %1072 = vmatmul.bf16.vlgmr.msra.gmra.mxu0 %v980_v20  ;;  %v2728_v13 = vld [vmem:[#allocation3 + $0x468] sm:$0xf0]  ;;  %v979_v10 = vunpack.c.l.b16 %v959_v63  ;;  %v1444_v14 = vrot.slane %v1442_v2, 5  ;;  %v1458_v15 = vrot.slane %v1456_v3, 5  ;;  %v1440_v16 = vrot.slane %v1439_v0, 4 }
  0x87   : > { %1090 = vmatmul.bf16.vlgmr.msra.gmra.mxu1 %v980_v20  ;;  %1583 = vmatpush.bf16.msrb.mxu2 %v2628_v31  ;;  %v1454_v17 = vrot.slane %v1453_v62, 4  ;;  %v2727_v18 = vor.u32 %v2898_v11, %v2726_v7  ;;  %v2731_v19 = vor.u32 %v2897_v12, %v2728_v13  ;;  %v2718_v20 = vld [vmem:[#allocation3 + $0x450] sm:$0xf]  ;;  %v1430_v21 = vld [vmem:[#allocation2 + $0x20] sm:$0xf]  ;;  %vm1937_vm12 = vcmask 1041408  }
  0x88   : > { %1601 = vmatpush.bf16.msrb.mxu3 %v2632_v33  ;;  %1390 = vmatpush.bf16.msrb.mxu0 %v2556_v39  ;;  %v2896_v22 = vld [vmem:[#allocation3 + $0x454] sm:$0xf0]  ;;  %v2895_v23 = vld [vmem:[#allocation3 + $0x454] sm:$0xf]  ;;  %v2720_v24 = vld [vmem:[#allocation3 + $0x458] sm:$0xf0]  ;;  %v981_v25 = vpack.c.b16 %v979_v10, %v979_v10  ;;  %v1445_v26 = vsel %vm3090_vm8, %v1440_v16, %v1444_v14 }
  0x89   : > { %v1459_v29 = vsel %vm3090_vm8, %v1454_v17, %v1458_v15  ;;  %v1461_v30 = vshrl.u32 %v1430_v21, 16  ;;  %v1464_v31 = vshll.u32 %v1430_v21, 16  ;;  %v2719_v33 = vor.u32 %v2896_v22, %v2718_v20  ;;  %v2710_v36 = vld [vmem:[#allocation3 + $0x440] sm:$0xf]  ;;  %v2894_v38 = vld [vmem:[#allocation3 + $0x444] sm:$0xf0] }
  0x8a   : > { %1408 = vmatpush.bf16.msrb.mxu1 %v2560_v40  ;;  %v2723_v35 = vor.u32 %v2895_v23, %v2720_v24  ;;  %v2893_v39 = vld [vmem:[#allocation3 + $0x444] sm:$0xf]  ;;  %v2712_v40 = vld [vmem:[#allocation3 + $0x448] sm:$0xf0]  ;;  %v1491_v42 = vunpack.c.l.b16 %v1445_v26  ;;  %v1492_v43 = vunpack.c.l.b16 %v1459_v29  ;;  %v2711_v45 = vor.u32 %v2894_v38, %v2710_v36  ;;  %v3209_v58 = vld [vmem:[#allocation2 + $0x24] sm:$0x1] }
  0x8b   : > { %1584 = vmatpush.bf16.msrb.mxu2 %v2620_v52  ;;  %v1463_v41 = vrot.slane %v1461_v30, 4  ;;  %v1466_v44 = vrot.slane %v1464_v31, 5  ;;  %v2715_v47 = vor.u32 %v2893_v39, %v2712_v40  ;;  %v2702_v28 = vld [vmem:[#allocation3 + $0x430] sm:$0xf]  ;;  %v2892_v48 = vld [vmem:[#allocation3 + $0x434] sm:$0xf0] }
  0x8c   : > { %1602 = vmatpush.bf16.msrb.mxu3 %v2624_v53  ;;  %1391 = vmatpush.bf16.msrb.mxu0 %v2548_v59  ;;  %v2891_v49 = vld [vmem:[#allocation3 + $0x434] sm:$0xf]  ;;  %v2704_v50 = vld [vmem:[#allocation3 + $0x438] sm:$0xf0]  ;;  %v1494_v51 = vpack.c.b16 %v1492_v43, %v1491_v42  ;;  %v1470_v53 = vshll.u32 %v3209_v58, 16  ;;  %v2703_v54 = vor.u32 %v2892_v48, %v2702_v28  ;;  %v1639_v20 = vrot.slane %v3209_v58, 5 }
  0x8d   : > { %1244 = vmatmul.bf16.gmra.mxu2 %v1148_v1  ;;  %1262 = vmatmul.bf16.gmra.mxu3 %v1148_v1  ;;  %v1467_v52 = vor.u32 %v1466_v44, %v1463_v41  ;;  %v2707_v55 = vor.u32 %v2891_v49, %v2704_v50  ;;  %v2694_v56 = vld [vmem:[#allocation3 + $0x420] sm:$0xf]  ;;  %v2890_v57 = vld [vmem:[#allocation3 + $0x424] sm:$0xf0]  ;;  %v2889_v59 = vld [vmem:[#allocation3 + $0x424] sm:$0xf] }
  0x8e   : > { %1409 = vmatpush.bf16.msrb.mxu1 %v2552_v60  ;;  %v2696_v60 = vld [vmem:[#allocation3 + $0x428] sm:$0xf0]  ;;  %v1472_v61 = vrot.slane %v1470_v53, 5  ;;  %v2543_v27 = vld [vmem:[#allocation2 + $0x10] sm:$0xf]  ;;  %v2695_v1 = vor.u32 %v2890_v57, %v2694_v56  ;;  %v1631_v30 = vrot.slane %v3195_v37, 5 }
  0x8f   : > { %1585 = vmatpush.bf16.msrb.mxu2 %v2612_v8  ;;  %v1468_v32 = vrot.slane %v1467_v52, 4  ;;  %v2852_v63 = vld [vmem:[#allocation2 + $0x14] sm:$0xf0]  ;;  %v2699_v2 = vor.u32 %v2889_v59, %v2696_v60  ;;  %v2888_v0 = vld [vmem:[#allocation3 + $0x414] sm:$0xf0]  ;;  %vm2026_vm13 = vcmask 1041409  }
  0x90   : > { %1745 = vmatpush.bf16.msra.mxu0 %v2735_v4  ;;  %1603 = vmatpush.bf16.msrb.mxu3 %v2616_v9  ;;  %v2686_v3 = vld [vmem:[#allocation3 + $0x410] sm:$0xf]  ;;  %v2887_v62 = vld [vmem:[#allocation3 + $0x414] sm:$0xf]  ;;  %v2678_v11 = vld [vmem:[#allocation3 + $0x400] sm:$0xf] }
  0x91   : > { %v1473_v7 = vsel %vm3090_vm8, %v1468_v32, %v1472_v61  ;;  %v2687_v8 = vor.u32 %v2888_v0, %v2686_v3  ;;  %v2886_v12 = vld [vmem:[#allocation3 + $0x404] sm:$0xf0]  ;;  %v2885_v13 = vld [vmem:[#allocation3 + $0x404] sm:$0xf]  ;;  %v2680_v10 = vld [vmem:[#allocation3 + $0x408] sm:$0xf0] }
  0x92   : > { %1763 = vmatpush.bf16.msra.mxu1 %v2739_v6  ;;  %v1493_v14 = vunpack.c.l.b16 %v1473_v7  ;;  %v2679_v15 = vor.u32 %v2886_v12, %v2678_v11  ;;  %v2683_v16 = vor.u32 %v2885_v13, %v2680_v10  ;;  %v1276_v17 = vld [vmem:[#allocation2 + $0x20] sm:$0xf]  ;;  %v1620_v24 = vld [vmem:[#allocation2 + $0x10] sm:$0xe]  ;;  %vm2029_vm14 = vcmask 1042434  }
  0x93   : > { %2901 = vmatpush.bf16.msra.mxu2 %v2735_v4  ;;  %v2688_v4 = vld [vmem:[#allocation3 + $0x418] sm:$0xf0]  ;;  %v2673_v29 = vrot.slane %v1620_v24, 9  ;;  %vm2032_vm15 = vcmask 1043459  }
  0x94   : > { %2909 = vmatpush.bf16.msra.mxu3 %v2739_v6  ;;  %1746 = vmatpush.bf16.msra.mxu0 %v2727_v18  ;;  %v2544_v6 = vor.u32 %v2852_v63, %v2543_v27  ;;  %v2691_v9 = vor.u32 %v2887_v62, %v2688_v4  ;;  %v1495_v34 = vpack.c.b16 %v1493_v14, %v1493_v14 }
  0x95   : > { %v1632_v36 = vsel %vm3122_vm11, %v2673_v29, %v1631_v30 }
  0x96   : > { %1764 = vmatpush.bf16.msra.mxu1 %v2731_v19  ;;  %1077 = vmatmul.bf16.gmra.mxu0 %v981_v25  ;;  %v1658_v42 = vunpack.c.l.b16 %v1632_v36 }
  0x97   : > { %2902 = vmatpush.bf16.msra.mxu2 %v2727_v18  ;;  %1095 = vmatmul.bf16.gmra.mxu1 %v981_v25  ;;  %v1622_v18 = vld [vmem:[#allocation2 + $0x20] sm:$0xe]  ;;  %v1621_v25 = vld [vmem:[#allocation2 + $0x18] sm:$0xe] }
  0x98   : > { %2910 = vmatpush.bf16.msra.mxu3 %v2731_v19  ;;  %1747 = vmatpush.bf16.msra.mxu0 %v2719_v33  ;;  %v1299_v19 = vunpack.c.l.b16 %v1276_v17  ;;  %v2675_v21 = vrot.slane %v1622_v18, 9  ;;  %v2674_v31 = vrot.slane %v1621_v25, 9 }
  0x9a   : > { %1765 = vmatpush.bf16.msra.mxu1 %v2723_v35  ;;  %v1301_v22 = vpack.c.b16 %v1299_v19, %v1299_v19  ;;  %v1640_v23 = vsel %vm3122_vm11, %v2675_v21, %v1639_v20 }
  0x9b   : > { %2903 = vmatpush.bf16.msra.mxu2 %v2719_v33  ;;  %v1660_v26 = vunpack.c.l.b16 %v1640_v23  ;;  %v1635_v33 = vrot.slane %v3197_v46, 5 }
  0x9c   : > { %2911 = vmatpush.bf16.msra.mxu3 %v2723_v35  ;;  %1748 = vmatpush.bf16.msra.mxu0 %v2711_v45 }
  0x9d   : > { %1586 = vmatmul.bf16.vlgmr.msrb.gmra.mxu2 %v1494_v51  ;;  %1604 = vmatmul.bf16.vlgmr.msrb.gmra.mxu3 %v1494_v51  ;;  %v1662_v35 = vpack.c.b16 %v1660_v26, %v1660_v26  ;;  %v1636_v38 = vsel %vm3122_vm11, %v2674_v31, %v1635_v33 }
  0x9e   : > { %1766 = vmatpush.bf16.msra.mxu1 %v2715_v47  ;;  %v1659_v43 = vunpack.c.l.b16 %v1636_v38 }
  0x9f   : > { %2904 = vmatpush.bf16.msra.mxu2 %v2711_v45 }
  0xa0   : > { %2912 = vmatpush.bf16.msra.mxu3 %v2715_v47  ;;  %1749 = vmatpush.bf16.msra.mxu0 %v2703_v54  ;;  %v1661_v47 = vpack.c.b16 %v1659_v43, %v1658_v42 }
  0xa2   : > { %1767 = vmatpush.bf16.msra.mxu1 %v2707_v55 }
  0xa3   : > { %2905 = vmatpush.bf16.msra.mxu2 %v2703_v54 }
  0xa4   : > { %2913 = vmatpush.bf16.msra.mxu3 %v2707_v55  ;;  %1750 = vmatpush.bf16.msra.mxu0 %v2695_v1 }
  0xa6   : > { %1768 = vmatpush.bf16.msra.mxu1 %v2699_v2  ;;  %1392 = vmatmul.bf16.vlgmr.msrb.gmra.mxu0 %v2544_v6 }
  0xa7   : > { %2906 = vmatpush.bf16.msra.mxu2 %v2695_v1  ;;  %1410 = vmatmul.bf16.vlgmr.msrb.gmra.mxu1 %v2544_v6 }
  0xa8   : > { %2914 = vmatpush.bf16.msra.mxu3 %v2699_v2  ;;  %1751 = vmatpush.bf16.msra.mxu0 %v2687_v8 }
  0xaa   : > { %1769 = vmatpush.bf16.msra.mxu1 %v2691_v9 }
  0xab   : > { %2907 = vmatpush.bf16.msra.mxu2 %v2687_v8 }
  0xac   : > { %2915 = vmatpush.bf16.msra.mxu3 %v2691_v9  ;;  %1752 = vmatpush.bf16.msra.mxu0 %v2679_v15 }
  0xad   : > { %1591 = vmatmul.bf16.gmra.mxu2 %v1495_v34  ;;  %1609 = vmatmul.bf16.gmra.mxu3 %v1495_v34 }
  0xae   : > { %1770 = vmatpush.bf16.msra.mxu1 %v2683_v16 }
  0xaf   : > { %2908 = vmatpush.bf16.msra.mxu2 %v2679_v15 }
  0xb0   : > { %2916 = vmatpush.bf16.msra.mxu3 %v2683_v16 }
  0xb6   : > { %1397 = vmatmul.bf16.gmra.mxu0 %v1301_v22 }
  0xb7   : > { %1415 = vmatmul.bf16.gmra.mxu1 %v1301_v22 }
  0xba   : > { %v563_v39 = vpop.f32.mrf.mxu2  ;;  %v581_v40 = vpop.f32.mrf.mxu3 }
  0xbd   : > { %1758 = vmatmul.bf16.vlgmr.msra.gmra.mxu2 %v1662_v35  ;;  %1776 = vmatmul.bf16.vlgmr.msra.gmra.mxu3 %v1662_v35 }
  0xbf   : > { %v437_v41 = vpop.f32.mrf.mxu0  ;;  %v455_v44 = vpop.f32.mrf.mxu1 }
  0xc0   : > { %v564_v45 = vadd.f32 %v563_v39, %v437_v41  ;;  %v582_v37 = vadd.f32 %v581_v40, %v455_v44 }
  0xc2   : > { %v565_v58 = vpop.f32.mrf.mxu2  ;;  %v583_v46 = vpop.f32.mrf.mxu3 }
  0xc6   : > { %1753 = vmatmul.bf16.vlgmr.msra.gmra.mxu0 %v1661_v47 }
  0xc7   : > { %1771 = vmatmul.bf16.vlgmr.msra.gmra.mxu1 %v1661_v47  ;;  %v439_v28 = vpop.f32.mrf.mxu0  ;;  %v457_v48 = vpop.f32.mrf.mxu1 }
  0xc8   : > { %v566_v49 = vadd.f32 %v565_v58, %v439_v28  ;;  %v584_v5 = vadd.f32 %v583_v46, %v457_v48 }
  0xd0   : > { %v568_v50 = vpop.f32.mrf.mxu2  ;;  %v586_v51 = vpop.f32.mrf.mxu3 }
  0xd3   : > { %v442_v52 = vpop.f32.mrf.mxu0 }
  0xd4   : > { %v460_v53 = vpop.f32.mrf.mxu1  ;;  %v569_v54 = vadd.f32 %v568_v50, %v442_v52 }
  0xd5   : > { %v587_v55 = vadd.f32 %v586_v51, %v460_v53 }
  0xd8   : > { %v570_v56 = vpop.f32.mrf.mxu2  ;;  %v588_v57 = vpop.f32.mrf.mxu3 }
  0xdb   : > { %v444_v59 = vpop.f32.mrf.mxu0 }
  0xdc   : > { %v462_v60 = vpop.f32.mrf.mxu1 }
  0xe0   : > { %v879_v32 = vpop.f32.mrf.mxu2  ;;  %v897_v61 = vpop.f32.mrf.mxu3 }
  0xe3   : > { %v727_v27 = vpop.f32.mrf.mxu0 }
  0xe4   : > { %v745_v63 = vpop.f32.mrf.mxu1  ;;  %v754_v1 = vadd.f32 %v727_v27, %v564_v45 }
  0xe5   : > { %v755_v2 = vadd.f32 %v745_v63, %v582_v37 }
  0xe6   : > { %v906_v3 = vadd.f32 %v879_v32, %v754_v1 }
  0xe7   : > { %v907_v0 = vadd.f32 %v897_v61, %v755_v2 }
  0xe8   : > { %v881_v62 = vpop.f32.mrf.mxu2  ;;  %v899_v4 = vpop.f32.mrf.mxu3 }
  0xeb   : > { %v729_v6 = vpop.f32.mrf.mxu0 }
  0xec   : > { %v747_v7 = vpop.f32.mrf.mxu1  ;;  %v756_v8 = vadd.f32 %v729_v6, %v566_v49 }
  0xed   : > { %v757_v9 = vadd.f32 %v747_v7, %v584_v5 }
  0xee   : > { %v908_v11 = vadd.f32 %v881_v62, %v756_v8 }
  0xef   : > { %v909_v12 = vadd.f32 %v899_v4, %v757_v9 }
  0xf0   : > { %v884_v13 = vpop.f32.mrf.mxu2  ;;  %v902_v10 = vpop.f32.mrf.mxu3 }
  0xf3   : > { %v732_v14 = vpop.f32.mrf.mxu0 }
  0xf4   : > { %v750_v15 = vpop.f32.mrf.mxu1  ;;  %v758_v16 = vadd.f32 %v732_v14, %v569_v54  ;;  %v3234_v14 = vld [vmem:[%s3292_s2] ss:$0 sm:$0xff] }
  0xf5   : > { %v759_v34 = vadd.f32 %v750_v15, %v587_v55 }
  0xf6   : > { %v910_v17 = vadd.f32 %v884_v13, %v758_v16 }
  0xf7   : > { %v911_v18 = vadd.f32 %v902_v10, %v759_v34 }
  0xf8   : > { %v886_v19 = vpop.f32.mrf.mxu2  ;;  %v904_v20 = vpop.f32.mrf.mxu3 }
  0xfb   : > { %v734_v21 = vpop.f32.mrf.mxu0 }
  0xfc   : > { %v752_v22 = vpop.f32.mrf.mxu1  ;;  %v3237_v21 = vrot.slane %v3234_v14, 2 }
 0x100   : > { %v1240_v23 = vpop.f32.mrf.mxu2  ;;  %v1258_v24 = vpop.f32.mrf.mxu3 }
 0x103   : > { %v1073_v25 = vpop.f32.mrf.mxu0 }
 0x104   : > { %v1091_v26 = vpop.f32.mrf.mxu1  ;;  %v1100_v1 = vadd.f32 %v1073_v25, %v906_v3 }
 0x105   : > { %v1101_v2 = vadd.f32 %v1091_v26, %v907_v0 }
 0x106   : > { %v1267_v6 = vadd.f32 %v1240_v23, %v1100_v1 }
 0x107   : > { %v1268_v7 = vadd.f32 %v1258_v24, %v1101_v2 }
 0x108   : > { %v1242_v29 = vpop.f32.mrf.mxu2  ;;  %v1260_v30 = vpop.f32.mrf.mxu3 }
 0x10b   : > { %v1075_v31 = vpop.f32.mrf.mxu0 }
 0x10c   : > { %v1093_v33 = vpop.f32.mrf.mxu1  ;;  %v1102_v35 = vadd.f32 %v1075_v31, %v908_v11  ;;  %v1865_v31 = vrot.slane %v3234_v14, 1 }
 0x10d   : > { %v1103_v36 = vadd.f32 %v1093_v33, %v909_v12  ;;  %v1866_v33 = vrot.slane %v3237_v21, 1 }
 0x10e   : > { %v3223_v38 = vadd.f32 %v1242_v29, %v1102_v35 }
 0x10f   : > { %v3225_v39 = vadd.f32 %v1260_v30, %v1103_v36 }
 0x110   : > { %v1245_v40 = vpop.f32.mrf.mxu2  ;;  %v1263_v42 = vpop.f32.mrf.mxu3 }
 0x113   : > { %v1078_v43 = vpop.f32.mrf.mxu0 }
 0x114   : > { %v1096_v41 = vpop.f32.mrf.mxu1  ;;  %v1104_v44 = vadd.f32 %v1078_v43, %v910_v17 }
 0x115   : > { %v1105_v45 = vadd.f32 %v1096_v41, %v911_v18 }
 0x116   : > { %v1271_v37 = vadd.f32 %v1245_v40, %v1104_v44 }
 0x117   : > { %v1272_v47 = vadd.f32 %v1263_v42, %v1105_v45 }
 0x118   : > { %v1247_v58 = vpop.f32.mrf.mxu2  ;;  %v1265_v46 = vpop.f32.mrf.mxu3 }
 0x11b   : > { %v1080_v28 = vpop.f32.mrf.mxu0 }
 0x11c   : > { %v1098_v48 = vpop.f32.mrf.mxu1 }
 0x120   : > { %v1587_v49 = vpop.f32.mrf.mxu2  ;;  %v1605_v5 = vpop.f32.mrf.mxu3 }
 0x123   : > { %v1393_v50 = vpop.f32.mrf.mxu0 }
 0x124   : > { %v1411_v51 = vpop.f32.mrf.mxu1  ;;  %v1420_v11 = vadd.f32 %v1393_v50, %v1267_v6 }
 0x125   : > { %v1421_v12 = vadd.f32 %v1411_v51, %v1268_v7 }
 0x126   : > { %v1614_v34 = vadd.f32 %v1587_v49, %v1420_v11 }
 0x127   : > { %v1615_v3 = vadd.f32 %v1605_v5, %v1421_v12 }
 0x128   : > { %v3227_v52 = vpop.f32.mrf.mxu2  ;;  %v3229_v53 = vpop.f32.mrf.mxu3 }
 0x12b   : > { %v1395_v54 = vpop.f32.mrf.mxu0 }
 0x12c   : > { %v1413_v55 = vpop.f32.mrf.mxu1  ;;  %v1422_v46 = vadd.f32 %v1395_v54, %v3223_v38 }
 0x12d   : > { %v1423_v51 = vadd.f32 %v1413_v55, %v3225_v39 }
 0x12e   : > { %v1616_v1 = vadd.f32 %v3227_v52, %v1422_v46 }
 0x12f   : > { %v1617_v38 = vadd.f32 %v3229_v53, %v1423_v51  ;;  %v1863_v53 = vrot.slane %v3234_v14, 4 }
 0x130   : > { %v1592_v56 = vpop.f32.mrf.mxu2  ;;  %v1610_v57 = vpop.f32.mrf.mxu3 }
 0x133   : > { %v1398_v59 = vpop.f32.mrf.mxu0 }
 0x134   : > { %v1416_v60 = vpop.f32.mrf.mxu1  ;;  %v1424_v62 = vadd.f32 %v1398_v59, %v1271_v37 }
 0x135   : > { %v1425_v4 = vadd.f32 %v1416_v60, %v1272_v47 }
 0x136   : > { %v1618_v8 = vadd.f32 %v1592_v56, %v1424_v62 }
 0x137   : > { %v1619_v9 = vadd.f32 %v1610_v57, %v1425_v4 }
 0x138   : > { %v1594_v32 = vpop.f32.mrf.mxu2  ;;  %v1612_v61 = vpop.f32.mrf.mxu3 }
 0x13b   : > { %v1400_v27 = vpop.f32.mrf.mxu0 }
 0x13c   : > { %v1418_v63 = vpop.f32.mrf.mxu1 }
 0x140   : > { %v1759_v13 = vpop.f32.mrf.mxu2  ;;  %v1777_v10 = vpop.f32.mrf.mxu3 }
 0x141   : > { %v1785_v15 = vadd.f32 %v1759_v13, %v1618_v8  ;;  %v1786_v16 = vadd.f32 %v1777_v10, %v1619_v9 }
 0x143   : > { %v1754_v0 = vpop.f32.mrf.mxu0  ;;  %v1789_v18 = vmax.f32 %v1785_v15, %v1786_v16 }
 0x144   : > { %v1772_v17 = vpop.f32.mrf.mxu1  ;;  %v1781_v19 = vadd.f32 %v1754_v0, %v1614_v34 }
 0x145   : > { %v1782_v20 = vadd.f32 %v1772_v17, %v1615_v3  ;;  %v1799_v43 = vrot.slane %v1789_v18, 2  ;;  %v1800_v41 = vrot.slane %v1789_v18, 4  ;;  %v1801_v44 = vrot.slane %v1789_v18, 6 }
 0x146   : > { %v2748_v28 = vrot.slane %v1789_v18, 9  ;;  %v1864_v3 = vrot.slane %v3234_v14, 6 }
 0x147   : > { %v1787_v22 = vmax.f32 %v1781_v19, %v1782_v20  ;;  %v2749_v56 = vrot.slane %v1799_v43, 9  ;;  %v2750_v57 = vrot.slane %v1800_v41, 9  ;;  %v2751_v59 = vrot.slane %v1801_v44, 9 }
 0x148   : > { %v1761_v29 = vpop.f32.mrf.mxu2  ;;  %v1779_v30 = vpop.f32.mrf.mxu3  ;;  %v1855_v54 = vmax.f32 %v1789_v18, %v2748_v28 }
 0x149   : > { %v1793_v23 = vrot.slane %v1787_v22, 2  ;;  %v1794_v24 = vrot.slane %v1787_v22, 4  ;;  %v1795_v25 = vrot.slane %v1787_v22, 6  ;;  %v2740_v26 = vrot.slane %v1787_v22, 9 }
 0x14a   : > { %v1856_v39 = vmax.f32 %v1799_v43, %v2749_v56  ;;  %v1857_v55 = vmax.f32 %v1800_v41, %v2750_v57  ;;  %v1858_v8 = vmax.f32 %v1801_v44, %v2751_v59  ;;  %v1885_v17 = vadd.f32 %v3234_v14, %v1855_v54 }
 0x14b   : > { %v2741_v35 = vrot.slane %v1793_v23, 9  ;;  %v2742_v36 = vrot.slane %v1794_v24, 9  ;;  %v2743_v40 = vrot.slane %v1795_v25, 9  ;;  %v1847_v42 = vmax.f32 %v1787_v22, %v2740_v26  ;;  %v1756_v63 = vpop.f32.mrf.mxu0 }
 0x14c   : > { %v1774_v7 = vpop.f32.mrf.mxu1  ;;  %v1783_v9 = vadd.f32 %v1756_v63, %v1616_v1  ;;  %v1886_v18 = vadd.f32 %v1865_v31, %v1856_v39  ;;  %v1887_v19 = vadd.f32 %v3237_v21, %v1857_v55  ;;  %v3255_v20 = vadd.f32 %v1866_v33, %v1858_v8 }
 0x14d   : > { %v1848_v45 = vmax.f32 %v1793_v23, %v2741_v35  ;;  %v1849_v37 = vmax.f32 %v1794_v24, %v2742_v36  ;;  %v1850_v47 = vmax.f32 %v1795_v25, %v2743_v40  ;;  %v1877_v58 = vadd.f32 %v3234_v14, %v1847_v42 }
 0x14e   : > { %v1784_v52 = vadd.f32 %v1774_v7, %v1617_v38  ;;  %v1867_v26 = vrot.slane %v1863_v53, 1  ;;  %v1868_v29 = vrot.slane %v1864_v3, 1  ;;  %v1897_v42 = vmax.f32 %v1885_v17, 0.0 }
 0x14f   : > { %v1878_v48 = vadd.f32 %v1865_v31, %v1848_v45  ;;  %v1879_v49 = vadd.f32 %v3237_v21, %v1849_v37  ;;  %v1880_v5 = vadd.f32 %v1866_v33, %v1850_v47  ;;  %v1889_v50 = vmax.f32 %v1877_v58, 0.0 }
 0x150   : > { %v1788_v0 = vmax.f32 %v1783_v9, %v1784_v52  ;;  %v1898_v43 = vmax.f32 %v1886_v18, 0.0  ;;  %v1899_v41 = vmax.f32 %v1887_v19, 0.0  ;;  %v1900_v14 = vmax.f32 %v3255_v20, 0.0 }
 0x151   : > { %v1890_v60 = vmax.f32 %v1878_v48, 0.0  ;;  %v1891_v32 = vmax.f32 %v1879_v49, 0.0  ;;  %v1892_v61 = vmax.f32 %v1880_v5, 0.0  ;;  %v1901_v27 = vpack.c.bf16 %v1889_v50, %v1889_v50 }
 0x152   : > { %v1796_v22 = vrot.slane %v1788_v0, 2  ;;  %v1797_v23 = vrot.slane %v1788_v0, 4  ;;  %v1798_v24 = vrot.slane %v1788_v0, 6  ;;  %v2744_v25 = vrot.slane %v1788_v0, 9 }
 0x153   : > { %v1902_v2 = vpack.c.bf16 %v1890_v60, %v1890_v60  ;;  %v1903_v62 = vpack.c.bf16 %v1891_v32, %v1891_v32  ;;  %v1904_v4 = vpack.c.bf16 %v1892_v61, %v1892_v61  ;;  %v1925_v6 = vrot.slane %v1901_v27, 2 }
 0x154   : > { %v2745_v30 = vrot.slane %v1796_v22, 9  ;;  %v2746_v35 = vrot.slane %v1797_v23, 9  ;;  %v2747_v36 = vrot.slane %v1798_v24, 9  ;;  %v1851_v40 = vmax.f32 %v1788_v0, %v2744_v25 }
 0x155   : > { %v1926_v11 = vrot.slane %v1902_v2, 2  ;;  %v1927_v12 = vrot.slane %v1903_v62, 2  ;;  %v1928_v13 = vrot.slane %v1904_v4, 2  ;;  %v1940_v10 = vsel %vm1937_vm12, %v1901_v27, %v1925_v6 }
 0x156   : > { %1974 = vst [vmem:[#allocation1] ss:$2 sm:$0xff] %v1940_v10  ;;  %v1852_v31 = vmax.f32 %v1796_v22, %v2745_v30  ;;  %v1853_v21 = vmax.f32 %v1797_v23, %v2746_v35  ;;  %v1854_v33 = vmax.f32 %v1798_v24, %v2747_v36  ;;  %v1881_v44 = vadd.f32 %v1863_v53, %v1851_v40 }
 0x157   : > { %v1943_v15 = vsel %vm1937_vm12, %v1902_v2, %v1926_v11  ;;  %v1946_v16 = vsel %vm1937_vm12, %v1903_v62, %v1927_v12  ;;  %v1949_v34 = vsel %vm1937_vm12, %v1904_v4, %v1928_v13  ;;  %v1909_v2 = vpack.c.bf16 %v1897_v42, %v1897_v42 }
 0x158   : > { %1978 = vst [vmem:[#allocation1 + $0x10] ss:$2 sm:$0xff] %v1943_v15  ;;  %v1882_v47 = vadd.f32 %v1867_v26, %v1852_v31  ;;  %v1883_v58 = vadd.f32 %v1864_v3, %v1853_v21  ;;  %v1884_v46 = vadd.f32 %v1868_v29, %v1854_v33  ;;  %v1893_v28 = vmax.f32 %v1881_v44, 0.0 }
 0x159   : > { %1982 = vst [vmem:[#allocation1 + $0x20] ss:$2 sm:$0xff] %v1946_v16  ;;  %v1910_v8 = vpack.c.bf16 %v1898_v43, %v1898_v43  ;;  %v1911_v52 = vpack.c.bf16 %v1899_v41, %v1899_v41  ;;  %v1912_v15 = vpack.c.bf16 %v1900_v14, %v1900_v14  ;;  %v1933_v16 = vrot.slane %v1909_v2, 2 }
 0x15a   : > { %1986 = vst [vmem:[#allocation1 + $0x30] ss:$2 sm:$0xff] %v1949_v34  ;;  %v1894_v51 = vmax.f32 %v1882_v47, 0.0  ;;  %v1895_v56 = vmax.f32 %v1883_v58, 0.0  ;;  %v1896_v57 = vmax.f32 %v1884_v46, 0.0  ;;  %v1905_v59 = vpack.c.bf16 %v1893_v28, %v1893_v28 }
 0x15b   : > { %v1934_v3 = vrot.slane %v1910_v8, 2  ;;  %v1935_v0 = vrot.slane %v1911_v52, 2  ;;  %v1936_v18 = vrot.slane %v1912_v15, 2  ;;  %v1964_v19 = vsel %vm1937_vm12, %v1909_v2, %v1933_v16 }
 0x15c   : > { %v1906_v63 = vpack.c.bf16 %v1894_v51, %v1894_v51  ;;  %v1907_v1 = vpack.c.bf16 %v1895_v56, %v1895_v56  ;;  %v1908_v38 = vpack.c.bf16 %v1896_v57, %v1896_v57  ;;  %v1929_v54 = vrot.slane %v1905_v59, 2 }
 0x15d   : > { %v1975_v45 = vld.sshfl [vmem:[#allocation1] sm:$0xff pattern:$0x75643120]  ;;  %v1967_v22 = vsel %vm1937_vm12, %v1910_v8, %v1934_v3  ;;  %v1970_v24 = vsel %vm1937_vm12, %v1911_v52, %v1935_v0  ;;  %v1973_v29 = vsel %vm1937_vm12, %v1912_v15, %v1936_v18 }
 0x15e   : > { %v2013_v60 = vunpack.c.l.b16 %v1975_v45  ;;  %v1930_v6 = vrot.slane %v1906_v63, 2  ;;  %v1931_v7 = vrot.slane %v1907_v1, 2  ;;  %v1932_v39 = vrot.slane %v1908_v38, 2 }
 0x15f   : > { %v1979_v37 = vld.sshfl [vmem:[#allocation1 + $0x10] sm:$0xff pattern:$0x75643120]  ;;  %v1952_v55 = vsel %vm1937_vm12, %v1905_v59, %v1929_v54 }
 0x160   : > { %v1983_v48 = vld.sshfl [vmem:[#allocation1 + $0x20] sm:$0xff pattern:$0x75643120]  ;;  %v2014_v5 = vunpack.c.l.b16 %v1979_v37  ;;  %1989 = vst [vmem:[#allocation1] ss:$2 sm:$0xff] %v1952_v55  ;;  %v1955_v11 = vsel %vm1937_vm12, %v1906_v63, %v1930_v6  ;;  %v1958_v12 = vsel %vm1937_vm12, %v1907_v1, %v1931_v7  ;;  %v1961_v13 = vsel %vm1937_vm12, %v1908_v38, %v1932_v39 }
 0x161   : > { %v1987_v49 = vld.sshfl [vmem:[#allocation1 + $0x30] sm:$0xff pattern:$0x75643120]  ;;  %v2015_v50 = vunpack.c.l.b16 %v1983_v48  ;;  %1992 = vst [vmem:[#allocation1 + $0x10] ss:$2 sm:$0xff] %v1955_v11 }
 0x162   : > { %v2016_v32 = vunpack.c.l.b16 %v1987_v49  ;;  %v2025_v61 = vrot.slane %v2014_v5, 7  ;;  %1995 = vst [vmem:[#allocation1 + $0x20] ss:$2 sm:$0xff] %v1958_v12 }
 0x163   : > { %v2028_v27 = vrot.slane %v2015_v50, 6  ;;  %1998 = vst [vmem:[#allocation1 + $0x30] ss:$2 sm:$0xff] %v1961_v13 }
 0x164   : > { %v2027_v62 = vsel %vm2026_vm13, %v2025_v61, %v2013_v60  ;;  %v2031_v4 = vrot.slane %v2016_v32, 5 }
 0x165   : > { %v2030_v9 = vsel %vm2029_vm14, %v2028_v27, %v2027_v62 }
 0x166   : > { %v2033_v10 = vsel %vm2032_vm15, %v2031_v4, %v2030_v9 }
 0x167   : > { %v2046_v53 = vpack.c.b16 %v2033_v10, %v2033_v10  ;;  %v1990_v20 = vld.sshfl [vmem:[#allocation1] sm:$0xff pattern:$0x75643120] }
 0x168   : > { %2001 = vst [vmem:[#allocation1] ss:$2 sm:$0xff] %v1964_v19  ;;  %v1993_v23 = vld.sshfl [vmem:[#allocation1 + $0x10] sm:$0xff pattern:$0x75643120]  ;;  %v2017_v36 = vunpack.c.l.b16 %v1990_v20 }
 0x169   : > { %v2049_v34 = vrot.slane %v2046_v53, 2  ;;  %v1996_v25 = vld.sshfl [vmem:[#allocation1 + $0x20] sm:$0xff pattern:$0x75643120]  ;;  %2004 = vst [vmem:[#allocation1 + $0x10] ss:$2 sm:$0xff] %v1967_v22  ;;  %v2018_v26 = vunpack.c.l.b16 %v1993_v23 }
 0x16a   : > { %v1999_v30 = vld.sshfl [vmem:[#allocation1 + $0x30] sm:$0xff pattern:$0x75643120]  ;;  %2007 = vst [vmem:[#allocation1 + $0x20] ss:$2 sm:$0xff] %v1970_v24  ;;  %v2019_v35 = vunpack.c.l.b16 %v1996_v25 }
 0x16b   : > { %v2054_v17 = vsel %vm1937_vm12, %v2046_v53, %v2049_v34  ;;  %2010 = vst [vmem:[#allocation1 + $0x30] ss:$2 sm:$0xff] %v1973_v29  ;;  %v2020_v40 = vunpack.c.l.b16 %v1999_v30  ;;  %v2034_v42 = vrot.slane %v2018_v26, 7 }
 0x16c   : > { %2064 = vst [vmem:[%s3269_s30] sm:$0x3] %v2054_v17  ;;  %v2036_v43 = vrot.slane %v2019_v35, 6 }
 0x16d   : > { %v2035_v41 = vsel %vm2026_vm13, %v2034_v42, %v2017_v36  ;;  %v2038_v14 = vrot.slane %v2020_v40, 5 }
 0x16e   : > { %v2037_v31 = vsel %vm2029_vm14, %v2036_v43, %v2035_v41 }
 0x16f   : > { %v2039_v21 = vsel %vm2032_vm15, %v2038_v14, %v2037_v31  ;;  %v2002_v33 = vld.sshfl [vmem:[#allocation1] sm:$0xff pattern:$0x75643120] }
 0x170   : > { %v2005_v44 = vld.sshfl [vmem:[#allocation1 + $0x10] sm:$0xff pattern:$0x75643120]  ;;  %v2047_v45 = vpack.c.b16 %v2039_v21, %v2039_v21  ;;  %v2021_v48 = vunpack.c.l.b16 %v2002_v33 }
 0x171   : > { %v2008_v37 = vld.sshfl [vmem:[#allocation1 + $0x20] sm:$0xff pattern:$0x75643120]  ;;  %v2022_v47 = vunpack.c.l.b16 %v2005_v44 }
 0x172   : > { %v2011_v58 = vld.sshfl [vmem:[#allocation1 + $0x30] sm:$0xff pattern:$0x75643120]  ;;  %v2023_v46 = vunpack.c.l.b16 %v2008_v37  ;;  %v2050_v28 = vrot.slane %v2047_v45, 2 }
 0x173   : > { %v2024_v49 = vunpack.c.l.b16 %v2011_v58  ;;  %v2040_v5 = vrot.slane %v2022_v47, 7 }
 0x174   : > { %v2042_v50 = vrot.slane %v2023_v46, 6  ;;  %v2057_v51 = vsel %vm1937_vm12, %v2047_v45, %v2050_v28 }
 0x175   : > { %v2041_v56 = vsel %vm2026_vm13, %v2040_v5, %v2021_v48  ;;  %v2044_v57 = vrot.slane %v2024_v49, 5  ;;  %2065 = vst [vmem:[%s3269_s30 + $0x2] sm:$0x3] %v2057_v51 }
 0x176   : > { %v2043_v59 = vsel %vm2029_vm14, %v2042_v50, %v2041_v56 }
 0x177   : > { %v2045_v60 = vsel %vm2032_vm15, %v2044_v57, %v2043_v59 }
 0x178   : > { %v2048_v32 = vpack.c.b16 %v2045_v60, %v2045_v60 }
 0x17a   : > { %v2051_v61 = vrot.slane %v2048_v32, 2 }
 0x17c   : > { %v2060_v27 = vsel %vm1937_vm12, %v2048_v32, %v2051_v61 }
 0x17d   : > { %2066 = vst [vmem:[%s3269_s30 + $0x4] sm:$0x3] %v2060_v27 }
 0x17e PF: > { %s14_s12 = sadd.s32 1, %s2982_s12  }
 0x17f   : > { %p11_p7 = scmp.ge.s32.totalorder %s14_s12, 4  }
 0x181   :  { %13 = sbr.rel (!%p11_p7) target bundleno = 1 (0x1), region = 80 }
 0x186   :  { %2088 = vsyncpa [#allocation4], 1 }
 0x187   :  { %2090 = vsyncpa [#allocation4 + $0x1], 1 }

</bundles_post_ra>
